<compile_context>
chip_gen: v6e
topology: v6e:2x2x1
jax: 0.10.0
libtpu: 0.0.40
codegen_flags: <defaults>
</compile_context>

<pallas_src>
import jax
import jax.numpy as jnp
from jax.experimental import pallas as pl
from jax.experimental.pallas import tpu as pltpu


def _conv1x1_kernel(wq_ref, ws_ref, x_ref, o_ref):
    # W_q:(C_out,C_in) int8, X:(C_in,HW) f32.  Dequant cast int8->bf16 (exact),
    # cast X to bf16 in-register, MXU bf16xbf16 matmul with f32 accumulation,
    # then apply the per-C_out dequant scale to the small result tile.
    acc = jnp.dot(
        wq_ref[...].astype(jnp.bfloat16),
        x_ref[...].astype(jnp.bfloat16),
        preferred_element_type=jnp.float32,
    )
    o_ref[...] = (acc * ws_ref[...]).astype(o_ref.dtype)


def conv1x1_pallas(x_nchw, w_q_int8, w_scale):
    """x_nchw: (1, C_in, H, W) f32; w_q_int8: (C_out, C_in) int8;
    w_scale: (C_out, 1) f32 per-output-channel dequant scale."""
    N, C_in, H, W = x_nchw.shape
    C_out = w_q_int8.shape[0]
    assert N == 1, "module spec is batch=1; NCHW-native GEMM path assumes N==1"
    assert w_q_int8.shape == (C_out, C_in)
    assert w_scale.shape == (C_out, 1)
    HW = H * W

    # Free reshape (no data movement): NCHW with N==1 -> (C_in, H*W).
    x_mat = x_nchw.reshape(C_in, HW)

    bytes_accessed = (
        w_q_int8.size * 1        # int8 weight
        + w_scale.size * 4       # f32 scales
        + C_in * HW * 4          # f32 activations
        + C_out * HW * 4         # f32 output
    )

    y_mat = pl.pallas_call(
        _conv1x1_kernel,
        out_shape=jax.ShapeDtypeStruct((C_out, HW), jnp.float32),
        # No grid: single invocation, full arrays resident in VMEM.
        in_specs=[
            pl.BlockSpec(memory_space=pltpu.MemorySpace.VMEM),  # W_q int8
            pl.BlockSpec(memory_space=pltpu.MemorySpace.VMEM),  # scale
            pl.BlockSpec(memory_space=pltpu.MemorySpace.VMEM),  # X
        ],
        out_specs=pl.BlockSpec(memory_space=pltpu.MemorySpace.VMEM),
        # Let XLA fuse X's (elementwise/reshape) producer into this operand
        # instead of materializing it in HBM; one bool per input operand.
        compiler_params=pltpu.CompilerParams(
            allow_input_fusion=[False, False, True],
        ),
        cost_estimate=pl.CostEstimate(
            flops=2 * C_out * C_in * HW,
            transcendentals=0,
            bytes_accessed=bytes_accessed,
        ),
    )(w_q_int8, w_scale, x_mat)

    # Free reshape back to the NCHW output convention.
    return y_mat.reshape(N, C_out, H, W)


def quantize_weight_int8(w_mat_f32):
    """One-time weight prep (outside the hot path): per-output-channel
    symmetric int8 quantization.  Returns (int8 weight, f32 scale (C_out,1))."""
    absmax = jnp.max(jnp.abs(w_mat_f32), axis=1, keepdims=True)
    scale = jnp.where(absmax > 0, absmax / 127.0, 1.0).astype(jnp.float32)
    w_q = jnp.clip(jnp.round(w_mat_f32 / scale), -127, 127).astype(jnp.int8)
    return w_q, scale


if __name__ == "__main__":
    key = jax.random.PRNGKey(0)
    kx, kw = jax.random.split(key)

    # Shapes implied by the module: x (1, 1824, 7, 7), weight (304, 1824, 1, 1).
    x = jax.random.normal(kx, (1, 1824, 7, 7), dtype=jnp.float32)
    w = (jax.random.normal(kw, (304, 1824, 1, 1), dtype=jnp.float32)
         * (1.0 / jnp.sqrt(1824.0)))  # deterministic, roughly kaiming-scaled

    # One-time inference weight prep: (C_out, C_in) int8 + per-row f32 scale.
    w_mat = w.reshape(304, 1824)
    w_q, w_scale = quantize_weight_int8(w_mat)

    fwd = jax.jit(conv1x1_pallas)
    y = fwd(x, w_q, w_scale)
    jax.block_until_ready(y)
    assert y.shape == (1, 304, 7, 7)

    x_mat = x.reshape(1824, 49)

    # Check 1 (tight): kernel math vs a plain-JAX reference at the same
    # precision (int8 weight, bf16-rounded activations, f32 accumulate).
    y_q_ref = (
        jnp.dot(w_q.astype(jnp.float32),
                x_mat.astype(jnp.bfloat16).astype(jnp.float32))
        * w_scale
    ).reshape(1, 304, 7, 7)
    assert jnp.allclose(y, y_q_ref, atol=1e-2, rtol=1e-2)

    # Check 2 (loose): vs the true f32 Conv2d math — bounds the inference-grade
    # quantization/bf16 error against the original module semantics.
    y_true = jnp.dot(w_mat, x_mat).reshape(1, 304, 7, 7)
    assert jnp.allclose(y, y_true, atol=0.15, rtol=0.05)

    print("KERNEL_OK")
</pallas_src>

<mosaic_0001>
module attributes {stable_mosaic.version = 11 : i64} {
  func.func @_conv1x1_kernel(%arg0: memref<304x1824xi8, #tpu.memory_space<vmem>>, %arg1: memref<304x1xf32, #tpu.memory_space<vmem>>, %arg2: memref<1824x49xf32, #tpu.memory_space<vmem>>, %arg3: memref<304x49xf32, #tpu.memory_space<vmem>>) attributes {dimension_semantics = [], scalar_prefetch = 0 : i64, scratch_operands = 0 : i64, tpu.core_type = #tpu.core_type<tc>} {
    %c0 = arith.constant 0 : index
    %c0_0 = arith.constant 0 : index
    %0 = vector.load %arg0[%c0, %c0_0] : memref<304x1824xi8, #tpu.memory_space<vmem>>, vector<304x1824xi8>
    %1 = arith.sitofp %0 : vector<304x1824xi8> to vector<304x1824xbf16>
    %c0_1 = arith.constant 0 : index
    %c0_2 = arith.constant 0 : index
    %2 = vector.load %arg2[%c0_1, %c0_2] : memref<1824x49xf32, #tpu.memory_space<vmem>>, vector<1824x49xf32>
    %3 = arith.truncf %2 : vector<1824x49xf32> to vector<1824x49xbf16>
    %cst = arith.constant dense<0.000000e+00> : vector<304x49xf32>
    %4 = tpu.matmul %1, %3, %cst {dimension_numbers = #tpu.dot_dimension_numbers<[1], [0], [0], [1], [0, 0, 1, 1], [], []>} : vector<304x1824xbf16>, vector<1824x49xbf16>, vector<304x49xf32> -> vector<304x49xf32>
    %c0_3 = arith.constant 0 : index
    %c0_4 = arith.constant 0 : index
    %5 = vector.load %arg1[%c0_3, %c0_4] : memref<304x1xf32, #tpu.memory_space<vmem>>, vector<304x1xf32>
    %6 = vector.broadcast %5 : vector<304x1xf32> to vector<304x49xf32>
    %7 = arith.mulf %4, %6 : vector<304x49xf32>
    %c0_5 = arith.constant 0 : index
    %c0_6 = arith.constant 0 : index
    %8 = vector.load %arg3[%c0_5, %c0_6] : memref<304x49xf32, #tpu.memory_space<vmem>>, vector<304x49xf32>
    tpu.vector_store %arg3[%c0_5, %c0_6], %7 {strides = array<i32>} : memref<304x49xf32, #tpu.memory_space<vmem>>, vector<304x49xf32>,
    return
  }
}

</mosaic_0001>

<bundles_post_ra>
// kernel: conv1x1_pallas.1
= control target key start
LH: loop header
LB: loop body
LE: loop exit
PB: predicated region body
PF: predicated region fallthrough
CT: control target
= control target key end

     0   :  { %v4495_v0 = vmov 0   ;;  %vm4497_vm0 = vmmov 0   ;;  %vm2238_vm1 = vcmask 261120   ;;  %vm4042_vm2 = vcmask 400384   ;;  %s6603_s2 = inlined_call_operand.vmem [shape: f32[1824,49], index: 2, kind: input, shape index: {}]   ;;  %s6604_s0 = inlined_call_operand.vmem [shape: s8[304,1824], index: 0, kind: input, shape index: {}]   ;;  %s6605_s1 = inlined_call_operand.vmem [shape: f32[304,1], index: 1, kind: input, shape index: {}]   ;;  %s6606_s3 = inlined_call_operand.vmem [shape: f32[304,49], index: 3, kind: output, shape index: {}]  }
   0x1   :  { %2296 = vmatprep.subr.bf16.mxu0 %v4495_v0  ;;  %2481 = vmatprep.subr.bf16.mxu1 %v4495_v0  ;;  %v485_v1 = vld [vmem:[%s6603_s2 + $0x70] sm:$0xff]  ;;  %v486_v2 = vld [vmem:[%s6603_s2 + $0x78] sm:$0xff]  ;;  %v483_v6 = vld [vmem:[%s6603_s2 + $0x60] sm:$0xff] }
   0x2   :  { %v517_v3 = vld [vmem:[%s6603_s2 + $0x170] sm:$0xff]  ;;  %v706_v4 = vpack.c.bf16 %v486_v2, %v485_v1  ;;  %v518_v5 = vld [vmem:[%s6603_s2 + $0x178] sm:$0xff]  ;;  %v484_v7 = vld [vmem:[%s6603_s2 + $0x68] sm:$0xff]  ;;  %4493 = vset.pattern.permute.xlu0 %v4495_v0  ;;  %4494 = vset.pattern.permute.xlu1 %v4495_v0 }
   0x3   :  { %v722_v8 = vpack.c.bf16 %v518_v5, %v517_v3  ;;  %v515_v9 = vld [vmem:[%s6603_s2 + $0x160] sm:$0xff]  ;;  %v516_v10 = vld [vmem:[%s6603_s2 + $0x168] sm:$0xff]  ;;  %v705_v11 = vpack.c.bf16 %v484_v7, %v483_v6  ;;  %v481_v13 = vld [vmem:[%s6603_s2 + $0x50] sm:$0xff] }
   0x4   :  { %2297 = vmatpush1.bf16.msra.mxu0 %v706_v4  ;;  %v721_v12 = vpack.c.bf16 %v516_v10, %v515_v9  ;;  %v482_v14 = vld [vmem:[%s6603_s2 + $0x58] sm:$0xff]  ;;  %v513_v15 = vld [vmem:[%s6603_s2 + $0x150] sm:$0xff]  ;;  %v479_v19 = vld [vmem:[%s6603_s2 + $0x40] sm:$0xff] }
   0x5   :  { %2482 = vmatpush1.bf16.msra.mxu1 %v722_v8  ;;  %2298 = vmatprep.subr.bf16.mxu0 %v4495_v0  ;;  %v514_v16 = vld [vmem:[%s6603_s2 + $0x158] sm:$0xff]  ;;  %v704_v17 = vpack.c.bf16 %v482_v14, %v481_v13  ;;  %v480_v20 = vld [vmem:[%s6603_s2 + $0x48] sm:$0xff]  ;;  %v511_v21 = vld [vmem:[%s6603_s2 + $0x140] sm:$0xff] }
   0x6   :  { %2483 = vmatprep.subr.bf16.mxu1 %v4495_v0  ;;  %v720_v18 = vpack.c.bf16 %v514_v16, %v513_v15  ;;  %v512_v22 = vld [vmem:[%s6603_s2 + $0x148] sm:$0xff]  ;;  %v703_v23 = vpack.c.bf16 %v480_v20, %v479_v19  ;;  %v477_v25 = vld [vmem:[%s6603_s2 + $0x30] sm:$0xff]  ;;  %v478_v26 = vld [vmem:[%s6603_s2 + $0x38] sm:$0xff] }
   0x7   :  { %v719_v24 = vpack.c.bf16 %v512_v22, %v511_v21  ;;  %v509_v27 = vld [vmem:[%s6603_s2 + $0x130] sm:$0xff]  ;;  %v510_v28 = vld [vmem:[%s6603_s2 + $0x138] sm:$0xff]  ;;  %v702_v29 = vpack.c.bf16 %v478_v26, %v477_v25  ;;  %v475_v31 = vld [vmem:[%s6603_s2 + $0x20] sm:$0xff] }
   0x8   :  { %2299 = vmatpush1.bf16.msra.mxu0 %v705_v11  ;;  %v718_v30 = vpack.c.bf16 %v510_v28, %v509_v27  ;;  %v476_v32 = vld [vmem:[%s6603_s2 + $0x28] sm:$0xff]  ;;  %v507_v33 = vld [vmem:[%s6603_s2 + $0x120] sm:$0xff]  ;;  %v473_v37 = vld [vmem:[%s6603_s2 + $0x10] sm:$0xff] }
   0x9   :  { %2484 = vmatpush1.bf16.msra.mxu1 %v721_v12  ;;  %2300 = vmatprep.subr.bf16.mxu0 %v4495_v0  ;;  %v508_v34 = vld [vmem:[%s6603_s2 + $0x128] sm:$0xff]  ;;  %v701_v35 = vpack.c.bf16 %v476_v32, %v475_v31  ;;  %v474_v38 = vld [vmem:[%s6603_s2 + $0x18] sm:$0xff]  ;;  %v505_v39 = vld [vmem:[%s6603_s2 + $0x110] sm:$0xff] }
   0xa   :  { %2485 = vmatprep.subr.bf16.mxu1 %v4495_v0  ;;  %v717_v36 = vpack.c.bf16 %v508_v34, %v507_v33  ;;  %v506_v40 = vld [vmem:[%s6603_s2 + $0x118] sm:$0xff]  ;;  %v4619_v41 = vld [vmem:[%s6604_s0] sm:$0xff]  ;;  %v700_v46 = vpack.c.bf16 %v474_v38, %v473_v37  ;;  %v472_v50 = vld [vmem:[%s6603_s2 + $0x8] sm:$0xff] }
   0xb   :  { %v4624_v42 = vld [vmem:[%s6604_s0 + $0x1e] sm:$0xff]  ;;  %v167_v43 = vunpack.c.l.s8.bf16 %v4619_v41  ;;  %v168_v45 = vunpack.c.h.s8.bf16 %v4619_v41  ;;  %v716_v48 = vpack.c.bf16 %v506_v40, %v505_v39  ;;  %v504_v53 = vld [vmem:[%s6603_s2 + $0x108] sm:$0xff]  ;;  %v501_v57 = vld [vmem:[%s6603_s2 + $0xf0] sm:$0xff] }
   0xc   :  { %2301 = vmatpush1.bf16.msra.mxu0 %v704_v17  ;;  %v175_v44 = vunpack.c.l.s8.bf16 %v4624_v42  ;;  %v176_v47 = vunpack.c.h.s8.bf16 %v4624_v42  ;;  %v471_v49 = vld [vmem:[%s6603_s2] sm:$0xff]  ;;  %v502_v58 = vld [vmem:[%s6603_s2 + $0xf8] sm:$0xff]  ;;  %v533_v59 = vld [vmem:[%s6603_s2 + $0x1f0] sm:$0xff] }
   0xd   :  { %2486 = vmatpush1.bf16.msra.mxu1 %v720_v18  ;;  %2302 = vmatprep.subr.bf16.mxu0 %v4495_v0  ;;  %v503_v52 = vld [vmem:[%s6603_s2 + $0x100] sm:$0xff]  ;;  %v699_v55 = vpack.c.bf16 %v472_v50, %v471_v49  ;;  %v534_v60 = vld [vmem:[%s6603_s2 + $0x1f8] sm:$0xff]  ;;  %v714_v61 = vpack.c.bf16 %v502_v58, %v501_v57  ;;  %v500_v1 = vld [vmem:[%s6603_s2 + $0xe8] sm:$0xff] }
   0xe   :  { %2487 = vmatprep.subr.bf16.mxu1 %v4495_v0  ;;  %v4086_v51 = vcombine.high %v167_v43, %v175_v44  ;;  %v4088_v54 = vcombine.high %v168_v45, %v176_v47  ;;  %v715_v56 = vpack.c.bf16 %v504_v53, %v503_v52  ;;  %v730_v62 = vpack.c.bf16 %v534_v60, %v533_v59  ;;  %v499_v63 = vld [vmem:[%s6603_s2 + $0xe0] sm:$0xff]  ;;  %v532_v3 = vld [vmem:[%s6603_s2 + $0x1e8] sm:$0xff]  ;;  %v497_v6 = vld [vmem:[%s6603_s2 + $0xd0] sm:$0xff] }
   0xf   :  { %v531_v2 = vld [vmem:[%s6603_s2 + $0x1e0] sm:$0xff]  ;;  %v713_v4 = vpack.c.bf16 %v500_v1, %v499_v63  ;;  %v498_v7 = vld [vmem:[%s6603_s2 + $0xd8] sm:$0xff]  ;;  %v529_v8 = vld [vmem:[%s6603_s2 + $0x1d0] sm:$0xff]  ;;  %v4085_v58 = vcombine.low %v167_v43, %v175_v44  ;;  %v4087_v59 = vcombine.low %v168_v45, %v176_v47 }
  0x10   :  { %2303 = vmatpush1.bf16.msra.mxu0 %v703_v23  ;;  %2328 = vmatprep.mubr.bf16.mxu0 %v4086_v51  ;;  %v729_v5 = vpack.c.bf16 %v532_v3, %v531_v2  ;;  %v530_v9 = vld [vmem:[%s6603_s2 + $0x1d8] sm:$0xff]  ;;  %v712_v10 = vpack.c.bf16 %v498_v7, %v497_v6  ;;  %v495_v12 = vld [vmem:[%s6603_s2 + $0xc0] sm:$0xff]  ;;  %v496_v13 = vld [vmem:[%s6603_s2 + $0xc8] sm:$0xff] }
  0x11   :  { %2488 = vmatpush1.bf16.msra.mxu1 %v719_v24  ;;  %2304 = vmatprep.subr.bf16.mxu0 %v4495_v0  ;;  %v728_v11 = vpack.c.bf16 %v530_v9, %v529_v8  ;;  %v527_v14 = vld [vmem:[%s6603_s2 + $0x1c0] sm:$0xff]  ;;  %v528_v15 = vld [vmem:[%s6603_s2 + $0x1c8] sm:$0xff]  ;;  %v711_v16 = vpack.c.bf16 %v496_v13, %v495_v12  ;;  %v493_v18 = vld [vmem:[%s6603_s2 + $0xb0] sm:$0xff] }
  0x12   :  { %2489 = vmatprep.subr.bf16.mxu1 %v4495_v0  ;;  %2513 = vmatprep.mubr.bf16.mxu1 %v4088_v54  ;;  %v727_v17 = vpack.c.bf16 %v528_v15, %v527_v14  ;;  %v494_v19 = vld [vmem:[%s6603_s2 + $0xb8] sm:$0xff]  ;;  %v525_v20 = vld [vmem:[%s6603_s2 + $0x1b0] sm:$0xff]  ;;  %v491_v24 = vld [vmem:[%s6603_s2 + $0xa0] sm:$0xff] }
  0x13   :  { %v526_v21 = vld [vmem:[%s6603_s2 + $0x1b8] sm:$0xff]  ;;  %v710_v22 = vpack.c.bf16 %v494_v19, %v493_v18  ;;  %v492_v25 = vld [vmem:[%s6603_s2 + $0xa8] sm:$0xff]  ;;  %v523_v26 = vld [vmem:[%s6603_s2 + $0x1a0] sm:$0xff] }
  0x14   :  { %2305 = vmatpush1.bf16.msra.mxu0 %v702_v29  ;;  %v726_v23 = vpack.c.bf16 %v526_v21, %v525_v20  ;;  %v524_v27 = vld [vmem:[%s6603_s2 + $0x1a8] sm:$0xff]  ;;  %v709_v28 = vpack.c.bf16 %v492_v25, %v491_v24  ;;  %v490_v31 = vld [vmem:[%s6603_s2 + $0x98] sm:$0xff]  ;;  %v521_v32 = vld [vmem:[%s6603_s2 + $0x190] sm:$0xff] }
  0x15   :  { %2490 = vmatpush1.bf16.msra.mxu1 %v718_v30  ;;  %2306 = vmatprep.subr.bf16.mxu0 %v4495_v0  ;;  %v725_v29 = vpack.c.bf16 %v524_v27, %v523_v26  ;;  %v489_v30 = vld [vmem:[%s6603_s2 + $0x90] sm:$0xff]  ;;  %v522_v33 = vld [vmem:[%s6603_s2 + $0x198] sm:$0xff]  ;;  %v488_v37 = vld [vmem:[%s6603_s2 + $0x88] sm:$0xff] }
  0x16   :  { %2491 = vmatprep.subr.bf16.mxu1 %v4495_v0  ;;  %v708_v34 = vpack.c.bf16 %v490_v31, %v489_v30  ;;  %v519_v38 = vld [vmem:[%s6603_s2 + $0x180] sm:$0xff]  ;;  %v520_v39 = vld [vmem:[%s6603_s2 + $0x188] sm:$0xff]  ;;  %v549_v50 = vld [vmem:[%s6603_s2 + $0x270] sm:$0xff] }
  0x17   :  { %v23_v40 = vld [vmem:[%s6604_s0 + $0x3c] sm:$0xff]  ;;  %v723_v49 = vpack.c.bf16 %v520_v39, %v519_v38  ;;  %v581_v54 = vld [vmem:[%s6603_s2 + $0x370] sm:$0xff]  ;;  %v548_v43 = vld [vmem:[%s6603_s2 + $0x268] sm:$0xff] }
  0x18   :  { %2307 = vmatpush1.bf16.msra.mxu0 %v701_v35  ;;  %v724_v35 = vpack.c.bf16 %v522_v33, %v521_v32  ;;  %v550_v51 = vld [vmem:[%s6603_s2 + $0x278] sm:$0xff]  ;;  %v183_v52 = vunpack.c.l.s8.bf16 %v23_v40  ;;  %v579_v45 = vld [vmem:[%s6603_s2 + $0x360] sm:$0xff]  ;;  %v580_v47 = vld [vmem:[%s6603_s2 + $0x368] sm:$0xff] }
  0x19   :  { %2492 = vmatpush1.bf16.msra.mxu1 %v717_v36  ;;  %2308 = vmatprep.subr.bf16.mxu0 %v4495_v0  ;;  %v487_v36 = vld [vmem:[%s6603_s2 + $0x80] sm:$0xff]  ;;  %v738_v60 = vpack.c.bf16 %v550_v51, %v549_v50  ;;  %v31_v42 = vld [vmem:[%s6604_s0 + $0x78] sm:$0xff]  ;;  %v545_v7 = vld [vmem:[%s6603_s2 + $0x250] sm:$0xff] }
  0x1a   :  { %2493 = vmatprep.subr.bf16.mxu1 %v4495_v0  ;;  %v35_v41 = vld [vmem:[%s6604_s0 + $0x96] sm:$0xff]  ;;  %v199_v2 = vunpack.c.l.s8.bf16 %v31_v42  ;;  %v543_v19 = vld [vmem:[%s6603_s2 + $0x240] sm:$0xff]  ;;  %v544_v20 = vld [vmem:[%s6603_s2 + $0x248] sm:$0xff] }
  0x1b   :  { %v207_v3 = vunpack.c.l.s8.bf16 %v35_v41  ;;  %v208_v6 = vunpack.c.h.s8.bf16 %v35_v41  ;;  %v546_v8 = vld [vmem:[%s6603_s2 + $0x258] sm:$0xff]  ;;  %v575_v21 = vld [vmem:[%s6603_s2 + $0x340] sm:$0xff]  ;;  %v735_v27 = vpack.c.bf16 %v544_v20, %v543_v19  ;;  %v573_v32 = vld [vmem:[%s6603_s2 + $0x330] sm:$0xff] }
  0x1c   :  { %2309 = vmatpush1.bf16.msra.mxu0 %v700_v46  ;;  %v27_v46 = vld [vmem:[%s6604_s0 + $0x5a] sm:$0xff]  ;;  %v736_v15 = vpack.c.bf16 %v546_v8, %v545_v7  ;;  %v4868_v38 = vld [vmem:[%s6604_s0 + $0x10e] sm:$0xff]  ;;  %v4952_v19 = vld [vmem:[%s6604_s0 + $0x186] sm:$0xff] }
  0x1d   :  { %2494 = vmatpush1.bf16.msra.mxu1 %v716_v48  ;;  %2310 = vmatprep.subr.bf16.mxu0 %v4495_v0  ;;  %v707_v48 = vpack.c.bf16 %v488_v37, %v487_v36  ;;  %v191_v53 = vunpack.c.l.s8.bf16 %v27_v46  ;;  %v192_v57 = vunpack.c.h.s8.bf16 %v27_v46  ;;  %v4116_v13 = vcombine.high %v199_v2, %v207_v3  ;;  %v542_v30 = vld [vmem:[%s6603_s2 + $0x238] sm:$0xff]  ;;  %v4863_v37 = vld [vmem:[%s6604_s0 + $0xf0] sm:$0xff]  ;;  %v539_v46 = vld [vmem:[%s6603_s2 + $0x220] sm:$0xff] }
  0x1e   :  { %2495 = vmatprep.subr.bf16.mxu1 %v4495_v0  ;;  %v4115_v31 = vcombine.low %v199_v2, %v207_v3  ;;  %v574_v33 = vld [vmem:[%s6603_s2 + $0x338] sm:$0xff]  ;;  %v572_v50 = vld [vmem:[%s6603_s2 + $0x328] sm:$0xff]  ;;  %v231_v51 = vunpack.c.l.s8.bf16 %v4863_v37  ;;  %v567_v2 = vld [vmem:[%s6603_s2 + $0x300] sm:$0xff] }
  0x1f   :  { %v4101_v63 = vcombine.high %v183_v52, %v191_v53  ;;  %v4100_v9 = vcombine.low %v183_v52, %v191_v53  ;;  %v239_v52 = vunpack.c.l.s8.bf16 %v4868_v38  ;;  %v232_v53 = vunpack.c.h.s8.bf16 %v4863_v37  ;;  %v4910_v41 = vld [vmem:[%s6604_s0 + $0x14a] sm:$0xff] }
  0x20   :  { %2311 = vmatpush1.bf16.msra.mxu0 %v699_v55  ;;  %v582_v55 = vld [vmem:[%s6603_s2 + $0x378] sm:$0xff]  ;;  %v568_v3 = vld [vmem:[%s6603_s2 + $0x308] sm:$0xff]  ;;  %v256_v7 = vunpack.c.h.s8.bf16 %v4910_v41 }
  0x21   :  { %2496 = vmatpush1.bf16.msra.mxu1 %v715_v56  ;;  %2312 = vmatprep.subr.bf16.mxu0 %v4495_v0  ;;  %v184_v56 = vunpack.c.h.s8.bf16 %v23_v40  ;;  %v750_v40 = vpack.c.bf16 %v574_v33, %v573_v32  ;;  %v561_v32 = vld [vmem:[%s6603_s2 + $0x2d0] sm:$0xff]  ;;  %v562_v33 = vld [vmem:[%s6603_s2 + $0x2d8] sm:$0xff] }
  0x22   :  { %2497 = vmatprep.subr.bf16.mxu1 %v4495_v0 }
  0x23   :  { %v4103_v44 = vcombine.high %v184_v56, %v192_v57  ;;  %v4102_v12 = vcombine.low %v184_v56, %v192_v57  ;;  %v537_v57 = vld [vmem:[%s6603_s2 + $0x210] sm:$0xff] }
  0x24   :  { %2313 = vmatpush2.bf16.msra.mxu0 %v714_v61  ;;  %v547_v61 = vld [vmem:[%s6603_s2 + $0x260] sm:$0xff] }
  0x25   :  { %2498 = vmatpush2.bf16.msra.mxu1 %v730_v62  ;;  %2314 = vmatprep.subr.bf16.mxu0 %v4495_v0  ;;  %v754_v62 = vpack.c.bf16 %v582_v55, %v581_v54  ;;  %v737_v1 = vpack.c.bf16 %v548_v43, %v547_v61  ;;  %v240_v54 = vunpack.c.h.s8.bf16 %v4868_v38  ;;  %v570_v61 = vld [vmem:[%s6603_s2 + $0x318] sm:$0xff] }
  0x26   :  { %2499 = vmatprep.subr.bf16.mxu1 %v4495_v0 }
  0x27   :  { %v4148_v43 = vcombine.high %v232_v53, %v240_v54 }
  0x28   :  { %2315 = vmatpush2.bf16.msra.mxu0 %v713_v4  ;;  %v753_v4 = vpack.c.bf16 %v580_v47, %v579_v45  ;;  %v535_v47 = vld [vmem:[%s6603_s2 + $0x200] sm:$0xff] }
  0x29   :  { %2500 = vmatpush2.bf16.msra.mxu1 %v729_v5  ;;  %2316 = vmatprep.subr.bf16.mxu0 %v4495_v0  ;;  %v200_v5 = vunpack.c.h.s8.bf16 %v31_v42  ;;  %v4905_v42 = vld [vmem:[%s6604_s0 + $0x12c] sm:$0xff] }
  0x2a   :  { %2501 = vmatprep.subr.bf16.mxu1 %v4495_v0 }
  0x2b   :  { %v4118_v14 = vcombine.high %v200_v5, %v208_v6 }
  0x2c   :  { %2317 = vmatpush2.bf16.msra.mxu0 %v712_v10  ;;  %v577_v10 = vld [vmem:[%s6603_s2 + $0x350] sm:$0xff] }
  0x2d   :  { %2502 = vmatpush2.bf16.msra.mxu1 %v728_v11  ;;  %2318 = vmatprep.subr.bf16.mxu0 %v4495_v0  ;;  %v578_v11 = vld [vmem:[%s6603_s2 + $0x358] sm:$0xff] }
  0x2e   :  { %2503 = vmatprep.subr.bf16.mxu1 %v4495_v0  ;;  %v752_v18 = vpack.c.bf16 %v578_v11, %v577_v10  ;;  %v565_v10 = vld [vmem:[%s6603_s2 + $0x2f0] sm:$0xff]  ;;  %v566_v11 = vld [vmem:[%s6603_s2 + $0x2f8] sm:$0xff] }
  0x2f   :  { %v746_v20 = vpack.c.bf16 %v566_v11, %v565_v10 }
  0x30   :  { %2319 = vmatpush2.bf16.msra.mxu0 %v711_v16  ;;  %v39_v16 = vld [vmem:[%s6604_s0 + $0xb4] sm:$0xff] }
  0x31   :  { %2504 = vmatpush2.bf16.msra.mxu1 %v727_v17  ;;  %2320 = vmatprep.subr.bf16.mxu0 %v4495_v0  ;;  %v43_v17 = vld [vmem:[%s6604_s0 + $0xd2] sm:$0xff]  ;;  %v216_v25 = vunpack.c.h.s8.bf16 %v39_v16 }
  0x32   :  { %2505 = vmatprep.subr.bf16.mxu1 %v4495_v0  ;;  %v223_v24 = vunpack.c.l.s8.bf16 %v43_v17  ;;  %v224_v26 = vunpack.c.h.s8.bf16 %v43_v17 }
  0x34   :  { %2321 = vmatpush2.bf16.msra.mxu0 %v710_v22  ;;  %v576_v22 = vld [vmem:[%s6603_s2 + $0x348] sm:$0xff]  ;;  %v4133_v36 = vcombine.high %v216_v25, %v224_v26 }
  0x35   :  { %2506 = vmatpush2.bf16.msra.mxu1 %v726_v23  ;;  %2322 = vmatprep.subr.bf16.mxu0 %v4495_v0  ;;  %v215_v23 = vunpack.c.l.s8.bf16 %v39_v16 }
  0x36   :  { %2507 = vmatprep.subr.bf16.mxu1 %v4495_v0 }
  0x38   :  { %2323 = vmatpush2.bf16.msra.mxu0 %v709_v28  ;;  %v751_v28 = vpack.c.bf16 %v576_v22, %v575_v21  ;;  %v563_v22 = vld [vmem:[%s6603_s2 + $0x2e0] sm:$0xff] }
  0x39   :  { %2508 = vmatpush2.bf16.msra.mxu1 %v725_v29  ;;  %2324 = vmatprep.subr.bf16.mxu0 %v4495_v0  ;;  %v541_v29 = vld [vmem:[%s6603_s2 + $0x230] sm:$0xff] }
  0x3a   :  { %2509 = vmatprep.subr.bf16.mxu1 %v4495_v0  ;;  %v734_v39 = vpack.c.bf16 %v542_v30, %v541_v29  ;;  %v272_v29 = vunpack.c.h.s8.bf16 %v4952_v19 }
  0x3c   :  { %2325 = vmatpush2.bf16.msra.mxu0 %v708_v34  ;;  %v4117_v34 = vcombine.low %v200_v5, %v208_v6  ;;  %v255_v5 = vunpack.c.l.s8.bf16 %v4910_v41  ;;  %v248_v6 = vunpack.c.h.s8.bf16 %v4905_v42 }
  0x3d   :  { %2510 = vmatpush2.bf16.msra.mxu1 %v724_v35  ;;  %2326 = vmatprep.subr.bf16.mxu0 %v4495_v0  ;;  %v4131_v35 = vcombine.high %v215_v23, %v223_v24 }
  0x3e   :  { %2511 = vmatprep.subr.bf16.mxu1 %v4495_v0  ;;  %v4163_v17 = vcombine.high %v248_v6, %v256_v7  ;;  %v4162_v37 = vcombine.low %v248_v6, %v256_v7  ;;  %v588_v6 = vld [vmem:[%s6603_s2 + $0x3a8] sm:$0xff] }
  0x40   :  { %2327 = vmatpush2.bf16.msra.mxu0 %v707_v48  ;;  %v540_v48 = vld [vmem:[%s6603_s2 + $0x228] sm:$0xff] }
  0x41   :  { %2512 = vmatpush2.bf16.msra.mxu1 %v723_v49  ;;  %2666 = vmatprep.subr.bf16.mxu0 %v4495_v0  ;;  %v571_v49 = vld [vmem:[%s6603_s2 + $0x320] sm:$0xff]  ;;  %v733_v55 = vpack.c.bf16 %v540_v48, %v539_v46  ;;  %v744_v48 = vpack.c.bf16 %v562_v33, %v561_v32 }
  0x42   :  { %2851 = vmatprep.subr.bf16.mxu1 %v4495_v0  ;;  %v749_v56 = vpack.c.bf16 %v572_v50, %v571_v49  ;;  %v4994_v46 = vld [vmem:[%s6604_s0 + $0x1c2] sm:$0xff] }
  0x43   :  { %2329 = vmatmul.mubr.bf16.vlgmr.msra.gmra.mxu0 %v4085_v58  ;;  %v538_v58 = vld [vmem:[%s6603_s2 + $0x218] sm:$0xff]  ;;  %v559_v50 = vld [vmem:[%s6603_s2 + $0x2c0] sm:$0xff] }
  0x44   :  { %2514 = vmatmul.mubr.bf16.vlgmr.msra.gmra.mxu1 %v4087_v59  ;;  %2667 = vmatpush1.bf16.msra.mxu0 %v738_v60  ;;  %v4130_v59 = vcombine.low %v215_v23, %v223_v24  ;;  %v569_v60 = vld [vmem:[%s6603_s2 + $0x310] sm:$0xff]  ;;  %v564_v23 = vld [vmem:[%s6603_s2 + $0x2e8] sm:$0xff]  ;;  %v595_v24 = vld [vmem:[%s6603_s2 + $0x3e0] sm:$0xff] }
  0x45   :  { %2852 = vmatpush1.bf16.msra.mxu1 %v754_v62  ;;  %2336 = vmatprep.mubr.bf16.mxu0 %v4101_v63  ;;  %v4132_v62 = vcombine.low %v216_v25, %v224_v26  ;;  %v4146_v63 = vcombine.high %v231_v51, %v239_v52  ;;  %v748_v45 = vpack.c.bf16 %v570_v61, %v569_v60  ;;  %v596_v25 = vld [vmem:[%s6603_s2 + $0x3e8] sm:$0xff]  ;;  %v557_v60 = vld [vmem:[%s6603_s2 + $0x2b0] sm:$0xff]  ;;  %v558_v61 = vld [vmem:[%s6603_s2 + $0x2b8] sm:$0xff] }
  0x46   :  { %2521 = vmatprep.mubr.bf16.mxu1 %v4103_v44  ;;  %2668 = vmatprep.subr.bf16.mxu0 %v4495_v0  ;;  %v732_v44 = vpack.c.bf16 %v538_v58, %v537_v57  ;;  %v745_v30 = vpack.c.bf16 %v564_v23, %v563_v22  ;;  %v288_v57 = vunpack.c.h.s8.bf16 %v4994_v46  ;;  %v91_v22 = vld [vmem:[%s6604_s0 + $0x23a] sm:$0xff] }
  0x47   :  { %2853 = vmatprep.subr.bf16.mxu1 %v4495_v0  ;;  %v320_v32 = vunpack.c.h.s8.bf16 %v91_v22 }
  0x48   :  { %2669 = vmatpush1.bf16.msra.mxu0 %v737_v1  ;;  %v536_v1 = vld [vmem:[%s6603_s2 + $0x208] sm:$0xff] }
  0x49   :  { %2854 = vmatpush1.bf16.msra.mxu1 %v753_v4  ;;  %2670 = vmatprep.subr.bf16.mxu0 %v4495_v0  ;;  %v247_v4 = vunpack.c.l.s8.bf16 %v4905_v42  ;;  %v731_v8 = vpack.c.bf16 %v536_v1, %v535_v47  ;;  %v83_v47 = vld [vmem:[%s6604_s0 + $0x1fe] sm:$0xff]  ;;  %v742_v1 = vpack.c.bf16 %v558_v61, %v557_v60 }
  0x4a   :  { %2855 = vmatprep.subr.bf16.mxu1 %v4495_v0  ;;  %v304_v10 = vunpack.c.h.s8.bf16 %v83_v47 }
  0x4b   :  { %2337 = vmatmul.mubr.bf16.gmra.mxu0 %v4100_v9  ;;  %v747_v9 = vpack.c.bf16 %v568_v3, %v567_v2  ;;  %v4161_v16 = vcombine.high %v247_v4, %v255_v5  ;;  %v555_v3 = vld [vmem:[%s6603_s2 + $0x2a0] sm:$0xff] }
  0x4c   :  { %2522 = vmatmul.mubr.bf16.gmra.mxu1 %v4102_v12  ;;  %2344 = vmatprep.mubr.bf16.mxu0 %v4116_v13  ;;  %v4145_v12 = vcombine.low %v231_v51, %v239_v52  ;;  %v597_v13 = vld [vmem:[%s6603_s2 + $0x3f0] sm:$0xff]  ;;  %v560_v51 = vld [vmem:[%s6603_s2 + $0x2c8] sm:$0xff]  ;;  %v591_v52 = vld [vmem:[%s6603_s2 + $0x3c0] sm:$0xff] }
  0x4d   :  { %2529 = vmatprep.mubr.bf16.mxu1 %v4118_v14  ;;  %2671 = vmatpush1.bf16.msra.mxu0 %v736_v15  ;;  %v598_v14 = vld [vmem:[%s6603_s2 + $0x3f8] sm:$0xff]  ;;  %v4147_v15 = vcombine.low %v232_v53, %v240_v54  ;;  %v592_v53 = vld [vmem:[%s6603_s2 + $0x3c8] sm:$0xff]  ;;  %v743_v58 = vpack.c.bf16 %v560_v51, %v559_v50 }
  0x4e   :  { %2856 = vmatpush1.bf16.msra.mxu1 %v752_v18  ;;  %2672 = vmatprep.subr.bf16.mxu0 %v4495_v0  ;;  %v4947_v18 = vld [vmem:[%s6604_s0 + $0x168] sm:$0xff]  ;;  %v762_v21 = vpack.c.bf16 %v598_v14, %v597_v13  ;;  %v553_v13 = vld [vmem:[%s6603_s2 + $0x290] sm:$0xff]  ;;  %v554_v14 = vld [vmem:[%s6603_s2 + $0x298] sm:$0xff] }
  0x4f   :  { %2857 = vmatprep.subr.bf16.mxu1 %v4495_v0  ;;  %v263_v26 = vunpack.c.l.s8.bf16 %v4947_v18  ;;  %v740_v23 = vpack.c.bf16 %v554_v14, %v553_v13 }
  0x51   :  { %2673 = vmatpush1.bf16.msra.mxu0 %v735_v27  ;;  %v271_v27 = vunpack.c.l.s8.bf16 %v4952_v19 }
  0x52   :  { %2858 = vmatpush1.bf16.msra.mxu1 %v751_v28  ;;  %2674 = vmatprep.subr.bf16.mxu0 %v4495_v0  ;;  %v264_v28 = vunpack.c.h.s8.bf16 %v4947_v18 }
  0x53   :  { %2345 = vmatmul.mubr.bf16.gmra.mxu0 %v4115_v31  ;;  %2859 = vmatprep.subr.bf16.mxu1 %v4495_v0  ;;  %v761_v31 = vpack.c.bf16 %v596_v25, %v595_v24  ;;  %v4176_v38 = vcombine.high %v263_v26, %v271_v27  ;;  %v551_v25 = vld [vmem:[%s6603_s2 + $0x280] sm:$0xff] }
  0x54   :  { %2530 = vmatmul.mubr.bf16.gmra.mxu1 %v4117_v34  ;;  %2352 = vmatprep.mubr.bf16.mxu0 %v4131_v35  ;;  %v4160_v34 = vcombine.low %v247_v4, %v255_v5  ;;  %v593_v35 = vld [vmem:[%s6603_s2 + $0x3d0] sm:$0xff]  ;;  %v4177_v42 = vcombine.low %v264_v28, %v272_v29  ;;  %v556_v4 = vld [vmem:[%s6603_s2 + $0x2a8] sm:$0xff]  ;;  %v587_v5 = vld [vmem:[%s6603_s2 + $0x3a0] sm:$0xff] }
  0x55   :  { %2537 = vmatprep.mubr.bf16.mxu1 %v4133_v36  ;;  %2675 = vmatpush1.bf16.msra.mxu0 %v734_v39  ;;  %v594_v36 = vld [vmem:[%s6603_s2 + $0x3d8] sm:$0xff]  ;;  %v4178_v39 = vcombine.high %v264_v28, %v272_v29  ;;  %v741_v11 = vpack.c.bf16 %v556_v4, %v555_v3  ;;  %v584_v28 = vld [vmem:[%s6603_s2 + $0x388] sm:$0xff] }
  0x56   :  { %2860 = vmatpush1.bf16.msra.mxu1 %v750_v40  ;;  %2676 = vmatprep.subr.bf16.mxu0 %v4495_v0  ;;  %v4989_v40 = vld [vmem:[%s6604_s0 + $0x1a4] sm:$0xff]  ;;  %v760_v49 = vpack.c.bf16 %v594_v36, %v593_v35 }
  0x57   :  { %2861 = vmatprep.subr.bf16.mxu1 %v4495_v0  ;;  %v279_v54 = vunpack.c.l.s8.bf16 %v4989_v40 }
  0x59   :  { %2677 = vmatpush1.bf16.msra.mxu0 %v733_v55  ;;  %v287_v55 = vunpack.c.l.s8.bf16 %v4994_v46 }
  0x5a   :  { %2862 = vmatpush1.bf16.msra.mxu1 %v749_v56  ;;  %2678 = vmatprep.subr.bf16.mxu0 %v4495_v0  ;;  %v280_v56 = vunpack.c.h.s8.bf16 %v4989_v40  ;;  %v99_v40 = vld [vmem:[%s6604_s0 + $0x276] sm:$0xff] }
  0x5b   :  { %2353 = vmatmul.mubr.bf16.gmra.mxu0 %v4130_v59  ;;  %2863 = vmatprep.subr.bf16.mxu1 %v4495_v0  ;;  %v759_v59 = vpack.c.bf16 %v592_v53, %v591_v52  ;;  %v4191_v41 = vcombine.high %v279_v54, %v287_v55  ;;  %v336_v50 = vunpack.c.h.s8.bf16 %v99_v40 }
  0x5c   :  { %2538 = vmatmul.mubr.bf16.gmra.mxu1 %v4132_v62  ;;  %2360 = vmatprep.mubr.bf16.mxu0 %v4146_v63  ;;  %v4175_v62 = vcombine.low %v263_v26, %v271_v27  ;;  %v589_v63 = vld [vmem:[%s6603_s2 + $0x3b0] sm:$0xff]  ;;  %v4192_v18 = vcombine.low %v280_v56, %v288_v57  ;;  %v552_v26 = vld [vmem:[%s6603_s2 + $0x288] sm:$0xff]  ;;  %v583_v27 = vld [vmem:[%s6603_s2 + $0x380] sm:$0xff] }
  0x5d   :  { %2545 = vmatprep.mubr.bf16.mxu1 %v4148_v43  ;;  %2679 = vmatpush1.bf16.msra.mxu0 %v732_v44  ;;  %v590_v43 = vld [vmem:[%s6603_s2 + $0x3b8] sm:$0xff]  ;;  %v4193_v44 = vcombine.high %v280_v56, %v288_v57  ;;  %v739_v33 = vpack.c.bf16 %v552_v26, %v551_v25  ;;  %v135_v26 = vld [vmem:[%s6604_s0 + $0x384] sm:$0xff] }
  0x5e   :  { %2864 = vmatpush1.bf16.msra.mxu1 %v748_v45  ;;  %2680 = vmatprep.subr.bf16.mxu0 %v4495_v0  ;;  %v79_v45 = vld [vmem:[%s6604_s0 + $0x1e0] sm:$0xff]  ;;  %v758_v2 = vpack.c.bf16 %v590_v43, %v589_v63  ;;  %v107_v56 = vld [vmem:[%s6604_s0 + $0x2b2] sm:$0xff] }
  0x5f   :  { %2865 = vmatprep.subr.bf16.mxu1 %v4495_v0  ;;  %v295_v7 = vunpack.c.l.s8.bf16 %v79_v45  ;;  %v352_v60 = vunpack.c.h.s8.bf16 %v107_v56 }
  0x61   :  { %2681 = vmatpush1.bf16.msra.mxu0 %v731_v8  ;;  %v303_v8 = vunpack.c.l.s8.bf16 %v83_v47 }
  0x62   :  { %2866 = vmatpush1.bf16.msra.mxu1 %v747_v9  ;;  %2682 = vmatprep.subr.bf16.mxu0 %v4495_v0  ;;  %v296_v9 = vunpack.c.h.s8.bf16 %v79_v45 }
  0x63   :  { %2361 = vmatmul.mubr.bf16.gmra.mxu0 %v4145_v12  ;;  %2867 = vmatprep.subr.bf16.mxu1 %v4495_v0  ;;  %v757_v12 = vpack.c.bf16 %v588_v6, %v587_v5  ;;  %v4206_v19 = vcombine.high %v295_v7, %v303_v8  ;;  %v4205_v35 = vcombine.low %v295_v7, %v303_v8  ;;  %v119_v6 = vld [vmem:[%s6604_s0 + $0x30c] sm:$0xff] }
  0x64   :  { %2546 = vmatmul.mubr.bf16.gmra.mxu1 %v4147_v15  ;;  %2368 = vmatprep.mubr.bf16.mxu0 %v4161_v16  ;;  %v4190_v15 = vcombine.low %v279_v54, %v287_v55  ;;  %v585_v16 = vld [vmem:[%s6603_s2 + $0x390] sm:$0xff]  ;;  %v4207_v36 = vcombine.low %v296_v9, %v304_v10  ;;  %v375_v8 = vunpack.c.l.s8.bf16 %v119_v6 }
  0x65   :  { %2553 = vmatprep.mubr.bf16.mxu1 %v4163_v17  ;;  %2683 = vmatpush2.bf16.msra.mxu0 %v746_v20  ;;  %v586_v17 = vld [vmem:[%s6603_s2 + $0x398] sm:$0xff]  ;;  %v4208_v20 = vcombine.high %v296_v9, %v304_v10  ;;  %v123_v7 = vld [vmem:[%s6604_s0 + $0x32a] sm:$0xff]  ;;  %v376_v10 = vunpack.c.h.s8.bf16 %v119_v6 }
  0x66   :  { %2868 = vmatpush2.bf16.msra.mxu1 %v762_v21  ;;  %2684 = vmatprep.subr.bf16.mxu0 %v4495_v0  ;;  %v87_v21 = vld [vmem:[%s6604_s0 + $0x21c] sm:$0xff]  ;;  %v756_v24 = vpack.c.bf16 %v586_v17, %v585_v16  ;;  %v103_v55 = vld [vmem:[%s6604_s0 + $0x294] sm:$0xff]  ;;  %v383_v9 = vunpack.c.l.s8.bf16 %v123_v7  ;;  %v127_v16 = vld [vmem:[%s6604_s0 + $0x348] sm:$0xff] }
  0x67   :  { %2869 = vmatprep.subr.bf16.mxu1 %v4495_v0  ;;  %v311_v29 = vunpack.c.l.s8.bf16 %v87_v21  ;;  %v343_v57 = vunpack.c.l.s8.bf16 %v103_v55  ;;  %v131_v17 = vld [vmem:[%s6604_s0 + $0x366] sm:$0xff] }
  0x68   :  { %v4281_v14 = vcombine.high %v375_v8, %v383_v9 }
  0x69   :  { %2685 = vmatpush2.bf16.msra.mxu0 %v745_v30  ;;  %v319_v30 = vunpack.c.l.s8.bf16 %v91_v22  ;;  %v4280_v22 = vcombine.low %v375_v8, %v383_v9 }
  0x6a   :  { %2870 = vmatpush2.bf16.msra.mxu1 %v761_v31  ;;  %2686 = vmatprep.subr.bf16.mxu0 %v4495_v0  ;;  %v312_v31 = vunpack.c.h.s8.bf16 %v87_v21  ;;  %v400_v21 = vunpack.c.h.s8.bf16 %v131_v17 }
  0x6b   :  { %2369 = vmatmul.mubr.bf16.gmra.mxu0 %v4160_v34  ;;  %2871 = vmatprep.subr.bf16.mxu1 %v4495_v0  ;;  %v755_v34 = vpack.c.bf16 %v584_v28, %v583_v27  ;;  %v4220_v51 = vcombine.low %v311_v29, %v319_v30  ;;  %v139_v27 = vld [vmem:[%s6604_s0 + $0x3a2] sm:$0xff]  ;;  %v407_v28 = vunpack.c.l.s8.bf16 %v135_v26 }
  0x6c   :  { %2554 = vmatmul.mubr.bf16.gmra.mxu1 %v4162_v37  ;;  %2376 = vmatprep.mubr.bf16.mxu0 %v4176_v38  ;;  %v4221_v37 = vcombine.high %v311_v29, %v319_v30  ;;  %v4223_v38 = vcombine.high %v312_v31, %v320_v32  ;;  %v4222_v52 = vcombine.low %v312_v31, %v320_v32  ;;  %v415_v29 = vunpack.c.l.s8.bf16 %v139_v27 }
  0x6d   :  { %2561 = vmatprep.mubr.bf16.mxu1 %v4178_v39  ;;  %2687 = vmatpush2.bf16.msra.mxu0 %v744_v48  ;;  %v95_v39 = vld [vmem:[%s6604_s0 + $0x258] sm:$0xff]  ;;  %v335_v48 = vunpack.c.l.s8.bf16 %v99_v40  ;;  %v408_v30 = vunpack.c.h.s8.bf16 %v135_v26  ;;  %v416_v31 = vunpack.c.h.s8.bf16 %v139_v27  ;;  %v611_v26 = vld [vmem:[%s6603_s2 + $0x460] sm:$0xff] }
  0x6e   :  { %2872 = vmatpush2.bf16.msra.mxu1 %v760_v49  ;;  %2688 = vmatprep.subr.bf16.mxu0 %v4495_v0  ;;  %v327_v46 = vunpack.c.l.s8.bf16 %v95_v39  ;;  %v328_v49 = vunpack.c.h.s8.bf16 %v95_v39 }
  0x6f   :  { %2873 = vmatprep.subr.bf16.mxu1 %v4495_v0 }
  0x70   :  { %v4236_v53 = vcombine.high %v327_v46, %v335_v48  ;;  %v4238_v54 = vcombine.high %v328_v49, %v336_v50  ;;  %v4235_v61 = vcombine.low %v327_v46, %v335_v48  ;;  %v4310_v48 = vcombine.low %v407_v28, %v415_v29 }
  0x71   :  { %2689 = vmatpush2.bf16.msra.mxu0 %v743_v58  ;;  %v351_v58 = vunpack.c.l.s8.bf16 %v107_v56 }
  0x72   :  { %2874 = vmatpush2.bf16.msra.mxu1 %v759_v59  ;;  %2690 = vmatprep.subr.bf16.mxu0 %v4495_v0  ;;  %v344_v59 = vunpack.c.h.s8.bf16 %v103_v55 }
  0x73   :  { %2377 = vmatmul.mubr.bf16.gmra.mxu0 %v4175_v62  ;;  %2875 = vmatprep.subr.bf16.mxu1 %v4495_v0  ;;  %v4237_v62 = vcombine.low %v328_v49, %v336_v50  ;;  %v4251_v63 = vcombine.high %v343_v57, %v351_v58  ;;  %v4312_v49 = vcombine.low %v408_v30, %v416_v31 }
  0x74   :  { %2562 = vmatmul.mubr.bf16.gmra.mxu1 %v4177_v42  ;;  %2384 = vmatprep.mubr.bf16.mxu0 %v4191_v41  ;;  %v4253_v43 = vcombine.high %v344_v59, %v352_v60  ;;  %v111_v42 = vld [vmem:[%s6604_s0 + $0x2d0] sm:$0xff]  ;;  %v4252_v3 = vcombine.low %v344_v59, %v352_v60 }
  0x75   :  { %2569 = vmatprep.mubr.bf16.mxu1 %v4193_v44  ;;  %2691 = vmatpush2.bf16.msra.mxu0 %v742_v1  ;;  %v115_v41 = vld [vmem:[%s6604_s0 + $0x2ee] sm:$0xff]  ;;  %v359_v44 = vunpack.c.l.s8.bf16 %v111_v42  ;;  %v360_v47 = vunpack.c.h.s8.bf16 %v111_v42 }
  0x76   :  { %2876 = vmatpush2.bf16.msra.mxu1 %v758_v2  ;;  %2692 = vmatprep.subr.bf16.mxu0 %v4495_v0  ;;  %v367_v45 = vunpack.c.l.s8.bf16 %v115_v41  ;;  %v368_v1 = vunpack.c.h.s8.bf16 %v115_v41  ;;  %v4250_v2 = vcombine.low %v343_v57, %v351_v58 }
  0x77   :  { %2877 = vmatprep.subr.bf16.mxu1 %v4495_v0 }
  0x78   :  { %v4266_v4 = vcombine.high %v359_v44, %v367_v45  ;;  %v4268_v5 = vcombine.high %v360_v47, %v368_v1  ;;  %v4267_v13 = vcombine.low %v360_v47, %v368_v1 }
  0x79   :  { %2693 = vmatpush2.bf16.msra.mxu0 %v741_v11  ;;  %v384_v11 = vunpack.c.h.s8.bf16 %v123_v7 }
  0x7a   :  { %2878 = vmatpush2.bf16.msra.mxu1 %v757_v12  ;;  %2694 = vmatprep.subr.bf16.mxu0 %v4495_v0  ;;  %v4265_v12 = vcombine.low %v359_v44, %v367_v45 }
  0x7b   :  { %2385 = vmatmul.mubr.bf16.gmra.mxu0 %v4190_v15  ;;  %2879 = vmatprep.subr.bf16.mxu1 %v4495_v0  ;;  %v4283_v15 = vcombine.high %v376_v10, %v384_v11 }
  0x7c   :  { %2570 = vmatmul.mubr.bf16.gmra.mxu1 %v4192_v18  ;;  %2392 = vmatprep.mubr.bf16.mxu0 %v4206_v19  ;;  %v391_v18 = vunpack.c.l.s8.bf16 %v127_v16  ;;  %v399_v19 = vunpack.c.l.s8.bf16 %v131_v17 }
  0x7d   :  { %2577 = vmatprep.mubr.bf16.mxu1 %v4208_v20  ;;  %2695 = vmatpush2.bf16.msra.mxu0 %v740_v23  ;;  %v392_v20 = vunpack.c.h.s8.bf16 %v127_v16  ;;  %v4282_v23 = vcombine.low %v376_v10, %v384_v11  ;;  %v614_v16 = vld [vmem:[%s6603_s2 + $0x478] sm:$0xff] }
  0x7e   :  { %2880 = vmatpush2.bf16.msra.mxu1 %v756_v24  ;;  %2696 = vmatprep.subr.bf16.mxu0 %v4495_v0  ;;  %v4296_v24 = vcombine.high %v391_v18, %v399_v19  ;;  %v4295_v32 = vcombine.low %v391_v18, %v399_v19  ;;  %v645_v19 = vld [vmem:[%s6603_s2 + $0x570] sm:$0xff] }
  0x7f   :  { %2881 = vmatprep.subr.bf16.mxu1 %v4495_v0  ;;  %v4298_v25 = vcombine.high %v392_v20, %v400_v21 }
  0x81   :  { %2697 = vmatpush2.bf16.msra.mxu0 %v739_v33  ;;  %v4297_v33 = vcombine.low %v392_v20, %v400_v21  ;;  %v646_v20 = vld [vmem:[%s6603_s2 + $0x578] sm:$0xff] }
  0x82   :  { %2882 = vmatpush2.bf16.msra.mxu1 %v755_v34  ;;  %3036 = vmatprep.subr.bf16.mxu0 %v4495_v0  ;;  %v4311_v34 = vcombine.high %v407_v28, %v415_v29  ;;  %v786_v27 = vpack.c.bf16 %v646_v20, %v645_v19  ;;  %v612_v29 = vld [vmem:[%s6603_s2 + $0x468] sm:$0xff] }
  0x83   :  { %2393 = vmatmul.mubr.bf16.gmra.mxu0 %v4205_v35  ;;  %3221 = vmatprep.subr.bf16.mxu1 %v4495_v0  ;;  %v4313_v35 = vcombine.high %v408_v30, %v416_v31  ;;  %v32_v30 = vld [vmem:[%s6604_s0 + $0x80] sm:$0xff] }
  0x84   :  { %2578 = vmatmul.mubr.bf16.gmra.mxu1 %v4207_v36  ;;  %2400 = vmatprep.mubr.bf16.mxu0 %v4221_v37  ;;  %v143_v36 = vld [vmem:[%s6604_s0 + $0x3c0] sm:$0xff] }
  0x85   :  { %2585 = vmatprep.mubr.bf16.mxu1 %v4223_v38  ;;  %v147_v37 = vld [vmem:[%s6604_s0 + $0x3de] sm:$0xff]  ;;  %v423_v38 = vunpack.c.l.s8.bf16 %v143_v36  ;;  %v424_v40 = vunpack.c.h.s8.bf16 %v143_v36  ;;  %v201_v36 = vunpack.c.l.s8.bf16 %v32_v30 }
  0x86   :  { %v431_v39 = vunpack.c.l.s8.bf16 %v147_v37  ;;  %v432_v46 = vunpack.c.h.s8.bf16 %v147_v37  ;;  %v36_v31 = vld [vmem:[%s6604_s0 + $0x9e] sm:$0xff] }
  0x87   :  { %v209_v37 = vunpack.c.l.s8.bf16 %v36_v31 }
  0x88   :  { %v4326_v50 = vcombine.high %v423_v38, %v431_v39  ;;  %v4325_v58 = vcombine.low %v423_v38, %v431_v39  ;;  %v4327_v59 = vcombine.low %v424_v40, %v432_v46  ;;  %v202_v39 = vunpack.c.h.s8.bf16 %v32_v30  ;;  %v5275_v30 = vld [vmem:[%s6604_s0 + $0x134] sm:$0xff] }
  0x8b   :  { %2401 = vmatmul.mubr.bf16.gmra.mxu0 %v4220_v51  ;;  %v4328_v51 = vcombine.high %v424_v40, %v432_v46  ;;  %v210_v40 = vunpack.c.h.s8.bf16 %v36_v31  ;;  %v609_v46 = vld [vmem:[%s6603_s2 + $0x450] sm:$0xff] }
  0x8c   :  { %2586 = vmatmul.mubr.bf16.gmra.mxu1 %v4222_v52  ;;  %2408 = vmatprep.mubr.bf16.mxu0 %v4236_v53  ;;  %v151_v52 = vld [vmem:[%s6604_s0 + $0x3fc] sm:$0xff]  ;;  %v5280_v31 = vld [vmem:[%s6604_s0 + $0x152] sm:$0xff] }
  0x8d   :  { %2593 = vmatprep.mubr.bf16.mxu1 %v4238_v54  ;;  %v155_v53 = vld [vmem:[%s6604_s0 + $0x41a] sm:$0xff]  ;;  %v439_v54 = vunpack.c.l.s8.bf16 %v151_v52  ;;  %v440_v56 = vunpack.c.h.s8.bf16 %v151_v52 }
  0x8e   :  { %v447_v55 = vunpack.c.l.s8.bf16 %v155_v53  ;;  %v448_v57 = vunpack.c.h.s8.bf16 %v155_v53  ;;  %v4120_v53 = vcombine.high %v201_v36, %v209_v37 }
  0x90   :  { %v4341_v60 = vcombine.high %v439_v54, %v447_v55  ;;  %v4340_v45 = vcombine.low %v439_v54, %v447_v55  ;;  %v4342_v47 = vcombine.low %v440_v56, %v448_v57  ;;  %v4122_v54 = vcombine.high %v202_v39, %v210_v40 }
  0x93   :  { %2409 = vmatmul.mubr.bf16.gmra.mxu0 %v4235_v61  ;;  %v4343_v61 = vcombine.high %v440_v56, %v448_v57  ;;  %v40_v56 = vld [vmem:[%s6604_s0 + $0xbc] sm:$0xff] }
  0x94   :  { %2594 = vmatmul.mubr.bf16.gmra.mxu1 %v4237_v62  ;;  %2416 = vmatprep.mubr.bf16.mxu0 %v4251_v63  ;;  %v159_v62 = vld [vmem:[%s6604_s0 + $0x438] sm:$0xff] }
  0x95   :  { %2601 = vmatprep.mubr.bf16.mxu1 %v4253_v43  ;;  %v163_v63 = vld [vmem:[%s6604_s0 + $0x456] sm:$0xff]  ;;  %v455_v43 = vunpack.c.l.s8.bf16 %v159_v62  ;;  %v456_v41 = vunpack.c.h.s8.bf16 %v159_v62  ;;  %v640_v62 = vld [vmem:[%s6603_s2 + $0x548] sm:$0xff] }
  0x96   :  { %v463_v42 = vunpack.c.l.s8.bf16 %v163_v63  ;;  %v464_v44 = vunpack.c.h.s8.bf16 %v163_v63  ;;  %v44_v57 = vld [vmem:[%s6604_s0 + $0xda] sm:$0xff]  ;;  %v217_v63 = vunpack.c.l.s8.bf16 %v40_v56 }
  0x98   :  { %v4356_v1 = vcombine.high %v455_v43, %v463_v42  ;;  %v4355_v9 = vcombine.low %v455_v43, %v463_v42  ;;  %v4357_v10 = vcombine.low %v456_v41, %v464_v44  ;;  %v225_v43 = vunpack.c.l.s8.bf16 %v44_v57 }
  0x99   :  { %v218_v42 = vunpack.c.h.s8.bf16 %v40_v56 }
  0x9b   :  { %2417 = vmatmul.mubr.bf16.gmra.mxu0 %v4250_v2  ;;  %v4358_v2 = vcombine.high %v456_v41, %v464_v44  ;;  %v226_v41 = vunpack.c.h.s8.bf16 %v44_v57 }
  0x9c   :  { %2602 = vmatmul.mubr.bf16.gmra.mxu1 %v4252_v3  ;;  %2424 = vmatprep.mubr.bf16.mxu0 %v4266_v4  ;;  %v16_v3 = vld [vmem:[%s6604_s0 + $0x8] sm:$0xff] }
  0x9d   :  { %2609 = vmatprep.mubr.bf16.mxu1 %v4268_v5  ;;  %v20_v4 = vld [vmem:[%s6604_s0 + $0x26] sm:$0xff]  ;;  %v169_v5 = vunpack.c.l.s8.bf16 %v16_v3  ;;  %v170_v7 = vunpack.c.h.s8.bf16 %v16_v3  ;;  %v637_v3 = vld [vmem:[%s6603_s2 + $0x530] sm:$0xff] }
  0x9e   :  { %v177_v6 = vunpack.c.l.s8.bf16 %v20_v4  ;;  %v178_v8 = vunpack.c.h.s8.bf16 %v20_v4  ;;  %v638_v4 = vld [vmem:[%s6603_s2 + $0x538] sm:$0xff] }
  0xa0   :  { %v4090_v11 = vcombine.high %v169_v5, %v177_v6 }
  0xa3   :  { %2425 = vmatmul.mubr.bf16.gmra.mxu0 %v4265_v12  ;;  %v4092_v12 = vcombine.high %v170_v7, %v178_v8 }
  0xa4   :  { %2610 = vmatmul.mubr.bf16.gmra.mxu1 %v4267_v13  ;;  %2432 = vmatprep.mubr.bf16.mxu0 %v4281_v14  ;;  %v24_v13 = vld [vmem:[%s6604_s0 + $0x44] sm:$0xff] }
  0xa5   :  { %2617 = vmatprep.mubr.bf16.mxu1 %v4283_v15  ;;  %v28_v14 = vld [vmem:[%s6604_s0 + $0x62] sm:$0xff]  ;;  %v613_v15 = vld [vmem:[%s6603_s2 + $0x470] sm:$0xff]  ;;  %v185_v17 = vunpack.c.l.s8.bf16 %v24_v13  ;;  %v186_v21 = vunpack.c.h.s8.bf16 %v24_v13 }
  0xa6   :  { %v193_v18 = vunpack.c.l.s8.bf16 %v28_v14  ;;  %v604_v13 = vld [vmem:[%s6603_s2 + $0x428] sm:$0xff] }
  0xa8   :  { %v4105_v28 = vcombine.high %v185_v17, %v193_v18 }
  0xab   :  { %2433 = vmatmul.mubr.bf16.gmra.mxu0 %v4280_v22  ;;  %v194_v22 = vunpack.c.h.s8.bf16 %v28_v14  ;;  %v635_v14 = vld [vmem:[%s6603_s2 + $0x520] sm:$0xff] }
  0xac   :  { %2618 = vmatmul.mubr.bf16.gmra.mxu1 %v4282_v23  ;;  %2440 = vmatprep.mubr.bf16.mxu0 %v4296_v24  ;;  %v4089_v23 = vcombine.low %v169_v5, %v177_v6  ;;  %v4091_v24 = vcombine.low %v170_v7, %v178_v8  ;;  %v4121_v5 = vcombine.low %v202_v39, %v210_v40  ;;  %v5233_v8 = vld [vmem:[%s6604_s0 + $0xf8] sm:$0xff]  ;;  %v257_v39 = vunpack.c.l.s8.bf16 %v5280_v31 }
  0xad   :  { %2625 = vmatprep.mubr.bf16.mxu1 %v4298_v25  ;;  %v770_v25 = vpack.c.bf16 %v614_v16, %v613_v15  ;;  %v4106_v52 = vcombine.low %v186_v21, %v194_v22  ;;  %v4135_v6 = vcombine.high %v217_v63, %v225_v43  ;;  %v4137_v7 = vcombine.high %v218_v42, %v226_v41  ;;  %v636_v15 = vld [vmem:[%s6603_s2 + $0x528] sm:$0xff] }
  0xae   :  { %v233_v16 = vunpack.c.l.s8.bf16 %v5233_v8  ;;  %v250_v40 = vunpack.c.h.s8.bf16 %v5275_v30 }
  0xb3   :  { %2441 = vmatmul.mubr.bf16.gmra.mxu0 %v4295_v32  ;;  %v4107_v32 = vcombine.high %v186_v21, %v194_v22  ;;  %v781_v21 = vpack.c.bf16 %v636_v15, %v635_v14  ;;  %v601_v22 = vld [vmem:[%s6603_s2 + $0x410] sm:$0xff]  ;;  %v623_v15 = vld [vmem:[%s6603_s2 + $0x4c0] sm:$0xff] }
  0xb4   :  { %2626 = vmatmul.mubr.bf16.gmra.mxu1 %v4297_v33  ;;  %2448 = vmatprep.mubr.bf16.mxu0 %v4311_v34  ;;  %v643_v33 = vld [vmem:[%s6603_s2 + $0x560] sm:$0xff]  ;;  %v644_v34 = vld [vmem:[%s6603_s2 + $0x568] sm:$0xff] }
  0xb5   :  { %2633 = vmatprep.mubr.bf16.mxu1 %v4313_v35  ;;  %v769_v35 = vpack.c.bf16 %v612_v29, %v611_v26  ;;  %v785_v38 = vpack.c.bf16 %v644_v34, %v643_v33  ;;  %v634_v26 = vld [vmem:[%s6603_s2 + $0x518] sm:$0xff]  ;;  %v599_v34 = vld [vmem:[%s6603_s2 + $0x400] sm:$0xff] }
  0xbb   :  { %2449 = vmatmul.mubr.bf16.gmra.mxu0 %v4310_v48  ;;  %v610_v48 = vld [vmem:[%s6603_s2 + $0x458] sm:$0xff] }
  0xbc   :  { %2634 = vmatmul.mubr.bf16.gmra.mxu1 %v4312_v49  ;;  %2456 = vmatprep.mubr.bf16.mxu0 %v4326_v50  ;;  %v4104_v49 = vcombine.low %v185_v17, %v193_v18  ;;  %v641_v50 = vld [vmem:[%s6603_s2 + $0x550] sm:$0xff]  ;;  %v768_v55 = vpack.c.bf16 %v610_v48, %v609_v46  ;;  %v234_v18 = vunpack.c.h.s8.bf16 %v5233_v8  ;;  %v258_v46 = vunpack.c.h.s8.bf16 %v5280_v31  ;;  %v622_v31 = vld [vmem:[%s6603_s2 + $0x4b8] sm:$0xff] }
  0xbd   :  { %2641 = vmatprep.mubr.bf16.mxu1 %v4328_v51  ;;  %v642_v51 = vld [vmem:[%s6603_s2 + $0x558] sm:$0xff] }
  0xbe   :  { %v4167_v57 = vcombine.high %v250_v40, %v258_v46  ;;  %v4166_v8 = vcombine.low %v250_v40, %v258_v46 }
  0xc3   :  { %2457 = vmatmul.mubr.bf16.gmra.mxu0 %v4325_v58  ;;  %v784_v58 = vpack.c.bf16 %v642_v51, %v641_v50  ;;  %v629_v50 = vld [vmem:[%s6603_s2 + $0x4f0] sm:$0xff]  ;;  %v630_v51 = vld [vmem:[%s6603_s2 + $0x4f8] sm:$0xff] }
  0xc4   :  { %2642 = vmatmul.mubr.bf16.gmra.mxu1 %v4327_v59  ;;  %2464 = vmatprep.mubr.bf16.mxu0 %v4341_v60  ;;  %v607_v59 = vld [vmem:[%s6603_s2 + $0x440] sm:$0xff]  ;;  %v608_v60 = vld [vmem:[%s6603_s2 + $0x448] sm:$0xff] }
  0xc5   :  { %2649 = vmatprep.mubr.bf16.mxu1 %v4343_v61  ;;  %v639_v61 = vld [vmem:[%s6603_s2 + $0x540] sm:$0xff]  ;;  %v767_v44 = vpack.c.bf16 %v608_v60, %v607_v59  ;;  %v5322_v59 = vld [vmem:[%s6604_s0 + $0x18e] sm:$0xff]  ;;  %v778_v60 = vpack.c.bf16 %v630_v51, %v629_v50 }
  0xcb   :  { %2465 = vmatmul.mubr.bf16.gmra.mxu0 %v4340_v45  ;;  %v783_v45 = vpack.c.bf16 %v640_v62, %v639_v61  ;;  %v627_v62 = vld [vmem:[%s6603_s2 + $0x4e0] sm:$0xff] }
  0xcc   :  { %2650 = vmatmul.mubr.bf16.gmra.mxu1 %v4342_v47  ;;  %2472 = vmatprep.mubr.bf16.mxu0 %v4356_v1  ;;  %v605_v47 = vld [vmem:[%s6603_s2 + $0x430] sm:$0xff]  ;;  %v606_v1 = vld [vmem:[%s6603_s2 + $0x438] sm:$0xff] }
  0xcd   :  { %2657 = vmatprep.mubr.bf16.mxu1 %v4358_v2  ;;  %v4119_v2 = vcombine.low %v201_v36, %v209_v37  ;;  %v631_v36 = vld [vmem:[%s6603_s2 + $0x500] sm:$0xff]  ;;  %v632_v37 = vld [vmem:[%s6603_s2 + $0x508] sm:$0xff] }
  0xd3   :  { %2473 = vmatmul.mubr.bf16.gmra.mxu0 %v4355_v9  ;;  %v5238_v9 = vld [vmem:[%s6604_s0 + $0x116] sm:$0xff] }
  0xd4   :  { %2658 = vmatmul.mubr.bf16.gmra.mxu1 %v4357_v10  ;;  %2698 = vmatprep.mubr.bf16.mxu0 %v4090_v11  ;;  %v766_v10 = vpack.c.bf16 %v606_v1, %v605_v47  ;;  %v782_v11 = vpack.c.bf16 %v638_v4, %v637_v3  ;;  %v241_v17 = vunpack.c.l.s8.bf16 %v5238_v9  ;;  %v242_v19 = vunpack.c.h.s8.bf16 %v5238_v9  ;;  %v625_v3 = vld [vmem:[%s6603_s2 + $0x4d0] sm:$0xff]  ;;  %v626_v4 = vld [vmem:[%s6603_s2 + $0x4d8] sm:$0xff] }
  0xd5   :  { %2883 = vmatprep.mubr.bf16.mxu1 %v4092_v12  ;;  %v603_v12 = vld [vmem:[%s6603_s2 + $0x420] sm:$0xff]  ;;  %v274_v47 = vunpack.c.h.s8.bf16 %v5322_v59 }
  0xd6   :  { %v765_v20 = vpack.c.bf16 %v604_v13, %v603_v12  ;;  %v4152_v29 = vcombine.high %v234_v18, %v242_v19  ;;  %v5364_v12 = vld [vmem:[%s6604_s0 + $0x1ca] sm:$0xff]  ;;  %v776_v13 = vpack.c.bf16 %v626_v4, %v625_v3  ;;  %v650_v4 = vld [vmem:[%s6603_s2 + $0x598] sm:$0xff] }
  0xd7   :  { %v649_v3 = vld [vmem:[%s6603_s2 + $0x590] sm:$0xff] }
  0xdb   :  { %2699 = vmatmul.mubr.bf16.vlgmr.msra.gmra.mxu0 %v4089_v23  ;;  %v602_v23 = vld [vmem:[%s6603_s2 + $0x418] sm:$0xff] }
  0xdc   :  { %2884 = vmatmul.mubr.bf16.vlgmr.msra.gmra.mxu1 %v4091_v24  ;;  %3037 = vmatpush1.bf16.msra.mxu0 %v770_v25  ;;  %v4134_v24 = vcombine.low %v217_v63, %v225_v43  ;;  %v633_v25 = vld [vmem:[%s6603_s2 + $0x510] sm:$0xff]  ;;  %v628_v63 = vld [vmem:[%s6603_s2 + $0x4e8] sm:$0xff]  ;;  %v659_v43 = vld [vmem:[%s6603_s2 + $0x5e0] sm:$0xff] }
  0xdd   :  { %3222 = vmatpush1.bf16.msra.mxu1 %v786_v27  ;;  %2706 = vmatprep.mubr.bf16.mxu0 %v4105_v28  ;;  %v4136_v27 = vcombine.low %v218_v42, %v226_v41  ;;  %v4150_v28 = vcombine.high %v233_v16, %v241_v17  ;;  %v780_v33 = vpack.c.bf16 %v634_v26, %v633_v25  ;;  %v660_v42 = vld [vmem:[%s6603_s2 + $0x5e8] sm:$0xff]  ;;  %v290_v26 = vunpack.c.h.s8.bf16 %v5364_v12 }
  0xde   :  { %2891 = vmatprep.mubr.bf16.mxu1 %v4107_v32  ;;  %3038 = vmatprep.subr.bf16.mxu0 %v4495_v0  ;;  %v764_v32 = vpack.c.bf16 %v602_v23, %v601_v22  ;;  %v777_v1 = vpack.c.bf16 %v628_v63, %v627_v62  ;;  %v289_v22 = vunpack.c.l.s8.bf16 %v5364_v12  ;;  %v5456_v12 = vld [vmem:[%s6604_s0 + $0x242] sm:$0xff] }
  0xdf   :  { %3223 = vmatprep.subr.bf16.mxu1 %v4495_v0 }
  0xe0   :  { %3039 = vmatpush1.bf16.msra.mxu0 %v769_v35  ;;  %v600_v35 = vld [vmem:[%s6603_s2 + $0x408] sm:$0xff] }
  0xe1   :  { %3224 = vmatpush1.bf16.msra.mxu1 %v785_v38  ;;  %3040 = vmatprep.subr.bf16.mxu0 %v4495_v0  ;;  %v249_v38 = vunpack.c.l.s8.bf16 %v5275_v30  ;;  %v763_v48 = vpack.c.bf16 %v600_v35, %v599_v34  ;;  %v621_v30 = vld [vmem:[%s6603_s2 + $0x4b0] sm:$0xff]  ;;  %v654_v35 = vld [vmem:[%s6603_s2 + $0x5b8] sm:$0xff] }
  0xe2   :  { %3225 = vmatprep.subr.bf16.mxu1 %v4495_v0  ;;  %v653_v34 = vld [vmem:[%s6603_s2 + $0x5b0] sm:$0xff]  ;;  %v774_v50 = vpack.c.bf16 %v622_v31, %v621_v30 }
  0xe3   :  { %2707 = vmatmul.mubr.bf16.gmra.mxu0 %v4104_v49  ;;  %v779_v49 = vpack.c.bf16 %v632_v37, %v631_v36  ;;  %v4165_v56 = vcombine.high %v249_v38, %v257_v39 }
  0xe4   :  { %2892 = vmatmul.mubr.bf16.gmra.mxu1 %v4106_v52  ;;  %2714 = vmatprep.mubr.bf16.mxu0 %v4120_v53  ;;  %v4149_v52 = vcombine.low %v233_v16, %v241_v17  ;;  %v661_v53 = vld [vmem:[%s6603_s2 + $0x5f0] sm:$0xff]  ;;  %v624_v16 = vld [vmem:[%s6603_s2 + $0x4c8] sm:$0xff] }
  0xe5   :  { %2899 = vmatprep.mubr.bf16.mxu1 %v4122_v54  ;;  %3041 = vmatpush1.bf16.msra.mxu0 %v768_v55  ;;  %v662_v54 = vld [vmem:[%s6603_s2 + $0x5f8] sm:$0xff]  ;;  %v4151_v55 = vcombine.low %v234_v18, %v242_v19  ;;  %v655_v18 = vld [vmem:[%s6603_s2 + $0x5c0] sm:$0xff]  ;;  %v656_v19 = vld [vmem:[%s6603_s2 + $0x5c8] sm:$0xff] }
  0xe6   :  { %3226 = vmatpush1.bf16.msra.mxu1 %v784_v58  ;;  %3042 = vmatprep.subr.bf16.mxu0 %v4495_v0  ;;  %v5317_v58 = vld [vmem:[%s6604_s0 + $0x170] sm:$0xff]  ;;  %v794_v61 = vpack.c.bf16 %v662_v54, %v661_v53  ;;  %v619_v53 = vld [vmem:[%s6603_s2 + $0x4a0] sm:$0xff]  ;;  %v620_v54 = vld [vmem:[%s6603_s2 + $0x4a8] sm:$0xff] }
  0xe7   :  { %3227 = vmatprep.subr.bf16.mxu1 %v4495_v0  ;;  %v265_v41 = vunpack.c.l.s8.bf16 %v5317_v58 }
  0xe9   :  { %3043 = vmatpush1.bf16.msra.mxu0 %v767_v44  ;;  %v273_v44 = vunpack.c.l.s8.bf16 %v5322_v59 }
  0xea   :  { %3228 = vmatpush1.bf16.msra.mxu1 %v783_v45  ;;  %3044 = vmatprep.subr.bf16.mxu0 %v4495_v0  ;;  %v266_v45 = vunpack.c.h.s8.bf16 %v5317_v58 }
  0xeb   :  { %2715 = vmatmul.mubr.bf16.gmra.mxu0 %v4119_v2  ;;  %3229 = vmatprep.subr.bf16.mxu1 %v4495_v0  ;;  %v793_v2 = vpack.c.bf16 %v660_v42, %v659_v43  ;;  %v4180_v9 = vcombine.high %v265_v41, %v273_v44  ;;  %v773_v42 = vpack.c.bf16 %v620_v54, %v619_v53 }
  0xec   :  { %2900 = vmatmul.mubr.bf16.gmra.mxu1 %v4121_v5  ;;  %2722 = vmatprep.mubr.bf16.mxu0 %v4135_v6  ;;  %v4164_v5 = vcombine.low %v249_v38, %v257_v39  ;;  %v657_v6 = vld [vmem:[%s6603_s2 + $0x5d0] sm:$0xff]  ;;  %v4181_v37 = vcombine.low %v266_v45, %v274_v47 }
  0xed   :  { %2907 = vmatprep.mubr.bf16.mxu1 %v4137_v7  ;;  %3045 = vmatpush1.bf16.msra.mxu0 %v766_v10  ;;  %v658_v7 = vld [vmem:[%s6603_s2 + $0x5d8] sm:$0xff]  ;;  %v4182_v10 = vcombine.high %v266_v45, %v274_v47  ;;  %v617_v45 = vld [vmem:[%s6603_s2 + $0x490] sm:$0xff] }
  0xee   :  { %3230 = vmatpush1.bf16.msra.mxu1 %v782_v11  ;;  %3046 = vmatprep.subr.bf16.mxu0 %v4495_v0  ;;  %v5359_v11 = vld [vmem:[%s6604_s0 + $0x1ac] sm:$0xff]  ;;  %v792_v14 = vpack.c.bf16 %v658_v7, %v657_v6  ;;  %v618_v47 = vld [vmem:[%s6603_s2 + $0x498] sm:$0xff] }
  0xef   :  { %3231 = vmatprep.subr.bf16.mxu1 %v4495_v0  ;;  %v282_v25 = vunpack.c.h.s8.bf16 %v5359_v11 }
  0xf1   :  { %3047 = vmatpush1.bf16.msra.mxu0 %v765_v20  ;;  %v4197_v46 = vcombine.high %v282_v25, %v290_v26  ;;  %v4196_v6 = vcombine.low %v282_v25, %v290_v26 }
  0xf2   :  { %3232 = vmatpush1.bf16.msra.mxu1 %v781_v21  ;;  %3048 = vmatprep.subr.bf16.mxu0 %v4495_v0  ;;  %v281_v21 = vunpack.c.l.s8.bf16 %v5359_v11  ;;  %v5451_v11 = vld [vmem:[%s6604_s0 + $0x224] sm:$0xff] }
  0xf3   :  { %2723 = vmatmul.mubr.bf16.gmra.mxu0 %v4134_v24  ;;  %3233 = vmatprep.subr.bf16.mxu1 %v4495_v0 }
  0xf4   :  { %2908 = vmatmul.mubr.bf16.gmra.mxu1 %v4136_v27  ;;  %2730 = vmatprep.mubr.bf16.mxu0 %v4150_v28  ;;  %v775_v27 = vpack.c.bf16 %v624_v16, %v623_v15  ;;  %v4195_v38 = vcombine.high %v281_v21, %v289_v22  ;;  %v788_v15 = vpack.c.bf16 %v650_v4, %v649_v3  ;;  %v615_v16 = vld [vmem:[%s6603_s2 + $0x480] sm:$0xff] }
  0xf5   :  { %2915 = vmatprep.mubr.bf16.mxu1 %v4152_v29  ;;  %3049 = vmatpush1.bf16.msra.mxu0 %v764_v32  ;;  %v791_v29 = vpack.c.bf16 %v656_v19, %v655_v18  ;;  %v647_v19 = vld [vmem:[%s6603_s2 + $0x580] sm:$0xff] }
  0xf6   :  { %3234 = vmatpush1.bf16.msra.mxu1 %v780_v33  ;;  %3050 = vmatprep.subr.bf16.mxu0 %v4495_v0  ;;  %v4179_v33 = vcombine.low %v265_v41, %v273_v44 }
  0xf7   :  { %3235 = vmatprep.subr.bf16.mxu1 %v4495_v0 }
  0xf9   :  { %3051 = vmatpush1.bf16.msra.mxu0 %v763_v48  ;;  %v5405_v48 = vld [vmem:[%s6604_s0 + $0x1e8] sm:$0xff] }
  0xfa   :  { %3236 = vmatpush1.bf16.msra.mxu1 %v779_v49  ;;  %3052 = vmatprep.subr.bf16.mxu0 %v4495_v0  ;;  %v5410_v49 = vld [vmem:[%s6604_s0 + $0x206] sm:$0xff]  ;;  %v297_v59 = vunpack.c.l.s8.bf16 %v5405_v48  ;;  %v298_v63 = vunpack.c.h.s8.bf16 %v5405_v48  ;;  %v100_v48 = vld [vmem:[%s6604_s0 + $0x27e] sm:$0xff] }
  0xfb   :  { %2731 = vmatmul.mubr.bf16.gmra.mxu0 %v4149_v52  ;;  %3237 = vmatprep.subr.bf16.mxu1 %v4495_v0  ;;  %v790_v52 = vpack.c.bf16 %v654_v35, %v653_v34  ;;  %v306_v43 = vunpack.c.h.s8.bf16 %v5410_v49  ;;  %v337_v54 = vunpack.c.l.s8.bf16 %v100_v48 }
  0xfc   :  { %2916 = vmatmul.mubr.bf16.gmra.mxu1 %v4151_v55  ;;  %2738 = vmatprep.mubr.bf16.mxu0 %v4165_v56  ;;  %v651_v56 = vld [vmem:[%s6603_s2 + $0x5a0] sm:$0xff] }
  0xfd   :  { %2923 = vmatprep.mubr.bf16.mxu1 %v4167_v57  ;;  %3053 = vmatpush2.bf16.msra.mxu0 %v778_v60  ;;  %v652_v57 = vld [vmem:[%s6603_s2 + $0x5a8] sm:$0xff]  ;;  %v305_v60 = vunpack.c.l.s8.bf16 %v5410_v49  ;;  %v4211_v35 = vcombine.low %v298_v63, %v306_v43 }
  0xfe   :  { %3238 = vmatpush2.bf16.msra.mxu1 %v794_v61  ;;  %3054 = vmatprep.subr.bf16.mxu0 %v4495_v0  ;;  %v789_v44 = vpack.c.bf16 %v652_v57, %v651_v56 }
  0xff   :  { %3239 = vmatprep.subr.bf16.mxu1 %v4495_v0  ;;  %v4210_v7 = vcombine.high %v297_v59, %v305_v60 }
 0x101   :  { %3055 = vmatpush2.bf16.msra.mxu0 %v777_v1 }
 0x102   :  { %3240 = vmatpush2.bf16.msra.mxu1 %v793_v2  ;;  %3056 = vmatprep.subr.bf16.mxu0 %v4495_v0  ;;  %v4194_v2 = vcombine.low %v281_v21, %v289_v22  ;;  %v313_v22 = vunpack.c.l.s8.bf16 %v5451_v11 }
 0x103   :  { %v2330_v17 = vpop.f32.mrf.mxu0  ;;  %2739 = vmatmul.mubr.bf16.gmra.mxu0 %v4164_v5  ;;  %3241 = vmatprep.subr.bf16.mxu1 %v4495_v0 }
 0x104   :  { %v2515_v20 = vpop.f32.mrf.mxu1  ;;  %2924 = vmatmul.mubr.bf16.gmra.mxu1 %v4166_v8  ;;  %2746 = vmatprep.mubr.bf16.mxu0 %v4180_v9 }
 0x105   :  { %v5382_v23 = vadd.f32 %v2515_v20, %v2330_v17  ;;  %v2332_v24 = vpop.f32.mrf.mxu0  ;;  %2931 = vmatprep.mubr.bf16.mxu1 %v4182_v10  ;;  %3057 = vmatpush2.bf16.msra.mxu0 %v776_v13  ;;  %v4212_v10 = vcombine.high %v298_v63, %v306_v43  ;;  %v772_v13 = vpack.c.bf16 %v618_v47, %v617_v45  ;;  %v616_v17 = vld [vmem:[%s6603_s2 + $0x488] sm:$0xff]  ;;  %v104_v47 = vld [vmem:[%s6604_s0 + $0x29c] sm:$0xff] }
 0x106   :  { %v2517_v28 = vpop.f32.mrf.mxu1  ;;  %3242 = vmatpush2.bf16.msra.mxu1 %v792_v14  ;;  %3058 = vmatprep.subr.bf16.mxu0 %v4495_v0  ;;  %v648_v20 = vld [vmem:[%s6603_s2 + $0x588] sm:$0xff]  ;;  %v321_v24 = vunpack.c.l.s8.bf16 %v5456_v12 }
 0x107   :  { %v2333_v32 = vpop.f32.mrf.mxu0  ;;  %3243 = vmatprep.subr.bf16.mxu1 %v4495_v0  ;;  %v322_v28 = vunpack.c.h.s8.bf16 %v5456_v12  ;;  %v787_v31 = vpack.c.bf16 %v648_v20, %v647_v19 }
 0x108   :  { %v2518_v36 = vpop.f32.mrf.mxu1 }
 0x109   :  { %v5400_v39 = vadd.f32 %v2518_v36, %v2333_v32  ;;  %v2335_v40 = vpop.f32.mrf.mxu0  ;;  %3059 = vmatpush2.bf16.msra.mxu0 %v775_v27  ;;  %v314_v27 = vunpack.c.h.s8.bf16 %v5451_v11  ;;  %v4225_v36 = vcombine.high %v313_v22, %v321_v24 }
 0x10a   :  { %v2520_v51 = vpop.f32.mrf.mxu1  ;;  %3244 = vmatpush2.bf16.msra.mxu1 %v791_v29  ;;  %3060 = vmatprep.subr.bf16.mxu0 %v4495_v0  ;;  %v771_v29 = vpack.c.bf16 %v616_v17, %v615_v16 }
 0x10b   :  { %v2338_v55 = vpop.f32.mrf.mxu0  ;;  %2747 = vmatmul.mubr.bf16.gmra.mxu0 %v4179_v33  ;;  %3245 = vmatprep.subr.bf16.mxu1 %v4495_v0  ;;  %v4209_v33 = vcombine.low %v297_v59, %v305_v60  ;;  %v4227_v40 = vcombine.high %v314_v27, %v322_v28  ;;  %v6607_v51 = vmov 0.0   ;;  %v4226_v43 = vcombine.low %v314_v27, %v322_v28 }
 0x10c   :  { %v2523_v58 = vpop.f32.mrf.mxu1  ;;  %2932 = vmatmul.mubr.bf16.gmra.mxu1 %v4181_v37  ;;  %2754 = vmatprep.mubr.bf16.mxu0 %v4195_v38 }
 0x10d   :  { %v5428_v61 = vadd.f32 %v2523_v58, %v2338_v55  ;;  %v2340_v62 = vpop.f32.mrf.mxu0  ;;  %2939 = vmatprep.mubr.bf16.mxu1 %v4197_v46  ;;  %3061 = vmatpush2.bf16.msra.mxu0 %v774_v50  ;;  %v96_v46 = vld [vmem:[%s6604_s0 + $0x260] sm:$0xff]  ;;  %v338_v58 = vunpack.c.h.s8.bf16 %v100_v48 }
 0x10e   :  { %v2525_v41 = vpop.f32.mrf.mxu1  ;;  %3246 = vmatpush2.bf16.msra.mxu1 %v790_v52  ;;  %3062 = vmatprep.subr.bf16.mxu0 %v4495_v0  ;;  %v329_v53 = vunpack.c.l.s8.bf16 %v96_v46  ;;  %v330_v57 = vunpack.c.h.s8.bf16 %v96_v46  ;;  %v4224_v62 = vcombine.low %v313_v22, %v321_v24  ;;  %v116_v22 = vld [vmem:[%s6604_s0 + $0x2f6] sm:$0xff] }
 0x10f   :  { %v2341_v1 = vpop.f32.mrf.mxu0  ;;  %3247 = vmatprep.subr.bf16.mxu1 %v4495_v0 }
 0x110   :  { %v2526_v5 = vpop.f32.mrf.mxu1  ;;  %v4242_v45 = vcombine.high %v330_v57, %v338_v58  ;;  %v4241_v16 = vcombine.low %v330_v57, %v338_v58 }
 0x111   :  { %v5446_v8 = vadd.f32 %v2526_v5, %v2341_v1  ;;  %v2343_v9 = vpop.f32.mrf.mxu0  ;;  %3063 = vmatpush2.bf16.msra.mxu0 %v773_v42  ;;  %v4240_v42 = vcombine.high %v329_v53, %v337_v54  ;;  %v108_v1 = vld [vmem:[%s6604_s0 + $0x2ba] sm:$0xff]  ;;  %v345_v5 = vunpack.c.l.s8.bf16 %v104_v47 }
 0x112   :  { %v2528_v14 = vpop.f32.mrf.mxu1  ;;  %3248 = vmatpush2.bf16.msra.mxu1 %v789_v44  ;;  %3064 = vmatprep.subr.bf16.mxu0 %v4495_v0  ;;  %v354_v11 = vunpack.c.h.s8.bf16 %v108_v1 }
 0x113   :  { %v2346_v18 = vpop.f32.mrf.mxu0  ;;  %2755 = vmatmul.mubr.bf16.gmra.mxu0 %v4194_v2  ;;  %3249 = vmatprep.subr.bf16.mxu1 %v4495_v0  ;;  %v4239_v14 = vcombine.low %v329_v53, %v337_v54  ;;  %v124_v53 = vld [vmem:[%s6604_s0 + $0x332] sm:$0xff] }
 0x114   :  { %v2531_v21 = vpop.f32.mrf.mxu1  ;;  %2940 = vmatmul.mubr.bf16.gmra.mxu1 %v4196_v6  ;;  %2762 = vmatprep.mubr.bf16.mxu0 %v4210_v7  ;;  %v353_v6 = vunpack.c.l.s8.bf16 %v108_v1 }
 0x115   :  { %v5474_v25 = vadd.f32 %v2531_v21, %v2346_v18  ;;  %v2348_v26 = vpop.f32.mrf.mxu0  ;;  %2947 = vmatprep.mubr.bf16.mxu1 %v4212_v10  ;;  %3065 = vmatpush2.bf16.msra.mxu0 %v772_v13  ;;  %v346_v10 = vunpack.c.h.s8.bf16 %v104_v47  ;;  %v112_v21 = vld [vmem:[%s6604_s0 + $0x2d8] sm:$0xff] }
 0x116   :  { %v2533_v30 = vpop.f32.mrf.mxu1  ;;  %3250 = vmatpush2.bf16.msra.mxu1 %v788_v15  ;;  %3066 = vmatprep.subr.bf16.mxu0 %v4495_v0  ;;  %v4255_v17 = vcombine.high %v345_v5, %v353_v6  ;;  %v361_v28 = vunpack.c.l.s8.bf16 %v112_v21 }
 0x117   :  { %v2349_v32 = vpop.f32.mrf.mxu0  ;;  %3251 = vmatprep.subr.bf16.mxu1 %v4495_v0  ;;  %v4257_v20 = vcombine.high %v346_v10, %v354_v11 }
 0x118   :  { %v2534_v34 = vpop.f32.mrf.mxu1 }
 0x119   :  { %v5480_v37 = vadd.f32 %v2534_v34, %v2349_v32  ;;  %v2351_v38 = vpop.f32.mrf.mxu0  ;;  %3067 = vmatpush2.bf16.msra.mxu0 %v771_v29  ;;  %v369_v29 = vunpack.c.l.s8.bf16 %v116_v22  ;;  %v362_v32 = vunpack.c.h.s8.bf16 %v112_v21 }
 0x11a   :  { %v2536_v49 = vpop.f32.mrf.mxu1  ;;  %3252 = vmatpush2.bf16.msra.mxu1 %v787_v31  ;;  %3406 = vmatprep.subr.bf16.mxu0 %v4495_v0 }
 0x11b   :  { %v2354_v50 = vpop.f32.mrf.mxu0  ;;  %2763 = vmatmul.mubr.bf16.gmra.mxu0 %v4209_v33  ;;  %4410 = vmatprep.subr.bf16.mxu1 %v6607_v51  ;;  %v370_v33 = vunpack.c.h.s8.bf16 %v116_v22  ;;  %v4270_v46 = vcombine.high %v361_v28, %v369_v29 }
 0x11c   :  { %v2539_v52 = vpop.f32.mrf.mxu1  ;;  %2948 = vmatmul.mubr.bf16.gmra.mxu1 %v4211_v35  ;;  %2770 = vmatprep.mubr.bf16.mxu0 %v4225_v36  ;;  %v4254_v36 = vcombine.low %v345_v5, %v353_v6  ;;  %v128_v6 = vld [vmem:[%s6604_s0 + $0x350] sm:$0xff] }
 0x11d   :  { %v5490_v55 = vadd.f32 %v2539_v52, %v2354_v50  ;;  %v2356_v56 = vpop.f32.mrf.mxu0  ;;  %2955 = vmatprep.mubr.bf16.mxu1 %v4227_v40  ;;  %v4256_v40 = vcombine.low %v346_v10, %v354_v11  ;;  %v4272_v50 = vcombine.high %v362_v32, %v370_v33  ;;  %v120_v52 = vld [vmem:[%s6604_s0 + $0x314] sm:$0xff]  ;;  %v4271_v1 = vcombine.low %v362_v32, %v370_v33  ;;  %v136_v32 = vld [vmem:[%s6604_s0 + $0x38c] sm:$0xff] }
 0x11e   :  { %v2541_v59 = vpop.f32.mrf.mxu1  ;;  %v377_v58 = vunpack.c.l.s8.bf16 %v120_v52  ;;  %v140_v33 = vld [vmem:[%s6604_s0 + $0x3aa] sm:$0xff] }
 0x11f   :  { %v2357_v60 = vpop.f32.mrf.mxu0  ;;  %v385_v59 = vunpack.c.l.s8.bf16 %v124_v53 }
 0x120   :  { %v2542_v63 = vpop.f32.mrf.mxu1 }
 0x121   :  { %v5492_v41 = vadd.f32 %v2542_v63, %v2357_v60  ;;  %v2359_v44 = vpop.f32.mrf.mxu0  ;;  %v378_v63 = vunpack.c.h.s8.bf16 %v120_v52  ;;  %v4284_v22 = vcombine.low %v377_v58, %v385_v59  ;;  %v418_v52 = vunpack.c.h.s8.bf16 %v140_v33 }
 0x122   :  { %v2544_v2 = vpop.f32.mrf.mxu1 }
 0x123   :  { %v2362_v3 = vpop.f32.mrf.mxu0  ;;  %2771 = vmatmul.mubr.bf16.gmra.mxu0 %v4224_v62  ;;  %v4285_v2 = vcombine.high %v377_v58, %v385_v59 }
 0x124   :  { %v2547_v4 = vpop.f32.mrf.mxu1  ;;  %2956 = vmatmul.mubr.bf16.gmra.mxu1 %v4226_v43  ;;  %2778 = vmatprep.mubr.bf16.mxu0 %v4240_v42  ;;  %v386_v43 = vunpack.c.h.s8.bf16 %v124_v53 }
 0x125   :  { %v5500_v7 = vadd.f32 %v2547_v4, %v2362_v3  ;;  %v2364_v9 = vpop.f32.mrf.mxu0  ;;  %2963 = vmatprep.mubr.bf16.mxu1 %v4242_v45  ;;  %v4269_v45 = vcombine.low %v361_v28, %v369_v29 }
 0x126   :  { %v2549_v12 = vpop.f32.mrf.mxu1  ;;  %v4287_v5 = vcombine.high %v378_v63, %v386_v43  ;;  %v132_v9 = vld [vmem:[%s6604_s0 + $0x36e] sm:$0xff] }
 0x127   :  { %v2365_v13 = vpop.f32.mrf.mxu0 }
 0x128   :  { %v2550_v15 = vpop.f32.mrf.mxu1 }
 0x129   :  { %v5502_v18 = vadd.f32 %v2550_v15, %v2365_v13  ;;  %v2367_v19 = vpop.f32.mrf.mxu0  ;;  %v393_v13 = vunpack.c.l.s8.bf16 %v128_v6 }
 0x12a   :  { %v2552_v24 = vpop.f32.mrf.mxu1  ;;  %v402_v19 = vunpack.c.h.s8.bf16 %v132_v9 }
 0x12b   :  { %v2370_v26 = vpop.f32.mrf.mxu0  ;;  %2779 = vmatmul.mubr.bf16.gmra.mxu0 %v4239_v14  ;;  %v401_v14 = vunpack.c.l.s8.bf16 %v132_v9 }
 0x12c   :  { %v2555_v27 = vpop.f32.mrf.mxu1  ;;  %2964 = vmatmul.mubr.bf16.gmra.mxu1 %v4241_v16  ;;  %2786 = vmatprep.mubr.bf16.mxu0 %v4255_v17  ;;  %v394_v17 = vunpack.c.h.s8.bf16 %v128_v6 }
 0x12d   :  { %v5510_v30 = vadd.f32 %v2555_v27, %v2370_v26  ;;  %v2372_v31 = vpop.f32.mrf.mxu0  ;;  %2971 = vmatprep.mubr.bf16.mxu1 %v4257_v20  ;;  %v4286_v26 = vcombine.low %v378_v63, %v386_v43  ;;  %v4300_v27 = vcombine.high %v393_v13, %v401_v14 }
 0x12e   :  { %v2557_v34 = vpop.f32.mrf.mxu1  ;;  %v4302_v31 = vcombine.high %v394_v17, %v402_v19  ;;  %v4301_v58 = vcombine.low %v394_v17, %v402_v19 }
 0x12f   :  { %v2373_v35 = vpop.f32.mrf.mxu0 }
 0x130   :  { %v2558_v38 = vpop.f32.mrf.mxu1 }
 0x131   :  { %v5512_v48 = vadd.f32 %v2558_v38, %v2373_v35  ;;  %v2375_v49 = vpop.f32.mrf.mxu0  ;;  %v409_v38 = vunpack.c.l.s8.bf16 %v136_v32 }
 0x132   :  { %v2560_v54 = vpop.f32.mrf.mxu1 }
 0x133   :  { %v2378_v56 = vpop.f32.mrf.mxu0  ;;  %2787 = vmatmul.mubr.bf16.gmra.mxu0 %v4254_v36 }
 0x134   :  { %v2563_v57 = vpop.f32.mrf.mxu1  ;;  %2972 = vmatmul.mubr.bf16.gmra.mxu1 %v4256_v40  ;;  %2794 = vmatprep.mubr.bf16.mxu0 %v4270_v46  ;;  %v417_v40 = vunpack.c.l.s8.bf16 %v140_v33 }
 0x135   :  { %v5520_v60 = vadd.f32 %v2563_v57, %v2378_v56  ;;  %v2380_v62 = vpop.f32.mrf.mxu0  ;;  %2979 = vmatprep.mubr.bf16.mxu1 %v4272_v50  ;;  %v410_v50 = vunpack.c.h.s8.bf16 %v136_v32  ;;  %v4299_v56 = vcombine.low %v393_v13, %v401_v14 }
 0x136   :  { %v2565_v42 = vpop.f32.mrf.mxu1  ;;  %v4315_v59 = vcombine.high %v409_v38, %v417_v40  ;;  %v4314_v13 = vcombine.low %v409_v38, %v417_v40 }
 0x137   :  { %v2381_v44 = vpop.f32.mrf.mxu0  ;;  %v4317_v43 = vcombine.high %v410_v50, %v418_v52  ;;  %v144_v42 = vld [vmem:[%s6604_s0 + $0x3c8] sm:$0xff] }
 0x138   :  { %v2566_v47 = vpop.f32.mrf.mxu1  ;;  %v426_v9 = vunpack.c.h.s8.bf16 %v144_v42 }
 0x139   :  { %v5522_v3 = vadd.f32 %v2566_v47, %v2381_v44  ;;  %v2383_v4 = vpop.f32.mrf.mxu0  ;;  %v148_v44 = vld [vmem:[%s6604_s0 + $0x3e6] sm:$0xff] }
 0x13a   :  { %v2568_v10 = vpop.f32.mrf.mxu1  ;;  %v433_v4 = vunpack.c.l.s8.bf16 %v148_v44 }
 0x13b   :  { %v2386_v11 = vpop.f32.mrf.mxu0  ;;  %2795 = vmatmul.mubr.bf16.gmra.mxu0 %v4269_v45  ;;  %v434_v10 = vunpack.c.h.s8.bf16 %v148_v44 }
 0x13c   :  { %v2571_v12 = vpop.f32.mrf.mxu1  ;;  %2980 = vmatmul.mubr.bf16.gmra.mxu1 %v4271_v1  ;;  %2802 = vmatprep.mubr.bf16.mxu0 %v4285_v2  ;;  %v425_v2 = vunpack.c.l.s8.bf16 %v144_v42 }
 0x13d   :  { %v5530_v15 = vadd.f32 %v2571_v12, %v2386_v11  ;;  %v2388_v16 = vpop.f32.mrf.mxu0  ;;  %2987 = vmatprep.mubr.bf16.mxu1 %v4287_v5 }
 0x13e   :  { %v2573_v20 = vpop.f32.mrf.mxu1  ;;  %v4316_v16 = vcombine.low %v410_v50, %v418_v52  ;;  %v4330_v17 = vcombine.high %v425_v2, %v433_v4  ;;  %v4331_v52 = vcombine.low %v426_v9, %v434_v10 }
 0x13f   :  { %v2389_v21 = vpop.f32.mrf.mxu0 }
 0x140   :  { %v2574_v24 = vpop.f32.mrf.mxu1 }
 0x141   :  { %v5532_v28 = vadd.f32 %v2574_v24, %v2389_v21  ;;  %v2391_v29 = vpop.f32.mrf.mxu0  ;;  %v4332_v21 = vcombine.high %v426_v9, %v434_v10  ;;  %v156_v24 = vld [vmem:[%s6604_s0 + $0x422] sm:$0xff] }
 0x142   :  { %v2576_v34 = vpop.f32.mrf.mxu1  ;;  %v449_v32 = vunpack.c.l.s8.bf16 %v156_v24 }
 0x143   :  { %v2394_v35 = vpop.f32.mrf.mxu0  ;;  %2803 = vmatmul.mubr.bf16.gmra.mxu0 %v4284_v22  ;;  %v152_v22 = vld [vmem:[%s6604_s0 + $0x404] sm:$0xff] }
 0x144   :  { %v2579_v36 = vpop.f32.mrf.mxu1  ;;  %2988 = vmatmul.mubr.bf16.gmra.mxu1 %v4286_v26  ;;  %2810 = vmatprep.mubr.bf16.mxu0 %v4300_v27 }
 0x145   :  { %v5540_v46 = vadd.f32 %v2579_v36, %v2394_v35  ;;  %v2396_v49 = vpop.f32.mrf.mxu0  ;;  %2995 = vmatprep.mubr.bf16.mxu1 %v4302_v31  ;;  %v441_v31 = vunpack.c.l.s8.bf16 %v152_v22  ;;  %v442_v35 = vunpack.c.h.s8.bf16 %v152_v22  ;;  %v450_v36 = vunpack.c.h.s8.bf16 %v156_v24 }
 0x146   :  { %v2581_v53 = vpop.f32.mrf.mxu1  ;;  %v4329_v49 = vcombine.low %v425_v2, %v433_v4 }
 0x147   :  { %v2397_v54 = vpop.f32.mrf.mxu0  ;;  %v4345_v53 = vcombine.high %v441_v31, %v449_v32  ;;  %v4344_v10 = vcombine.low %v441_v31, %v449_v32 }
 0x148   :  { %v2582_v57 = vpop.f32.mrf.mxu1 }
 0x149   :  { %v5542_v62 = vadd.f32 %v2582_v57, %v2397_v54  ;;  %v2399_v63 = vpop.f32.mrf.mxu0  ;;  %v4347_v57 = vcombine.high %v442_v35, %v450_v36 }
 0x14a   :  { %v2584_v45 = vpop.f32.mrf.mxu1 }
 0x14b   :  { %v2402_v47 = vpop.f32.mrf.mxu0  ;;  %2811 = vmatmul.mubr.bf16.gmra.mxu0 %v4299_v56 }
 0x14c   :  { %v2587_v1 = vpop.f32.mrf.mxu1  ;;  %2996 = vmatmul.mubr.bf16.gmra.mxu1 %v4301_v58  ;;  %2818 = vmatprep.mubr.bf16.mxu0 %v4315_v59  ;;  %v160_v58 = vld [vmem:[%s6604_s0 + $0x440] sm:$0xff] }
 0x14d   :  { %v5550_v5 = vadd.f32 %v2587_v1, %v2402_v47  ;;  %v2404_v6 = vpop.f32.mrf.mxu0  ;;  %3003 = vmatprep.mubr.bf16.mxu1 %v4317_v43  ;;  %v164_v59 = vld [vmem:[%s6604_s0 + $0x45e] sm:$0xff]  ;;  %v457_v44 = vunpack.c.l.s8.bf16 %v160_v58  ;;  %v458_v2 = vunpack.c.h.s8.bf16 %v160_v58 }
 0x14e   :  { %v2589_v11 = vpop.f32.mrf.mxu1  ;;  %v465_v45 = vunpack.c.l.s8.bf16 %v164_v59  ;;  %v466_v4 = vunpack.c.h.s8.bf16 %v164_v59  ;;  %v25_v59 = vld [vmem:[%s6604_s0 + $0x4c] sm:$0xff] }
 0x14f   :  { %v2405_v12 = vpop.f32.mrf.mxu0 }
 0x150   :  { %v2590_v14 = vpop.f32.mrf.mxu1 }
 0x151   :  { %v5552_v19 = vadd.f32 %v2590_v14, %v2405_v12  ;;  %v2407_v20 = vpop.f32.mrf.mxu0  ;;  %v4346_v12 = vcombine.low %v442_v35, %v450_v36 }
 0x152   :  { %v2592_v26 = vpop.f32.mrf.mxu1  ;;  %v17_v20 = vld [vmem:[%s6604_s0 + $0x10] sm:$0xff] }
 0x153   :  { %v2410_v27 = vpop.f32.mrf.mxu0  ;;  %2819 = vmatmul.mubr.bf16.gmra.mxu0 %v4314_v13  ;;  %v4360_v13 = vcombine.high %v457_v44, %v465_v45 }
 0x154   :  { %v2595_v29 = vpop.f32.mrf.mxu1  ;;  %3004 = vmatmul.mubr.bf16.gmra.mxu1 %v4316_v16  ;;  %2826 = vmatprep.mubr.bf16.mxu0 %v4330_v17  ;;  %v4362_v17 = vcombine.high %v458_v2, %v466_v4 }
 0x155   :  { %v5560_v33 = vadd.f32 %v2595_v29, %v2410_v27  ;;  %v2412_v34 = vpop.f32.mrf.mxu0  ;;  %3011 = vmatprep.mubr.bf16.mxu1 %v4332_v21  ;;  %v21_v21 = vld [vmem:[%s6604_s0 + $0x2e] sm:$0xff]  ;;  %v171_v27 = vunpack.c.l.s8.bf16 %v17_v20 }
 0x156   :  { %v2597_v38 = vpop.f32.mrf.mxu1  ;;  %v179_v29 = vunpack.c.l.s8.bf16 %v21_v21  ;;  %v172_v34 = vunpack.c.h.s8.bf16 %v17_v20  ;;  %v180_v35 = vunpack.c.h.s8.bf16 %v21_v21 }
 0x157   :  { %v2413_v40 = vpop.f32.mrf.mxu0 }
 0x158   :  { %v2598_v50 = vpop.f32.mrf.mxu1  ;;  %v4095_v21 = vcombine.low %v172_v34, %v180_v35 }
 0x159   :  { %v5562_v54 = vadd.f32 %v2598_v50, %v2413_v40  ;;  %v2415_v56 = vpop.f32.mrf.mxu0  ;;  %v4359_v40 = vcombine.low %v457_v44, %v465_v45  ;;  %v4361_v50 = vcombine.low %v458_v2, %v466_v4  ;;  %v678_v2 = vld [vmem:[%s6603_s2 + $0x678] sm:$0xff]  ;;  %v187_v4 = vunpack.c.l.s8.bf16 %v25_v59 }
 0x15a   :  { %v2600_v63 = vpop.f32.mrf.mxu1 }
 0x15b   :  { %v2418_v43 = vpop.f32.mrf.mxu0  ;;  %2827 = vmatmul.mubr.bf16.gmra.mxu0 %v4329_v49  ;;  %v29_v63 = vld [vmem:[%s6604_s0 + $0x6a] sm:$0xff] }
 0x15c   :  { %v2603_v42 = vpop.f32.mrf.mxu1  ;;  %3012 = vmatmul.mubr.bf16.gmra.mxu1 %v4331_v52  ;;  %2834 = vmatprep.mubr.bf16.mxu0 %v4345_v53  ;;  %v4094_v52 = vcombine.high %v171_v27, %v179_v29 }
 0x15d   :  { %v5570_v47 = vadd.f32 %v2603_v42, %v2418_v43  ;;  %v2420_v1 = vpop.f32.mrf.mxu0  ;;  %3019 = vmatprep.mubr.bf16.mxu1 %v4347_v57  ;;  %v4096_v57 = vcombine.high %v172_v34, %v180_v35 }
 0x15e   :  { %v2605_v6 = vpop.f32.mrf.mxu1  ;;  %v677_v1 = vld [vmem:[%s6603_s2 + $0x670] sm:$0xff] }
 0x15f   :  { %v2421_v9 = vpop.f32.mrf.mxu0  ;;  %v195_v6 = vunpack.c.l.s8.bf16 %v29_v63 }
 0x160   :  { %v2606_v11 = vpop.f32.mrf.mxu1 }
 0x161   :  { %v5572_v14 = vadd.f32 %v2606_v11, %v2421_v9  ;;  %v2423_v16 = vpop.f32.mrf.mxu0  ;;  %v698_v11 = vld [vmem:[%s6603_s2 + $0x718] sm:$0xff] }
 0x162   :  { %v2608_v22 = vpop.f32.mrf.mxu1 }
 0x163   :  { %v2426_v24 = vpop.f32.mrf.mxu0  ;;  %2835 = vmatmul.mubr.bf16.gmra.mxu0 %v4344_v10  ;;  %v697_v10 = vld [vmem:[%s6603_s2 + $0x710] sm:$0xff]  ;;  %v802_v22 = vpack.c.bf16 %v678_v2, %v677_v1 }
 0x164   :  { %v2611_v26 = vpop.f32.mrf.mxu1  ;;  %3020 = vmatmul.mubr.bf16.gmra.mxu1 %v4346_v12  ;;  %2842 = vmatprep.mubr.bf16.mxu0 %v4360_v13  ;;  %v188_v12 = vunpack.c.h.s8.bf16 %v25_v59  ;;  %v196_v13 = vunpack.c.h.s8.bf16 %v29_v63 }
 0x165   :  { %v5580_v31 = vadd.f32 %v2611_v26, %v2426_v24  ;;  %v2428_v32 = vpop.f32.mrf.mxu0  ;;  %3027 = vmatprep.mubr.bf16.mxu1 %v4362_v17  ;;  %v4093_v17 = vcombine.low %v171_v27, %v179_v29  ;;  %v675_v24 = vld [vmem:[%s6603_s2 + $0x660] sm:$0xff]  ;;  %v5615_v27 = vld [vmem:[%s6604_s0 + $0x88] sm:$0xff] }
 0x166   :  { %v2613_v36 = vpop.f32.mrf.mxu1  ;;  %v5620_v29 = vld [vmem:[%s6604_s0 + $0xa6] sm:$0xff]  ;;  %v4111_v35 = vcombine.high %v188_v12, %v196_v13 }
 0x167   :  { %v2429_v38 = vpop.f32.mrf.mxu0  ;;  %v812_v36 = vpack.c.bf16 %v698_v11, %v697_v10  ;;  %v211_v59 = vunpack.c.l.s8.bf16 %v5620_v29  ;;  %v674_v10 = vld [vmem:[%s6603_s2 + $0x658] sm:$0xff] }
 0x168   :  { %v2614_v49 = vpop.f32.mrf.mxu1 }
 0x169   :  { %v5582_v53 = vadd.f32 %v2614_v49, %v2429_v38  ;;  %v2431_v56 = vpop.f32.mrf.mxu0  ;;  %v4109_v38 = vcombine.high %v187_v4, %v195_v6  ;;  %v695_v49 = vld [vmem:[%s6603_s2 + $0x700] sm:$0xff] }
 0x16a   :  { %v2616_v58 = vpop.f32.mrf.mxu1 }
 0x16b   :  { %v2434_v43 = vpop.f32.mrf.mxu0  ;;  %2843 = vmatmul.mubr.bf16.gmra.mxu0 %v4359_v40  ;;  %v676_v40 = vld [vmem:[%s6603_s2 + $0x668] sm:$0xff]  ;;  %v203_v58 = vunpack.c.l.s8.bf16 %v5615_v27 }
 0x16c   :  { %v2619_v42 = vpop.f32.mrf.mxu1  ;;  %3028 = vmatmul.mubr.bf16.gmra.mxu1 %v4361_v50  ;;  %3068 = vmatprep.mubr.bf16.mxu0 %v4094_v52  ;;  %v696_v50 = vld [vmem:[%s6603_s2 + $0x708] sm:$0xff] }
 0x16d   :  { %v5590_v44 = vadd.f32 %v2619_v42, %v2434_v43  ;;  %v2436_v45 = vpop.f32.mrf.mxu0  ;;  %3253 = vmatprep.mubr.bf16.mxu1 %v4096_v57  ;;  %v801_v57 = vpack.c.bf16 %v676_v40, %v675_v24  ;;  %v204_v42 = vunpack.c.h.s8.bf16 %v5615_v27  ;;  %v811_v1 = vpack.c.bf16 %v696_v50, %v695_v49 }
 0x16e   :  { %v2621_v9 = vpop.f32.mrf.mxu1  ;;  %v212_v45 = vunpack.c.h.s8.bf16 %v5620_v29 }
 0x16f   :  { %v2437_v16 = vpop.f32.mrf.mxu0  ;;  %v673_v9 = vld [vmem:[%s6603_s2 + $0x650] sm:$0xff] }
 0x170   :  { %v2622_v20 = vpop.f32.mrf.mxu1 }
 0x171   :  { %v5607_v26 = vadd.f32 %v2622_v20, %v2437_v16  ;;  %v2439_v32 = vpop.f32.mrf.mxu0  ;;  %v4108_v16 = vcombine.low %v187_v4, %v195_v6  ;;  %v4110_v20 = vcombine.low %v188_v12, %v196_v13  ;;  %v45_v4 = vld [vmem:[%s6604_s0 + $0xe2] sm:$0xff] }
 0x172   :  { %v2624_v34 = vpop.f32.mrf.mxu1  ;;  %v4126_v32 = vcombine.high %v204_v42, %v212_v45  ;;  %v671_v12 = vld [vmem:[%s6603_s2 + $0x640] sm:$0xff]  ;;  %v672_v13 = vld [vmem:[%s6603_s2 + $0x648] sm:$0xff] }
 0x173   :  { %v2442_v52 = vpop.f32.mrf.mxu0  ;;  %3069 = vmatmul.mubr.bf16.vlgmr.msra.gmra.mxu0 %v4093_v17  ;;  %v227_v34 = vunpack.c.l.s8.bf16 %v45_v4 }
 0x174   :  { %v2627_v56 = vpop.f32.mrf.mxu1  ;;  %3254 = vmatmul.mubr.bf16.vlgmr.msra.gmra.mxu1 %v4095_v21  ;;  %3407 = vmatpush1.bf16.msra.mxu0 %v802_v22  ;;  %v4124_v21 = vcombine.high %v203_v58, %v211_v59 }
 0x175   :  { %v5630_v63 = vadd.f32 %v2627_v56, %v2442_v52  ;;  %v2444_v43 = vpop.f32.mrf.mxu0  ;;  %4411 = vmatpush3.bf16.msra.mxu1 %v812_v36  ;;  %3076 = vmatprep.mubr.bf16.mxu0 %v4109_v38  ;;  %v800_v36 = vpack.c.bf16 %v674_v10, %v673_v9  ;;  %v41_v38 = vld [vmem:[%s6604_s0 + $0xc4] sm:$0xff]  ;;  %v228_v52 = vunpack.c.h.s8.bf16 %v45_v4  ;;  %v799_v56 = vpack.c.bf16 %v672_v13, %v671_v12 }
 0x176   :  { %v2629_v2 = vpop.f32.mrf.mxu1  ;;  %3261 = vmatprep.mubr.bf16.mxu1 %v4111_v35  ;;  %3408 = vmatprep.subr.bf16.mxu0 %v4495_v0  ;;  %v219_v29 = vunpack.c.l.s8.bf16 %v41_v38  ;;  %v220_v50 = vunpack.c.h.s8.bf16 %v41_v38  ;;  %v669_v43 = vld [vmem:[%s6603_s2 + $0x630] sm:$0xff]  ;;  %v4123_v9 = vcombine.low %v203_v58, %v211_v59  ;;  %v667_v58 = vld [vmem:[%s6603_s2 + $0x620] sm:$0xff]  ;;  %v668_v59 = vld [vmem:[%s6603_s2 + $0x628] sm:$0xff] }
 0x177   :  { %v2445_v11 = vpop.f32.mrf.mxu0  ;;  %4412 = vmatprep.subr.bf16.mxu1 %v6607_v51 }
 0x178   :  { %v2630_v17 = vpop.f32.mrf.mxu1  ;;  %3409 = vmatpush1.bf16.msra.mxu0 %v801_v57 }
 0x179   :  { %v5642_v22 = vadd.f32 %v2630_v17, %v2445_v11  ;;  %v2447_v24 = vpop.f32.mrf.mxu0  ;;  %3410 = vmatprep.subr.bf16.mxu0 %v4495_v0  ;;  %4413 = vmatpush3.bf16.msra.mxu1 %v811_v1  ;;  %v670_v1 = vld [vmem:[%s6603_s2 + $0x638] sm:$0xff]  ;;  %v4125_v11 = vcombine.low %v204_v42, %v212_v45 }
 0x17a   :  { %v2632_v6 = vpop.f32.mrf.mxu1  ;;  %v5671_v24 = vld [vmem:[%s6604_s0 + $0x100] sm:$0xff] }
 0x17b   :  { %v2450_v40 = vpop.f32.mrf.mxu0  ;;  %3077 = vmatmul.mubr.bf16.gmra.mxu0 %v4108_v16  ;;  %v4139_v16 = vcombine.high %v219_v29, %v227_v34  ;;  %v235_v4 = vunpack.c.l.s8.bf16 %v5671_v24 }
 0x17c   :  { %v2635_v27 = vpop.f32.mrf.mxu1  ;;  %3262 = vmatmul.mubr.bf16.gmra.mxu1 %v4110_v20  ;;  %3084 = vmatprep.mubr.bf16.mxu0 %v4124_v21  ;;  %v4141_v21 = vcombine.high %v220_v50, %v228_v52 }
 0x17d   :  { %v5657_v35 = vadd.f32 %v2635_v27, %v2450_v40  ;;  %v2452_v49 = vpop.f32.mrf.mxu0  ;;  %3269 = vmatprep.mubr.bf16.mxu1 %v4126_v32  ;;  %3411 = vmatpush1.bf16.msra.mxu0 %v800_v36  ;;  %v53_v32 = vld [vmem:[%s6604_s0 + $0x11e] sm:$0xff]  ;;  %v798_v36 = vpack.c.bf16 %v670_v1, %v669_v43  ;;  %v236_v40 = vunpack.c.h.s8.bf16 %v5671_v24 }
 0x17e   :  { %v2637_v57 = vpop.f32.mrf.mxu1  ;;  %3412 = vmatprep.subr.bf16.mxu0 %v4495_v0  ;;  %v243_v6 = vunpack.c.l.s8.bf16 %v53_v32  ;;  %v244_v27 = vunpack.c.h.s8.bf16 %v53_v32  ;;  %v797_v49 = vpack.c.bf16 %v668_v59, %v667_v58  ;;  %v666_v43 = vld [vmem:[%s6603_s2 + $0x618] sm:$0xff] }
 0x17f   :  { %v2453_v2 = vpop.f32.mrf.mxu0  ;;  %v665_v57 = vld [vmem:[%s6603_s2 + $0x610] sm:$0xff]  ;;  %v5699_v24 = vld [vmem:[%s6604_s0 + $0x13c] sm:$0xff] }
 0x180   :  { %v2638_v10 = vpop.f32.mrf.mxu1  ;;  %v5704_v32 = vld [vmem:[%s6604_s0 + $0x15a] sm:$0xff]  ;;  %v251_v58 = vunpack.c.l.s8.bf16 %v5699_v24 }
 0x181   :  { %v5666_v17 = vadd.f32 %v2638_v10, %v2453_v2  ;;  %v2455_v20 = vpop.f32.mrf.mxu0  ;;  %3413 = vmatpush1.bf16.msra.mxu0 %v799_v56  ;;  %v4138_v2 = vcombine.low %v219_v29, %v227_v34  ;;  %v4140_v10 = vcombine.low %v220_v50, %v228_v52  ;;  %v663_v34 = vld [vmem:[%s6603_s2 + $0x600] sm:$0xff]  ;;  %v664_v50 = vld [vmem:[%s6603_s2 + $0x608] sm:$0xff]  ;;  %v259_v59 = vunpack.c.l.s8.bf16 %v5704_v32 }
 0x182   :  { %v2640_v38 = vpop.f32.mrf.mxu1  ;;  %3414 = vmatprep.subr.bf16.mxu0 %v4495_v0 }
 0x183   :  { %v2458_v42 = vpop.f32.mrf.mxu0  ;;  %3085 = vmatmul.mubr.bf16.gmra.mxu0 %v4123_v9 }
 0x184   :  { %v2643_v45 = vpop.f32.mrf.mxu1  ;;  %3270 = vmatmul.mubr.bf16.gmra.mxu1 %v4125_v11  ;;  %3092 = vmatprep.mubr.bf16.mxu0 %v4139_v16  ;;  %v4154_v11 = vcombine.high %v235_v4, %v243_v6 }
 0x185   :  { %v5684_v12 = vadd.f32 %v2643_v45, %v2458_v42  ;;  %v2460_v13 = vpop.f32.mrf.mxu0  ;;  %3277 = vmatprep.mubr.bf16.mxu1 %v4141_v21  ;;  %3415 = vmatpush1.bf16.msra.mxu0 %v798_v36  ;;  %v4156_v21 = vcombine.high %v236_v40, %v244_v27  ;;  %v796_v36 = vpack.c.bf16 %v666_v43, %v665_v57  ;;  %v693_v43 = vld [vmem:[%s6603_s2 + $0x6f0] sm:$0xff] }
 0x186   :  { %v2645_v56 = vpop.f32.mrf.mxu1  ;;  %3416 = vmatprep.subr.bf16.mxu0 %v4495_v0  ;;  %v252_v13 = vunpack.c.h.s8.bf16 %v5699_v24 }
 0x187   :  { %v2461_v1 = vpop.f32.mrf.mxu0  ;;  %v795_v56 = vpack.c.bf16 %v664_v50, %v663_v34 }
 0x188   :  { %v2646_v9 = vpop.f32.mrf.mxu1 }
 0x189   :  { %v5694_v16 = vadd.f32 %v2646_v9, %v2461_v1  ;;  %v2463_v20 = vpop.f32.mrf.mxu0  ;;  %3417 = vmatpush1.bf16.msra.mxu0 %v797_v49  ;;  %v260_v49 = vunpack.c.h.s8.bf16 %v5704_v32  ;;  %v694_v1 = vld [vmem:[%s6603_s2 + $0x6f8] sm:$0xff]  ;;  %v4153_v9 = vcombine.low %v235_v4, %v243_v6  ;;  %v691_v6 = vld [vmem:[%s6603_s2 + $0x6e0] sm:$0xff] }
 0x18a   :  { %v2648_v29 = vpop.f32.mrf.mxu1  ;;  %3418 = vmatprep.subr.bf16.mxu0 %v4495_v0  ;;  %v4169_v20 = vcombine.high %v251_v58, %v259_v59  ;;  %v810_v34 = vpack.c.bf16 %v694_v1, %v693_v43 }
 0x18b   :  { %v2466_v52 = vpop.f32.mrf.mxu0  ;;  %3093 = vmatmul.mubr.bf16.gmra.mxu0 %v4138_v2  ;;  %v4171_v32 = vcombine.high %v252_v13, %v260_v49  ;;  %v5736_v29 = vld [vmem:[%s6604_s0 + $0x196] sm:$0xff] }
 0x18c   :  { %v2651_v38 = vpop.f32.mrf.mxu1  ;;  %3278 = vmatmul.mubr.bf16.gmra.mxu1 %v4140_v10  ;;  %3100 = vmatprep.mubr.bf16.mxu0 %v4154_v11  ;;  %v4155_v11 = vcombine.low %v236_v40, %v244_v27  ;;  %v692_v40 = vld [vmem:[%s6603_s2 + $0x6e8] sm:$0xff]  ;;  %v276_v43 = vunpack.c.h.s8.bf16 %v5736_v29 }
 0x18d   :  { %v5715_v42 = vadd.f32 %v2651_v38, %v2466_v52  ;;  %v2468_v45 = vpop.f32.mrf.mxu0  ;;  %3285 = vmatprep.mubr.bf16.mxu1 %v4156_v21  ;;  %3419 = vmatpush1.bf16.msra.mxu0 %v796_v36  ;;  %v5731_v36 = vld [vmem:[%s6604_s0 + $0x178] sm:$0xff]  ;;  %v275_v38 = vunpack.c.l.s8.bf16 %v5736_v29  ;;  %v809_v1 = vpack.c.bf16 %v692_v40, %v691_v6 }
 0x18e   :  { %v2653_v57 = vpop.f32.mrf.mxu1  ;;  %3420 = vmatprep.subr.bf16.mxu0 %v4495_v0  ;;  %v267_v52 = vunpack.c.l.s8.bf16 %v5731_v36  ;;  %v5763_v6 = vld [vmem:[%s6604_s0 + $0x1b4] sm:$0xff] }
 0x18f   :  { %v2469_v2 = vpop.f32.mrf.mxu0  ;;  %v268_v57 = vunpack.c.h.s8.bf16 %v5731_v36  ;;  %v5768_v40 = vld [vmem:[%s6604_s0 + $0x1d2] sm:$0xff] }
 0x190   :  { %v2654_v10 = vpop.f32.mrf.mxu1  ;;  %v4184_v36 = vcombine.high %v267_v52, %v275_v38 }
 0x191   :  { %v5726_v21 = vadd.f32 %v2654_v10, %v2469_v2  ;;  %v2471_v24 = vpop.f32.mrf.mxu0  ;;  %3421 = vmatpush1.bf16.msra.mxu0 %v795_v56  ;;  %v690_v10 = vld [vmem:[%s6603_s2 + $0x6d8] sm:$0xff] }
 0x192   :  { %v2656_v4 = vpop.f32.mrf.mxu1  ;;  %3422 = vmatprep.subr.bf16.mxu0 %v4495_v0 }
 0x193   :  { %v2474_v27 = vpop.f32.mrf.mxu0  ;;  %3101 = vmatmul.mubr.bf16.gmra.mxu0 %v4153_v9  ;;  %v689_v9 = vld [vmem:[%s6603_s2 + $0x6d0] sm:$0xff] }
 0x194   :  { %v2659_v50 = vpop.f32.mrf.mxu1  ;;  %3286 = vmatmul.mubr.bf16.gmra.mxu1 %v4155_v11  ;;  %3108 = vmatprep.mubr.bf16.mxu0 %v4169_v20  ;;  %v4168_v20 = vcombine.low %v251_v58, %v259_v59  ;;  %v687_v59 = vld [vmem:[%s6603_s2 + $0x6c0] sm:$0xff] }
 0x195   :  { %v5747_v45 = vadd.f32 %v2659_v50, %v2474_v27  ;;  %v2476_v56 = vpop.f32.mrf.mxu0  ;;  %3293 = vmatprep.mubr.bf16.mxu1 %v4171_v32  ;;  %3423 = vmatpush2.bf16.msra.mxu0 %v810_v34  ;;  %v4170_v32 = vcombine.low %v252_v13, %v260_v49  ;;  %v4186_v34 = vcombine.high %v268_v57, %v276_v43  ;;  %v688_v13 = vld [vmem:[%s6603_s2 + $0x6c8] sm:$0xff] }
 0x196   :  { %v2661_v2 = vpop.f32.mrf.mxu1  ;;  %3424 = vmatprep.subr.bf16.mxu0 %v4495_v0  ;;  %v808_v27 = vpack.c.bf16 %v690_v10, %v689_v9  ;;  %v284_v10 = vunpack.c.h.s8.bf16 %v5763_v6 }
 0x197   :  { %v2477_v11 = vpop.f32.mrf.mxu0  ;;  %v291_v2 = vunpack.c.l.s8.bf16 %v5768_v40 }
 0x198   :  { %v2662_v24 = vpop.f32.mrf.mxu1 }
 0x199   :  { %v5758_v4 = vadd.f32 %v2662_v24, %v2477_v11  ;;  %v2479_v29 = vpop.f32.mrf.mxu0  ;;  %3425 = vmatpush2.bf16.msra.mxu0 %v809_v1  ;;  %v283_v1 = vunpack.c.l.s8.bf16 %v5763_v6  ;;  %v292_v11 = vunpack.c.h.s8.bf16 %v5768_v40  ;;  %v807_v24 = vpack.c.bf16 %v688_v13, %v687_v59 }
 0x19a   :  { %v2664_v58 = vpop.f32.mrf.mxu1  ;;  %3426 = vmatprep.subr.bf16.mxu0 %v4495_v0 }
 0x19b   :  { %v2700_v49 = vpop.f32.mrf.mxu0  ;;  %3109 = vmatmul.mubr.bf16.gmra.mxu0 %v4168_v20  ;;  %v4199_v58 = vcombine.high %v283_v1, %v291_v2  ;;  %v4201_v13 = vcombine.high %v284_v10, %v292_v11 }
 0x19c   :  { %v2701_v50 = vadd.f32 %v2700_v49, %v5382_v23  ;;  %v2885_v56 = vpop.f32.mrf.mxu1  ;;  %3294 = vmatmul.mubr.bf16.gmra.mxu1 %v4170_v32  ;;  %3116 = vmatprep.mubr.bf16.mxu0 %v4184_v36  ;;  %v685_v23 = vld [vmem:[%s6603_s2 + $0x6b0] sm:$0xff]  ;;  %v686_v32 = vld [vmem:[%s6603_s2 + $0x6b8] sm:$0xff] }
 0x19d   :  { %v2702_v9 = vpop.f32.mrf.mxu0  ;;  %3301 = vmatprep.mubr.bf16.mxu1 %v4186_v34  ;;  %3427 = vmatpush2.bf16.msra.mxu0 %v808_v27  ;;  %v4183_v34 = vcombine.low %v267_v52, %v275_v38  ;;  %v4185_v27 = vcombine.low %v268_v57, %v276_v43  ;;  %v5795_v49 = vld [vmem:[%s6604_s0 + $0x1f0] sm:$0xff]  ;;  %v683_v38 = vld [vmem:[%s6603_s2 + $0x6a0] sm:$0xff]  ;;  %v684_v57 = vld [vmem:[%s6603_s2 + $0x6a8] sm:$0xff] }
 0x19e   :  { %v5782_v29 = vadd.f32 %v2885_v56, %v2701_v50  ;;  %v2887_v20 = vpop.f32.mrf.mxu1  ;;  %3428 = vmatprep.subr.bf16.mxu0 %v4495_v0  ;;  %v5800_v50 = vld [vmem:[%s6604_s0 + $0x20e] sm:$0xff]  ;;  %v806_v56 = vpack.c.bf16 %v686_v32, %v685_v23 }
 0x19f   :  { %v2703_v36 = vpop.f32.mrf.mxu0  ;;  %v307_v23 = vunpack.c.l.s8.bf16 %v5800_v50 }
 0x1a0   :  { %v2704_v6 = vadd.f32 %v2703_v36, %v5400_v39  ;;  %v2888_v40 = vpop.f32.mrf.mxu1  ;;  %v300_v36 = vunpack.c.h.s8.bf16 %v5795_v49 }
 0x1a1   :  { %v2705_v59 = vpop.f32.mrf.mxu0  ;;  %3429 = vmatpush2.bf16.msra.mxu0 %v807_v24  ;;  %v299_v24 = vunpack.c.l.s8.bf16 %v5795_v49 }
 0x1a2   :  { %v5802_v52 = vadd.f32 %v2888_v40, %v2704_v6  ;;  %v2890_v39 = vpop.f32.mrf.mxu1  ;;  %3430 = vmatprep.subr.bf16.mxu0 %v4495_v0  ;;  %v308_v6 = vunpack.c.h.s8.bf16 %v5800_v50  ;;  %v805_v40 = vpack.c.bf16 %v684_v57, %v683_v38 }
 0x1a3   :  { %v2708_v43 = vpop.f32.mrf.mxu0  ;;  %3117 = vmatmul.mubr.bf16.gmra.mxu0 %v4183_v34  ;;  %v4214_v39 = vcombine.high %v299_v24, %v307_v23 }
 0x1a4   :  { %v2709_v9 = vadd.f32 %v2708_v43, %v5428_v61  ;;  %v2893_v20 = vpop.f32.mrf.mxu1  ;;  %3302 = vmatmul.mubr.bf16.gmra.mxu1 %v4185_v27  ;;  %3124 = vmatprep.mubr.bf16.mxu0 %v4199_v58  ;;  %v681_v61 = vld [vmem:[%s6603_s2 + $0x690] sm:$0xff]  ;;  %v682_v27 = vld [vmem:[%s6603_s2 + $0x698] sm:$0xff]  ;;  %v4216_v57 = vcombine.high %v300_v36, %v308_v6 }
 0x1a5   :  { %v2710_v32 = vpop.f32.mrf.mxu0  ;;  %3309 = vmatprep.mubr.bf16.mxu1 %v4201_v13  ;;  %3431 = vmatpush2.bf16.msra.mxu0 %v806_v56  ;;  %v4198_v13 = vcombine.low %v283_v1, %v291_v2  ;;  %v4200_v56 = vcombine.low %v284_v10, %v292_v11  ;;  %v89_v43 = vld [vmem:[%s6604_s0 + $0x22c] sm:$0xff] }
 0x1a6   :  { %v5816_v59 = vadd.f32 %v2893_v20, %v2709_v9  ;;  %v2895_v34 = vpop.f32.mrf.mxu1  ;;  %3432 = vmatprep.subr.bf16.mxu0 %v4495_v0  ;;  %v93_v9 = vld [vmem:[%s6604_s0 + $0x24a] sm:$0xff]  ;;  %v804_v20 = vpack.c.bf16 %v682_v27, %v681_v61 }
 0x1a7   :  { %v2711_v58 = vpop.f32.mrf.mxu0  ;;  %v680_v2 = vld [vmem:[%s6603_s2 + $0x688] sm:$0xff]  ;;  %v323_v61 = vunpack.c.l.s8.bf16 %v93_v9 }
 0x1a8   :  { %6609 = vst [vmem:[#allocation2_spill] sm:$0xff] %v5816_v59  ;;  %v2712_v49 = vadd.f32 %v2711_v58, %v5446_v8  ;;  %v2896_v50 = vpop.f32.mrf.mxu1  ;;  %v679_v8 = vld [vmem:[%s6603_s2 + $0x680] sm:$0xff]  ;;  %v316_v58 = vunpack.c.h.s8.bf16 %v89_v43 }
 0x1a9   :  { %v2713_v38 = vpop.f32.mrf.mxu0  ;;  %3433 = vmatpush2.bf16.msra.mxu0 %v805_v40  ;;  %v315_v40 = vunpack.c.l.s8.bf16 %v89_v43  ;;  %v101_v43 = vld [vmem:[%s6604_s0 + $0x286] sm:$0xff] }
 0x1aa   :  { %v5832_v32 = vadd.f32 %v2896_v50, %v2712_v49  ;;  %v2898_v1 = vpop.f32.mrf.mxu1  ;;  %3434 = vmatprep.subr.bf16.mxu0 %v4495_v0  ;;  %v324_v49 = vunpack.c.h.s8.bf16 %v93_v9  ;;  %v803_v50 = vpack.c.bf16 %v680_v2, %v679_v8 }
 0x1ab   :  { %v2716_v10 = vpop.f32.mrf.mxu0  ;;  %3125 = vmatmul.mubr.bf16.gmra.mxu0 %v4198_v13  ;;  %v4213_v13 = vcombine.low %v299_v24, %v307_v23 }
 0x1ac   :  { %6610 = vst [vmem:[#allocation3_spill] sm:$0xff] %v5832_v32  ;;  %v2717_v11 = vadd.f32 %v2716_v10, %v5474_v25  ;;  %v2901_v34 = vpop.f32.mrf.mxu1  ;;  %3310 = vmatmul.mubr.bf16.gmra.mxu1 %v4200_v56  ;;  %3132 = vmatprep.mubr.bf16.mxu0 %v4214_v39  ;;  %v4215_v56 = vcombine.low %v300_v36, %v308_v6  ;;  %v339_v36 = vunpack.c.l.s8.bf16 %v101_v43 }
 0x1ad   :  { %v2718_v27 = vpop.f32.mrf.mxu0  ;;  %3317 = vmatprep.mubr.bf16.mxu1 %v4216_v57  ;;  %3435 = vmatpush2.bf16.msra.mxu0 %v804_v20  ;;  %v4229_v39 = vcombine.high %v315_v40, %v323_v61  ;;  %v4231_v59 = vcombine.high %v316_v58, %v324_v49  ;;  %v97_v57 = vld [vmem:[%s6604_s0 + $0x268] sm:$0xff] }
 0x1ae   :  { %v5842_v38 = vadd.f32 %v2901_v34, %v2717_v11  ;;  %v2903_v1 = vpop.f32.mrf.mxu1  ;;  %3436 = vmatprep.subr.bf16.mxu0 %v4495_v0  ;;  %v331_v23 = vunpack.c.l.s8.bf16 %v97_v57  ;;  %v332_v20 = vunpack.c.h.s8.bf16 %v97_v57  ;;  %v4228_v34 = vcombine.low %v315_v40, %v323_v61 }
 0x1af   :  { %v2719_v51 = vpop.f32.mrf.mxu0  ;;  %v4230_v1 = vcombine.low %v316_v58, %v324_v49 }
 0x1b0   :  { %v2720_v25 = vadd.f32 %v2719_v51, %v5480_v37  ;;  %v2904_v10 = vpop.f32.mrf.mxu1 }
 0x1b1   :  { %v2721_v32 = vpop.f32.mrf.mxu0  ;;  %3437 = vmatpush2.bf16.msra.mxu0 %v803_v50 }
 0x1b2   :  { %v5852_v9 = vadd.f32 %v2904_v10, %v2720_v25  ;;  %v2906_v0 = vpop.f32.mrf.mxu1  ;;  %v340_v32 = vunpack.c.h.s8.bf16 %v101_v43  ;;  %v105_v10 = vld [vmem:[%s6604_s0 + $0x2a4] sm:$0xff] }
 0x1b3   :  { %v2724_v24 = vpop.f32.mrf.mxu0  ;;  %3133 = vmatmul.mubr.bf16.gmra.mxu0 %v4213_v13  ;;  %v4244_v13 = vcombine.high %v331_v23, %v339_v36  ;;  %v347_v61 = vunpack.c.l.s8.bf16 %v105_v10  ;;  %v348_v43 = vunpack.c.h.s8.bf16 %v105_v10 }
 0x1b4   :  { %v2725_v37 = vadd.f32 %v2724_v24, %v5490_v55  ;;  %v2909_v51 = vpop.f32.mrf.mxu1  ;;  %3318 = vmatmul.mubr.bf16.gmra.mxu1 %v4215_v56  ;;  %3140 = vmatprep.mubr.bf16.mxu0 %v4229_v39  ;;  %v4246_v25 = vcombine.high %v332_v20, %v340_v32 }
 0x1b5   :  { %v2726_v6 = vpop.f32.mrf.mxu0  ;;  %3325 = vmatprep.mubr.bf16.mxu1 %v4231_v59  ;;  %v109_v59 = vld [vmem:[%s6604_s0 + $0x2c2] sm:$0xff] }
 0x1b6   :  { %v5855_v8 = vadd.f32 %v2909_v51, %v2725_v37  ;;  %v2911_v2 = vpop.f32.mrf.mxu1  ;;  %v355_v58 = vunpack.c.l.s8.bf16 %v109_v59  ;;  %v356_v0 = vunpack.c.h.s8.bf16 %v109_v59  ;;  %v4243_v6 = vcombine.low %v331_v23, %v339_v36 }
 0x1b7   :  { %v2727_v11 = vpop.f32.mrf.mxu0 }
 0x1b8   :  { %v2728_v27 = vadd.f32 %v2727_v11, %v5492_v41  ;;  %v2912_v50 = vpop.f32.mrf.mxu1 }
 0x1b9   :  { %v2729_v55 = vpop.f32.mrf.mxu0 }
 0x1ba   :  { %v5864_v56 = vadd.f32 %v2912_v50, %v2728_v27  ;;  %v2914_v39 = vpop.f32.mrf.mxu1  ;;  %v4259_v27 = vcombine.high %v347_v61, %v355_v58  ;;  %v4261_v50 = vcombine.high %v348_v43, %v356_v0 }
 0x1bb   :  { %v2732_v57 = vpop.f32.mrf.mxu0  ;;  %3141 = vmatmul.mubr.bf16.gmra.mxu0 %v4228_v34  ;;  %v4245_v34 = vcombine.low %v332_v20, %v340_v32 }
 0x1bc   :  { %v2733_v41 = vadd.f32 %v2732_v57, %v5500_v7  ;;  %v2917_v40 = vpop.f32.mrf.mxu1  ;;  %3326 = vmatmul.mubr.bf16.gmra.mxu1 %v4230_v1  ;;  %3148 = vmatprep.mubr.bf16.mxu0 %v4244_v13  ;;  %v113_v1 = vld [vmem:[%s6604_s0 + $0x2e0] sm:$0xff] }
 0x1bd   :  { %v2734_v49 = vpop.f32.mrf.mxu0  ;;  %3333 = vmatprep.mubr.bf16.mxu1 %v4246_v25  ;;  %v117_v13 = vld [vmem:[%s6604_s0 + $0x2fe] sm:$0xff]  ;;  %v363_v36 = vunpack.c.l.s8.bf16 %v113_v1  ;;  %v364_v59 = vunpack.c.h.s8.bf16 %v113_v1 }
 0x1be   :  { %v5867_v24 = vadd.f32 %v2917_v40, %v2733_v41  ;;  %v2919_v37 = vpop.f32.mrf.mxu1  ;;  %v371_v20 = vunpack.c.l.s8.bf16 %v117_v13  ;;  %v372_v39 = vunpack.c.h.s8.bf16 %v117_v13  ;;  %v4258_v49 = vcombine.low %v347_v61, %v355_v58 }
 0x1bf   :  { %v2735_v51 = vpop.f32.mrf.mxu0 }
 0x1c0   :  { %v2736_v2 = vadd.f32 %v2735_v51, %v5502_v18  ;;  %v2920_v11 = vpop.f32.mrf.mxu1 }
 0x1c1   :  { %v2737_v7 = vpop.f32.mrf.mxu0 }
 0x1c2   :  { %v5876_v55 = vadd.f32 %v2920_v11, %v2736_v2  ;;  %v2922_v25 = vpop.f32.mrf.mxu1  ;;  %v4274_v2 = vcombine.high %v363_v36, %v371_v20  ;;  %v4276_v11 = vcombine.high %v364_v59, %v372_v39 }
 0x1c3   :  { %v2740_v10 = vpop.f32.mrf.mxu0  ;;  %3149 = vmatmul.mubr.bf16.gmra.mxu0 %v4243_v6  ;;  %v4260_v6 = vcombine.low %v348_v43, %v356_v0 }
 0x1c4   :  { %v2741_v18 = vadd.f32 %v2740_v10, %v5510_v30  ;;  %v2925_v23 = vpop.f32.mrf.mxu1  ;;  %3334 = vmatmul.mubr.bf16.gmra.mxu1 %v4245_v34  ;;  %3156 = vmatprep.mubr.bf16.mxu0 %v4259_v27  ;;  %v121_v34 = vld [vmem:[%s6604_s0 + $0x31c] sm:$0xff] }
 0x1c5   :  { %v2742_v32 = vpop.f32.mrf.mxu0  ;;  %3341 = vmatprep.mubr.bf16.mxu1 %v4261_v50  ;;  %v125_v27 = vld [vmem:[%s6604_s0 + $0x33a] sm:$0xff]  ;;  %v379_v58 = vunpack.c.l.s8.bf16 %v121_v34  ;;  %v380_v13 = vunpack.c.h.s8.bf16 %v121_v34 }
 0x1c6   :  { %v5879_v57 = vadd.f32 %v2925_v23, %v2741_v18  ;;  %v2927_v41 = vpop.f32.mrf.mxu1  ;;  %v387_v43 = vunpack.c.l.s8.bf16 %v125_v27  ;;  %v388_v25 = vunpack.c.h.s8.bf16 %v125_v27  ;;  %v4273_v32 = vcombine.low %v363_v36, %v371_v20 }
 0x1c7   :  { %v2743_v40 = vpop.f32.mrf.mxu0 }
 0x1c8   :  { %v2744_v37 = vadd.f32 %v2743_v40, %v5512_v48  ;;  %v2928_v51 = vpop.f32.mrf.mxu1 }
 0x1c9   :  { %v2745_v30 = vpop.f32.mrf.mxu0 }
 0x1ca   :  { %v5888_v7 = vadd.f32 %v2928_v51, %v2744_v37  ;;  %v2930_v50 = vpop.f32.mrf.mxu1  ;;  %v4289_v37 = vcombine.high %v379_v58, %v387_v43  ;;  %v4291_v51 = vcombine.high %v380_v13, %v388_v25 }
 0x1cb   :  { %v2748_v1 = vpop.f32.mrf.mxu0  ;;  %3157 = vmatmul.mubr.bf16.gmra.mxu0 %v4258_v49  ;;  %v4275_v49 = vcombine.low %v364_v59, %v372_v39  ;;  %v3776_v39 = vld [vmem:[%s6605_s1] sm:$0xff] }
 0x1cc   :  { %v2749_v48 = vadd.f32 %v2748_v1, %v5520_v60  ;;  %v2933_v61 = vpop.f32.mrf.mxu1  ;;  %3342 = vmatmul.mubr.bf16.gmra.mxu1 %v4260_v6  ;;  %3164 = vmatprep.mubr.bf16.mxu0 %v4274_v2  ;;  %v129_v6 = vld [vmem:[%s6604_s0 + $0x358] sm:$0xff] }
 0x1cd   :  { %v2750_v0 = vpop.f32.mrf.mxu0  ;;  %3349 = vmatprep.mubr.bf16.mxu1 %v4276_v11  ;;  %v133_v2 = vld [vmem:[%s6604_s0 + $0x376] sm:$0xff]  ;;  %v395_v20 = vunpack.c.l.s8.bf16 %v129_v6  ;;  %v396_v50 = vunpack.c.h.s8.bf16 %v129_v6  ;;  %3816 = vperm.xlu0 %4493, %v3776_v39  }
 0x1ce   :  { %v5891_v10 = vadd.f32 %v2933_v61, %v2749_v48  ;;  %v2935_v18 = vpop.f32.mrf.mxu1  ;;  %v403_v59 = vunpack.c.l.s8.bf16 %v133_v2  ;;  %v404_v1 = vunpack.c.h.s8.bf16 %v133_v2 }
 0x1cf   :  { %v2751_v23 = vpop.f32.mrf.mxu0  ;;  %v4288_v18 = vcombine.low %v379_v58, %v387_v43 }
 0x1d0   :  { %v2752_v41 = vadd.f32 %v2751_v23, %v5522_v3  ;;  %v2936_v40 = vpop.f32.mrf.mxu1 }
 0x1d1   :  { %v2753_v60 = vpop.f32.mrf.mxu0 }
 0x1d2   :  { %v5900_v30 = vadd.f32 %v2936_v40, %v2752_v41  ;;  %v2938_v11 = vpop.f32.mrf.mxu1  ;;  %v4304_v41 = vcombine.high %v395_v20, %v403_v59  ;;  %v3777_v40 = vld [vmem:[%s6605_s1 + $0x8] sm:$0xff]  ;;  %v4306_v60 = vcombine.high %v396_v50, %v404_v1 }
 0x1d3   :  { %v2756_v34 = vpop.f32.mrf.mxu0  ;;  %3165 = vmatmul.mubr.bf16.gmra.mxu0 %v4273_v32  ;;  %v4290_v32 = vcombine.low %v380_v13, %v388_v25  ;;  %3821 = vperm.xlu0 %4493, %v3777_v40   ;;  %v3780_v40 = vld [vmem:[%s6605_s1 + $0x20] sm:$0xff] }
 0x1d4   :  { %v2757_v3 = vadd.f32 %v2756_v34, %v5530_v15  ;;  %v2941_v36 = vpop.f32.mrf.mxu1  ;;  %3350 = vmatmul.mubr.bf16.gmra.mxu1 %v4275_v49  ;;  %3172 = vmatprep.mubr.bf16.mxu0 %v4289_v37  ;;  %v3778_v49 = vld [vmem:[%s6605_s1 + $0x10] sm:$0xff]  ;;  %v3779_v34 = vld [vmem:[%s6605_s1 + $0x18] sm:$0xff] }
 0x1d5   :  { %v2758_v27 = vpop.f32.mrf.mxu0  ;;  %3357 = vmatprep.mubr.bf16.mxu1 %v4291_v51  ;;  %v137_v51 = vld [vmem:[%s6604_s0 + $0x394] sm:$0xff]  ;;  %3826 = vperm.xlu1 %4494, %v3778_v49  }
 0x1d6   :  { %v5906_v48 = vadd.f32 %v2941_v36, %v2757_v3  ;;  %v2943_v61 = vpop.f32.mrf.mxu1  ;;  %v411_v2 = vunpack.c.l.s8.bf16 %v137_v51  ;;  %v412_v36 = vunpack.c.h.s8.bf16 %v137_v51 }
 0x1d7   :  { %v2759_v0 = vpop.f32.mrf.mxu0  ;;  %3836 = vperm.xlu0 %4493, %v3780_v40   ;;  %v3784_v40 = vld [vmem:[%s6605_s1 + $0x40] sm:$0xff] }
 0x1d8   :  { %v2760_v15 = vadd.f32 %v2759_v0, %v5532_v28  ;;  %v2944_v23 = vpop.f32.mrf.mxu1  ;;  %v141_v28 = vld [vmem:[%s6604_s0 + $0x3b2] sm:$0xff] }
 0x1d9   :  { %v2761_v37 = vpop.f32.mrf.mxu0  ;;  %v419_v11 = vunpack.c.l.s8.bf16 %v141_v28  ;;  %v420_v39 = vunpack.c.h.s8.bf16 %v141_v28  ;;  %3831 = vperm.xlu1 %4494, %v3779_v34  }
 0x1da   :  { %v5921_v58 = vadd.f32 %v2944_v23, %v2760_v15  ;;  %v2946_v43 = vpop.f32.mrf.mxu1  ;;  %v4305_v23 = vcombine.low %v396_v50, %v404_v1 }
 0x1db   :  { %v2764_v13 = vpop.f32.mrf.mxu0  ;;  %3173 = vmatmul.mubr.bf16.gmra.mxu0 %v4288_v18  ;;  %v4303_v18 = vcombine.low %v395_v20, %v403_v59  ;;  %v4321_v37 = vcombine.high %v412_v36, %v420_v39 }
 0x1dc   :  { %v2765_v25 = vadd.f32 %v2764_v13, %v5540_v46  ;;  %v2949_v6 = vpop.f32.mrf.mxu1  ;;  %3358 = vmatmul.mubr.bf16.gmra.mxu1 %v4290_v32  ;;  %3180 = vmatprep.mubr.bf16.mxu0 %v4304_v41  ;;  %v4319_v32 = vcombine.high %v411_v2, %v419_v11  ;;  %v3781_v41 = vld [vmem:[%s6605_s1 + $0x28] sm:$0xff]  ;;  %v3783_v13 = vld [vmem:[%s6605_s1 + $0x38] sm:$0xff] }
 0x1dd   :  { %v2766_v3 = vpop.f32.mrf.mxu0  ;;  %3365 = vmatprep.mubr.bf16.mxu1 %v4306_v60  ;;  %v5939_v60 = vld [vmem:[%s6604_s0 + $0x3d0] sm:$0xff]  ;;  %3841 = vperm.xlu1 %4494, %v3781_v41   ;;  %v3785_v41 = vld [vmem:[%s6605_s1 + $0x48] sm:$0xff] }
 0x1de   :  { %v5927_v27 = vadd.f32 %v2949_v6, %v2765_v25  ;;  %v2951_v61 = vpop.f32.mrf.mxu1  ;;  %v427_v28 = vunpack.c.l.s8.bf16 %v5939_v60  ;;  %v3782_v25 = vld [vmem:[%s6605_s1 + $0x30] sm:$0xff]  ;;  %v428_v34 = vunpack.c.h.s8.bf16 %v5939_v60 }
 0x1df   :  { %v2767_v0 = vpop.f32.mrf.mxu0  ;;  %3846 = vperm.xlu0 %4493, %v3782_v25   ;;  %v5967_v60 = vld [vmem:[%s6604_s0 + $0x40c] sm:$0xff] }
 0x1e0   :  { %v2768_v46 = vadd.f32 %v2767_v0, %v5542_v62  ;;  %v2952_v15 = vpop.f32.mrf.mxu1  ;;  %v149_v62 = vld [vmem:[%s6604_s0 + $0x3ee] sm:$0xff]  ;;  %v444_v25 = vunpack.c.h.s8.bf16 %v5967_v60 }
 0x1e1   :  { %v2769_v49 = vpop.f32.mrf.mxu0  ;;  %v435_v43 = vunpack.c.l.s8.bf16 %v149_v62  ;;  %v436_v3 = vunpack.c.h.s8.bf16 %v149_v62  ;;  %3851 = vperm.xlu1 %4494, %v3783_v13  }
 0x1e2   :  { %v5944_v20 = vadd.f32 %v2952_v15, %v2768_v46  ;;  %v2954_v59 = vpop.f32.mrf.mxu1 }
 0x1e3   :  { %v2772_v50 = vpop.f32.mrf.mxu0  ;;  %3181 = vmatmul.mubr.bf16.gmra.mxu0 %v4303_v18  ;;  %v4318_v18 = vcombine.low %v411_v2, %v419_v11  ;;  %3856 = vperm.xlu0 %4493, %v3784_v40   ;;  %v443_v59 = vunpack.c.l.s8.bf16 %v5967_v60  ;;  %v3788_v40 = vld [vmem:[%s6605_s1 + $0x60] sm:$0xff]  ;;  %v161_v60 = vld [vmem:[%s6604_s0 + $0x448] sm:$0xff] }
 0x1e4   :  { %v2773_v1 = vadd.f32 %v2772_v50, %v5550_v5  ;;  %v2957_v51 = vpop.f32.mrf.mxu1  ;;  %3366 = vmatmul.mubr.bf16.gmra.mxu1 %v4305_v23  ;;  %3188 = vmatprep.mubr.bf16.mxu0 %v4319_v32  ;;  %v4320_v23 = vcombine.low %v412_v36, %v420_v39  ;;  %v4334_v32 = vcombine.high %v427_v28, %v435_v43 }
 0x1e5   :  { %v2774_v6 = vpop.f32.mrf.mxu0  ;;  %3373 = vmatprep.mubr.bf16.mxu1 %v4321_v37  ;;  %v4336_v37 = vcombine.high %v428_v34, %v436_v3  ;;  %3861 = vperm.xlu1 %4494, %v3785_v41   ;;  %v3789_v41 = vld [vmem:[%s6605_s1 + $0x68] sm:$0xff] }
 0x1e6   :  { %v5955_v5 = vadd.f32 %v2957_v51, %v2773_v1  ;;  %v2959_v61 = vpop.f32.mrf.mxu1  ;;  %v3787_v1 = vld [vmem:[%s6605_s1 + $0x58] sm:$0xff]  ;;  %v3786_v51 = vld [vmem:[%s6605_s1 + $0x50] sm:$0xff] }
 0x1e7   :  { %v2775_v0 = vpop.f32.mrf.mxu0  ;;  %3866 = vperm.xlu0 %4493, %v3786_v51   ;;  %v460_v51 = vunpack.c.h.s8.bf16 %v161_v60 }
 0x1e8   :  { %v2776_v46 = vadd.f32 %v2775_v0, %v5552_v19  ;;  %v2960_v15 = vpop.f32.mrf.mxu1  ;;  %v157_v19 = vld [vmem:[%s6604_s0 + $0x42a] sm:$0xff] }
 0x1e9   :  { %v2777_v49 = vpop.f32.mrf.mxu0  ;;  %v451_v50 = vunpack.c.l.s8.bf16 %v157_v19  ;;  %v452_v6 = vunpack.c.h.s8.bf16 %v157_v19  ;;  %3871 = vperm.xlu1 %4494, %v3787_v1  }
 0x1ea   :  { %v5972_v2 = vadd.f32 %v2960_v15, %v2776_v46  ;;  %v2962_v11 = vpop.f32.mrf.mxu1 }
 0x1eb   :  { %v2780_v36 = vpop.f32.mrf.mxu0  ;;  %3189 = vmatmul.mubr.bf16.gmra.mxu0 %v4318_v18  ;;  %v4333_v18 = vcombine.low %v427_v28, %v435_v43  ;;  %3876 = vperm.xlu0 %4493, %v3788_v40   ;;  %v459_v11 = vunpack.c.l.s8.bf16 %v161_v60  ;;  %v3792_v40 = vld [vmem:[%s6605_s1 + $0x80] sm:$0xff]  ;;  %v18_v60 = vld [vmem:[%s6604_s0 + $0x18] sm:$0x3f] }
 0x1ec   :  { %v2781_v39 = vadd.f32 %v2780_v36, %v5560_v33  ;;  %v2965_v62 = vpop.f32.mrf.mxu1  ;;  %3374 = vmatmul.mubr.bf16.gmra.mxu1 %v4320_v23  ;;  %3196 = vmatprep.mubr.bf16.mxu0 %v4334_v32  ;;  %v4335_v23 = vcombine.low %v428_v34, %v436_v3  ;;  %v4349_v32 = vcombine.high %v443_v59, %v451_v50 }
 0x1ed   :  { %v2782_v13 = vpop.f32.mrf.mxu0  ;;  %3381 = vmatprep.mubr.bf16.mxu1 %v4336_v37  ;;  %v4351_v37 = vcombine.high %v444_v25, %v452_v6  ;;  %3881 = vperm.xlu1 %4494, %v3789_v41   ;;  %v3793_v41 = vld [vmem:[%s6605_s1 + $0x88] sm:$0xff] }
 0x1ee   :  { %v5983_v33 = vadd.f32 %v2965_v62, %v2781_v39  ;;  %v2967_v61 = vpop.f32.mrf.mxu1  ;;  %v3791_v39 = vld [vmem:[%s6605_s1 + $0x78] sm:$0xff]  ;;  %v3790_v62 = vld [vmem:[%s6605_s1 + $0x70] sm:$0xff] }
 0x1ef   :  { %v2783_v0 = vpop.f32.mrf.mxu0  ;;  %3886 = vperm.xlu0 %4493, %v3790_v62  }
 0x1f0   :  { %v2784_v46 = vadd.f32 %v2783_v0, %v5562_v54  ;;  %v2968_v15 = vpop.f32.mrf.mxu1  ;;  %v165_v54 = vld [vmem:[%s6604_s0 + $0x466] sm:$0xff] }
 0x1f1   :  { %v2785_v49 = vpop.f32.mrf.mxu0  ;;  %v467_v36 = vunpack.c.l.s8.bf16 %v165_v54  ;;  %v468_v13 = vunpack.c.h.s8.bf16 %v165_v54  ;;  %3891 = vperm.xlu1 %4494, %v3791_v39  }
 0x1f2   :  { %v5998_v28 = vadd.f32 %v2968_v15, %v2784_v46  ;;  %v2970_v43 = vpop.f32.mrf.mxu1 }
 0x1f3   :  { %v2788_v34 = vpop.f32.mrf.mxu0  ;;  %3197 = vmatmul.mubr.bf16.gmra.mxu0 %v4333_v18  ;;  %v4348_v18 = vcombine.low %v443_v59, %v451_v50  ;;  %3896 = vperm.xlu0 %4493, %v3792_v40   ;;  %v173_v43 = vunpack.c.l.s8.bf16 %v18_v60  ;;  %v6043_v40 = vld [vmem:[%s6604_s0 + $0x54] sm:$0x3f] }
 0x1f4   :  { %v2789_v3 = vadd.f32 %v2788_v34, %v5570_v47  ;;  %v2973_v19 = vpop.f32.mrf.mxu1  ;;  %3382 = vmatmul.mubr.bf16.gmra.mxu1 %v4335_v23  ;;  %3204 = vmatprep.mubr.bf16.mxu0 %v4349_v32  ;;  %v4350_v23 = vcombine.low %v444_v25, %v452_v6  ;;  %v4364_v32 = vcombine.high %v459_v11, %v467_v36 }
 0x1f5   :  { %v2790_v1 = vpop.f32.mrf.mxu0  ;;  %3389 = vmatprep.mubr.bf16.mxu1 %v4351_v37  ;;  %v4366_v37 = vcombine.high %v460_v51, %v468_v13  ;;  %3901 = vperm.xlu1 %4494, %v3793_v41  }
 0x1f6   :  { %v6007_v61 = vadd.f32 %v2973_v19, %v2789_v3  ;;  %v2975_v47 = vpop.f32.mrf.mxu1  ;;  %v3795_v3 = vld [vmem:[%s6605_s1 + $0x98] sm:$0xff]  ;;  %v3794_v19 = vld [vmem:[%s6605_s1 + $0x90] sm:$0xff] }
 0x1f7   :  { %v2791_v0 = vpop.f32.mrf.mxu0  ;;  %3906 = vperm.xlu0 %4493, %v3794_v19   ;;  %v4363_v47 = vcombine.low %v459_v11, %v467_v36 }
 0x1f8   :  { %v2792_v46 = vadd.f32 %v2791_v0, %v5572_v14  ;;  %v2976_v15 = vpop.f32.mrf.mxu1  ;;  %v22_v14 = vld [vmem:[%s6604_s0 + $0x36] sm:$0x3f] }
 0x1f9   :  { %v2793_v49 = vpop.f32.mrf.mxu0  ;;  %v181_v34 = vunpack.c.l.s8.bf16 %v22_v14  ;;  %3911 = vperm.xlu1 %4494, %v3795_v3   ;;  %v3798_v3 = vld [vmem:[%s6605_s1 + $0xb0] sm:$0xff] }
 0x1fa   :  { %v6022_v59 = vadd.f32 %v2976_v15, %v2792_v46  ;;  %v2978_v50 = vpop.f32.mrf.mxu1  ;;  %v4365_v46 = vcombine.low %v460_v51, %v468_v13  ;;  %v174_v13 = vunpack.c.h.s8.bf16 %v18_v60  ;;  %v6611_v60 = vmov 0.0  }
 0x1fb   :  { %v2796_v25 = vpop.f32.mrf.mxu0  ;;  %3205 = vmatmul.mubr.bf16.gmra.mxu0 %v4348_v18  ;;  %v4098_v15 = vcombine.high %v173_v43, %v181_v34  ;;  %v182_v50 = vunpack.c.h.s8.bf16 %v22_v14 }
 0x1fc   :  { %v2797_v6 = vadd.f32 %v2796_v25, %v5580_v31  ;;  %v2981_v54 = vpop.f32.mrf.mxu1  ;;  %3390 = vmatmul.mubr.bf16.gmra.mxu1 %v4350_v23  ;;  %3212 = vmatprep.mubr.bf16.mxu0 %v4364_v32  ;;  %v3797_v23 = vld [vmem:[%s6605_s1 + $0xa8] sm:$0xff]  ;;  %v3796_v32 = vld [vmem:[%s6605_s1 + $0xa0] sm:$0xff]  ;;  %v189_v25 = vunpack.c.l.s8.bf16 %v6043_v40 }
 0x1fd   :  { %v2798_v39 = vpop.f32.mrf.mxu0  ;;  %3397 = vmatprep.mubr.bf16.mxu1 %v4366_v37  ;;  %3921 = vperm.xlu1 %4494, %v3797_v23  }
 0x1fe   :  { %v6031_v62 = vadd.f32 %v2981_v54, %v2797_v6  ;;  %v2983_v1 = vpop.f32.mrf.mxu1  ;;  %3916 = vperm.xlu0 %4493, %v3796_v32   ;;  %v3799_v54 = vld [vmem:[%s6605_s1 + $0xb8] sm:$0xff]  ;;  %v34_v32 = vld [vmem:[%s6604_s0 + $0x90] sm:$0x3f] }
 0x1ff   :  { %v2799_v31 = vpop.f32.mrf.mxu0  ;;  %v4097_v1 = vcombine.low %v173_v43, %v181_v34 }
 0x200   :  { %v2800_v0 = vadd.f32 %v2799_v31, %v5582_v53  ;;  %v2984_v18 = vpop.f32.mrf.mxu1  ;;  %v6048_v53 = vld [vmem:[%s6604_s0 + $0x72] sm:$0x3f] }
 0x201   :  { %v2801_v41 = vpop.f32.mrf.mxu0  ;;  %v197_v6 = vunpack.c.l.s8.bf16 %v6048_v53  ;;  %3931 = vperm.xlu1 %4494, %v3799_v54   ;;  %v3803_v54 = vld [vmem:[%s6605_s1 + $0xd8] sm:$0xff] }
 0x202   :  { %v6050_v11 = vadd.f32 %v2984_v18, %v2800_v0  ;;  %v2986_v36 = vpop.f32.mrf.mxu1  ;;  %3926 = vperm.xlu0 %4493, %v3798_v3   ;;  %v4099_v0 = vcombine.low %v174_v13, %v182_v50  ;;  %v3802_v3 = vld [vmem:[%s6605_s1 + $0xd0] sm:$0xff] }
 0x203   :  { %v2804_v51 = vpop.f32.mrf.mxu0  ;;  %3213 = vmatmul.mubr.bf16.gmra.mxu0 %v4363_v47  ;;  %v4113_v18 = vcombine.high %v189_v25, %v197_v6  ;;  %v190_v36 = vunpack.c.h.s8.bf16 %v6043_v40 }
 0x204   :  { %v2805_v49 = vadd.f32 %v2804_v51, %v5590_v44  ;;  %v2989_v37 = vpop.f32.mrf.mxu1  ;;  %3398 = vmatmul.mubr.bf16.gmra.mxu1 %v4365_v46  ;;  %3438 = vmatprep.mubr.bf16.mxu0 %v4098_v15  ;;  %v3801_v46 = vld [vmem:[%s6605_s1 + $0xc8] sm:$0xff]  ;;  %v3800_v15 = vld [vmem:[%s6605_s1 + $0xc0] sm:$0xff] }
 0x205   :  { %v2806_v19 = vpop.f32.mrf.mxu0  ;;  %4414 = vmatprep.mubr.msk.bf16.mxu1 %vm4497_vm0, %v6611_v60  ;;  %3941 = vperm.xlu1 %4494, %v3801_v46  }
 0x206   :  { %v6063_v44 = vadd.f32 %v2989_v37, %v2805_v49  ;;  %v2991_v14 = vpop.f32.mrf.mxu1  ;;  %3936 = vperm.xlu0 %4493, %v3800_v15   ;;  %v198_v49 = vunpack.c.h.s8.bf16 %v6048_v53  ;;  %v205_v37 = vunpack.c.l.s8.bf16 %v34_v32  ;;  %v42_v15 = vld [vmem:[%s6604_s0 + $0xcc] sm:$0x3f] }
 0x207   :  { %v2807_v39 = vpop.f32.mrf.mxu0  ;;  %v4112_v14 = vcombine.low %v189_v25, %v197_v6 }
 0x208   :  { %v2808_v31 = vadd.f32 %v2807_v39, %v5607_v26  ;;  %v2992_v47 = vpop.f32.mrf.mxu1  ;;  %v38_v26 = vld [vmem:[%s6604_s0 + $0xae] sm:$0x3f] }
 0x209   :  { %v2809_v23 = vpop.f32.mrf.mxu0  ;;  %v213_v50 = vunpack.c.l.s8.bf16 %v38_v26  ;;  %3951 = vperm.xlu1 %4494, %v3803_v54   ;;  %v3807_v54 = vld [vmem:[%s6605_s1 + $0xf8] sm:$0xff] }
 0x20a   :  { %v6078_v43 = vadd.f32 %v2992_v47, %v2808_v31  ;;  %v2994_v34 = vpop.f32.mrf.mxu1  ;;  %3946 = vperm.xlu0 %4493, %v3802_v3   ;;  %v4114_v31 = vcombine.low %v190_v36, %v198_v49  ;;  %v3806_v3 = vld [vmem:[%s6605_s1 + $0xf0] sm:$0xff] }
 0x20b   :  { %v2812_v41 = vpop.f32.mrf.mxu0  ;;  %3439 = vmatmul.mubr.bf16.vlgmr.msra.gmra.mxu0 %v4097_v1  ;;  %v4128_v47 = vcombine.high %v205_v37, %v213_v50  ;;  %v206_v34 = vunpack.c.h.s8.bf16 %v34_v32 }
 0x20c   :  { %v2813_v51 = vadd.f32 %v2812_v41, %v5630_v63  ;;  %v2997_v13 = vpop.f32.mrf.mxu1  ;;  %4415 = vmatmul.mubr.msk.bf16.vlgmr.msra.gmra.mxu1 %vm2238_vm1, %v4099_v0  ;;  %3446 = vmatprep.mubr.bf16.mxu0 %v4113_v18  ;;  %v3805_v0 = vld [vmem:[%s6605_s1 + $0xe8] sm:$0xff]  ;;  %v3804_v18 = vld [vmem:[%s6605_s1 + $0xe0] sm:$0xff] }
 0x20d   :  { %v2814_v19 = vpop.f32.mrf.mxu0  ;;  %4418 = vmatprep.mubr.msk.bf16.mxu1 %vm4497_vm0, %v6611_v60  ;;  %3961 = vperm.xlu1 %4494, %v3805_v0  }
 0x20e   :  { %v6092_v63 = vadd.f32 %v2997_v13, %v2813_v51  ;;  %v2999_v40 = vpop.f32.mrf.mxu1  ;;  %3956 = vperm.xlu0 %4493, %v3804_v18   ;;  %v214_v51 = vunpack.c.h.s8.bf16 %v38_v26  ;;  %v221_v13 = vunpack.c.l.s8.bf16 %v42_v15  ;;  %v50_v18 = vld [vmem:[%s6604_s0 + $0x108] sm:$0x3f] }
 0x20f   :  { %v2815_v53 = vpop.f32.mrf.mxu0  ;;  %v4127_v40 = vcombine.low %v205_v37, %v213_v50 }
 0x210   :  { %v2816_v39 = vadd.f32 %v2815_v53, %v5642_v22  ;;  %v3000_v1 = vpop.f32.mrf.mxu1  ;;  %v46_v22 = vld [vmem:[%s6604_s0 + $0xea] sm:$0x3f] }
 0x211   :  { %v2817_v46 = vpop.f32.mrf.mxu0  ;;  %v229_v49 = vunpack.c.l.s8.bf16 %v46_v22  ;;  %3971 = vperm.xlu1 %4494, %v3807_v54   ;;  %v3811_v54 = vld [vmem:[%s6605_s1 + $0x118] sm:$0xff] }
 0x212   :  { %v6107_v25 = vadd.f32 %v3000_v1, %v2816_v39  ;;  %v3002_v6 = vpop.f32.mrf.mxu1  ;;  %3966 = vperm.xlu0 %4493, %v3806_v3   ;;  %v4129_v39 = vcombine.low %v206_v34, %v214_v51  ;;  %v3810_v3 = vld [vmem:[%s6605_s1 + $0x110] sm:$0xff] }
 0x213   :  { %v2820_v23 = vpop.f32.mrf.mxu0  ;;  %3447 = vmatmul.mubr.bf16.gmra.mxu0 %v4112_v14  ;;  %v4143_v1 = vcombine.high %v221_v13, %v229_v49  ;;  %v222_v6 = vunpack.c.h.s8.bf16 %v42_v15 }
 0x214   :  { %v2821_v41 = vadd.f32 %v2820_v23, %v5657_v35  ;;  %v3005_v36 = vpop.f32.mrf.mxu1  ;;  %4419 = vmatmul.mubr.msk.bf16.gmra.mxu1 %vm2238_vm1, %v4114_v31  ;;  %3454 = vmatprep.mubr.bf16.mxu0 %v4128_v47  ;;  %v3809_v31 = vld [vmem:[%s6605_s1 + $0x108] sm:$0xff]  ;;  %v3808_v47 = vld [vmem:[%s6605_s1 + $0x100] sm:$0xff] }
 0x215   :  { %v2822_v19 = vpop.f32.mrf.mxu0  ;;  %4422 = vmatprep.mubr.msk.bf16.mxu1 %vm4497_vm0, %v6611_v60  ;;  %3981 = vperm.xlu1 %4494, %v3809_v31  }
 0x216   :  { %v6119_v35 = vadd.f32 %v3005_v36, %v2821_v41  ;;  %v3007_v32 = vpop.f32.mrf.mxu1  ;;  %3976 = vperm.xlu0 %4493, %v3808_v47   ;;  %v230_v41 = vunpack.c.h.s8.bf16 %v46_v22  ;;  %v237_v36 = vunpack.c.l.s8.bf16 %v50_v18  ;;  %v58_v47 = vld [vmem:[%s6604_s0 + $0x144] sm:$0x3f] }
 0x217   :  { %v2823_v26 = vpop.f32.mrf.mxu0  ;;  %v4142_v32 = vcombine.low %v221_v13, %v229_v49 }
 0x218   :  { %v2824_v53 = vadd.f32 %v2823_v26, %v5666_v17  ;;  %v3008_v14 = vpop.f32.mrf.mxu1  ;;  %v54_v17 = vld [vmem:[%s6604_s0 + $0x126] sm:$0x3f] }
 0x219   :  { %v2825_v0 = vpop.f32.mrf.mxu0  ;;  %v245_v51 = vunpack.c.l.s8.bf16 %v54_v17  ;;  %3991 = vperm.xlu1 %4494, %v3811_v54  }
 0x21a   :  { %v6134_v37 = vadd.f32 %v3008_v14, %v2824_v53  ;;  %v3010_v50 = vpop.f32.mrf.mxu1  ;;  %3986 = vperm.xlu0 %4493, %v3810_v3   ;;  %v4144_v53 = vcombine.low %v222_v6, %v230_v41 }
 0x21b   :  { %v2828_v46 = vpop.f32.mrf.mxu0  ;;  %3455 = vmatmul.mubr.bf16.gmra.mxu0 %v4127_v40  ;;  %v4158_v14 = vcombine.high %v237_v36, %v245_v51  ;;  %v238_v50 = vunpack.c.h.s8.bf16 %v50_v18 }
 0x21c   :  { %v2829_v23 = vadd.f32 %v2828_v46, %v5684_v12  ;;  %v3013_v34 = vpop.f32.mrf.mxu1  ;;  %4423 = vmatmul.mubr.msk.bf16.gmra.mxu1 %vm2238_vm1, %v4129_v39  ;;  %3462 = vmatprep.mubr.bf16.mxu0 %v4143_v1  ;;  %v3813_v39 = vld [vmem:[%s6605_s1 + $0x128] sm:$0xff]  ;;  %v3812_v1 = vld [vmem:[%s6605_s1 + $0x120] sm:$0xff] }
 0x21d   :  { %v2830_v19 = vpop.f32.mrf.mxu0  ;;  %4426 = vmatprep.mubr.msk.bf16.mxu1 %vm4497_vm0, %v6611_v60  ;;  %4001 = vperm.xlu1 %4494, %v3813_v39  }
 0x21e   :  { %v6146_v12 = vadd.f32 %v3013_v34, %v2829_v23  ;;  %v3015_v15 = vpop.f32.mrf.mxu1  ;;  %3996 = vperm.xlu0 %4493, %v3812_v1   ;;  %v246_v23 = vunpack.c.h.s8.bf16 %v54_v17  ;;  %v253_v34 = vunpack.c.l.s8.bf16 %v58_v47  ;;  %v66_v17 = vld [vmem:[%s6604_s0 + $0x180] sm:$0x3f] }
 0x21f   :  { %v2831_v22 = vpop.f32.mrf.mxu0 }
 0x220   :  { %v2832_v26 = vadd.f32 %v2831_v22, %v5694_v16  ;;  %v3016_v40 = vpop.f32.mrf.mxu1  ;;  %v62_v16 = vld [vmem:[%s6604_s0 + $0x162] sm:$0x3f]  ;;  %v4157_v22 = vcombine.low %v237_v36, %v245_v51  ;;  %v254_v36 = vunpack.c.h.s8.bf16 %v58_v47 }
 0x221   :  { %v2833_v31 = vpop.f32.mrf.mxu0  ;;  %v261_v41 = vunpack.c.l.s8.bf16 %v62_v16 }
 0x222   :  { %v6161_v13 = vadd.f32 %v3016_v40, %v2832_v26  ;;  %v3018_v49 = vpop.f32.mrf.mxu1  ;;  %v262_v31 = vunpack.c.h.s8.bf16 %v62_v16  ;;  %v74_v16 = vld [vmem:[%s6604_s0 + $0x1bc] sm:$0x3f] }
 0x223   :  { %v2836_v0 = vpop.f32.mrf.mxu0  ;;  %3463 = vmatmul.mubr.bf16.gmra.mxu0 %v4142_v32  ;;  %v4173_v26 = vcombine.high %v253_v34, %v261_v41  ;;  %v269_v49 = vunpack.c.l.s8.bf16 %v66_v17 }
 0x224   :  { %v2837_v46 = vadd.f32 %v2836_v0, %v5715_v42  ;;  %v3021_v6 = vpop.f32.mrf.mxu1  ;;  %4427 = vmatmul.mubr.msk.bf16.gmra.mxu1 %vm2238_vm1, %v4144_v53  ;;  %3470 = vmatprep.mubr.bf16.mxu0 %v4158_v14  ;;  %v4159_v42 = vcombine.low %v238_v50, %v246_v23  ;;  %v70_v53 = vld [vmem:[%s6604_s0 + $0x19e] sm:$0x3f] }
 0x225   :  { %v2838_v54 = vpop.f32.mrf.mxu0  ;;  %4430 = vmatprep.mubr.msk.bf16.mxu1 %vm4497_vm0, %v6611_v60  ;;  %v277_v0 = vunpack.c.l.s8.bf16 %v70_v53 }
 0x226   :  { %v6167_v3 = vadd.f32 %v3021_v6, %v2837_v46  ;;  %v3023_v19 = vpop.f32.mrf.mxu1  ;;  %v4172_v54 = vcombine.low %v253_v34, %v261_v41  ;;  %v270_v34 = vunpack.c.h.s8.bf16 %v66_v17 }
 0x227   :  { %v2839_v15 = vpop.f32.mrf.mxu0 }
 0x228   :  { %v2840_v18 = vadd.f32 %v2839_v15, %v5726_v21  ;;  %v3024_v32 = vpop.f32.mrf.mxu1  ;;  %v4188_v15 = vcombine.high %v269_v49, %v277_v0 }
 0x229   :  { %v2841_v40 = vpop.f32.mrf.mxu0 }
 0x22a   :  { %v6176_v14 = vadd.f32 %v3024_v32, %v2840_v18  ;;  %v3026_v39 = vpop.f32.mrf.mxu1  ;;  %v78_v18 = vld [vmem:[%s6604_s0 + $0x1da] sm:$0x3f]  ;;  %v278_v40 = vunpack.c.h.s8.bf16 %v70_v53 }
 0x22b   :  { %v2844_v1 = vpop.f32.mrf.mxu0  ;;  %3471 = vmatmul.mubr.bf16.gmra.mxu0 %v4157_v22  ;;  %v285_v39 = vunpack.c.l.s8.bf16 %v74_v16  ;;  %v82_v53 = vld [vmem:[%s6604_s0 + $0x1f8] sm:$0x3f] }
 0x22c   :  { %v2845_v21 = vadd.f32 %v2844_v1, %v5747_v45  ;;  %v3029_v51 = vpop.f32.mrf.mxu1  ;;  %4431 = vmatmul.mubr.msk.bf16.gmra.mxu1 %vm2238_vm1, %v4159_v42  ;;  %3478 = vmatprep.mubr.bf16.mxu0 %v4173_v26  ;;  %v4174_v45 = vcombine.low %v254_v36, %v262_v31  ;;  %v293_v1 = vunpack.c.l.s8.bf16 %v78_v18 }
 0x22d   :  { %v2846_v50 = vpop.f32.mrf.mxu0  ;;  %4434 = vmatprep.mubr.msk.bf16.mxu1 %vm4497_vm0, %v6611_v60 }
 0x22e   :  { %v6182_v46 = vadd.f32 %v3029_v51, %v2845_v21  ;;  %v3031_v6 = vpop.f32.mrf.mxu1  ;;  %v4187_v50 = vcombine.low %v269_v49, %v277_v0  ;;  %v286_v49 = vunpack.c.h.s8.bf16 %v74_v16  ;;  %v6612_v0 = vld [vmem:[#allocation2_spill] sm:$0xff] }
 0x22f   :  { %v2847_v23 = vpop.f32.mrf.mxu0 }
 0x230   :  { %v2848_v47 = vadd.f32 %v2847_v23, %v5758_v4  ;;  %v3032_v19 = vpop.f32.mrf.mxu1  ;;  %v4203_v23 = vcombine.high %v285_v39, %v293_v1 }
 0x231   :  { %v2849_v22 = vpop.f32.mrf.mxu0 }
 0x232   :  { %v6191_v32 = vadd.f32 %v3032_v19, %v2848_v47  ;;  %v3034_v42 = vpop.f32.mrf.mxu1  ;;  %v86_v47 = vld [vmem:[%s6604_s0 + $0x216] sm:$0x3f] }
 0x233   :  { %v3070_v26 = vpop.f32.mrf.mxu0  ;;  %3479 = vmatmul.mubr.bf16.gmra.mxu0 %v4172_v54  ;;  %v294_v42 = vunpack.c.h.s8.bf16 %v78_v18  ;;  %v90_v18 = vld [vmem:[%s6604_s0 + $0x234] sm:$0x3f] }
 0x234   :  { %v3071_v4 = vadd.f32 %v3070_v26, %v5782_v29  ;;  %v3255_v41 = vpop.f32.mrf.mxu1  ;;  %4435 = vmatmul.mubr.msk.bf16.gmra.mxu1 %vm2238_vm1, %v4174_v45  ;;  %3486 = vmatprep.mubr.bf16.mxu0 %v4188_v15  ;;  %v4189_v29 = vcombine.low %v270_v34, %v278_v40  ;;  %v301_v26 = vunpack.c.l.s8.bf16 %v82_v53  ;;  %v309_v34 = vunpack.c.l.s8.bf16 %v86_v47 }
 0x235   :  { %v3072_v36 = vpop.f32.mrf.mxu0  ;;  %4438 = vmatprep.mubr.msk.bf16.mxu1 %vm4497_vm0, %v6611_v60 }
 0x236   :  { %v6197_v21 = vadd.f32 %v3255_v41, %v3071_v4  ;;  %v3257_v51 = vpop.f32.mrf.mxu1 }
 0x237   :  { %v3073_v31 = vpop.f32.mrf.mxu0  ;;  %v4202_v51 = vcombine.low %v285_v39, %v293_v1  ;;  %v302_v39 = vunpack.c.h.s8.bf16 %v82_v53 }
 0x238   :  { %v3074_v17 = vadd.f32 %v3073_v31, %v5802_v52  ;;  %v3258_v6 = vpop.f32.mrf.mxu1  ;;  %v6613_v31 = vld [vmem:[#allocation3_spill] sm:$0xff] }
 0x239   :  { %v3075_v54 = vpop.f32.mrf.mxu0 }
 0x23a   :  { %v6206_v19 = vadd.f32 %v3258_v6, %v3074_v17  ;;  %v3260_v45 = vpop.f32.mrf.mxu1  ;;  %v4204_v17 = vcombine.low %v286_v49, %v294_v42  ;;  %v4218_v6 = vcombine.high %v301_v26, %v309_v34  ;;  %v310_v49 = vunpack.c.h.s8.bf16 %v86_v47  ;;  %v98_v47 = vld [vmem:[%s6604_s0 + $0x270] sm:$0x3f] }
 0x23b   :  { %v3078_v15 = vpop.f32.mrf.mxu0  ;;  %3487 = vmatmul.mubr.bf16.gmra.mxu0 %v4187_v50 }
 0x23c   :  { %v3079_v52 = vadd.f32 %v3078_v15, %v6612_v0  ;;  %v3263_v22 = vpop.f32.mrf.mxu1  ;;  %4439 = vmatmul.mubr.msk.bf16.gmra.mxu1 %vm2238_vm1, %v4189_v29  ;;  %3494 = vmatprep.mubr.bf16.mxu0 %v4203_v23  ;;  %v94_v29 = vld [vmem:[%s6604_s0 + $0x252] sm:$0x3f] }
 0x23d   :  { %v3080_v4 = vpop.f32.mrf.mxu0  ;;  %4442 = vmatprep.mubr.msk.bf16.mxu1 %vm4497_vm0, %v6611_v60 }
 0x23e   :  { %v6212_v41 = vadd.f32 %v3263_v22, %v3079_v52  ;;  %v3265_v40 = vpop.f32.mrf.mxu1  ;;  %v317_v52 = vunpack.c.l.s8.bf16 %v90_v18  ;;  %v325_v22 = vunpack.c.l.s8.bf16 %v94_v29 }
 0x23f   :  { %v3081_v36 = vpop.f32.mrf.mxu0 }
 0x240   :  { %v3082_v16 = vadd.f32 %v3081_v36, %v6613_v31  ;;  %v3266_v50 = vpop.f32.mrf.mxu1  ;;  %v4217_v31 = vcombine.low %v301_v26, %v309_v34  ;;  %v318_v26 = vunpack.c.h.s8.bf16 %v90_v18 }
 0x241   :  { %v3083_v54 = vpop.f32.mrf.mxu0 }
 0x242   :  { %v6221_v23 = vadd.f32 %v3266_v50, %v3082_v16  ;;  %v3268_v45 = vpop.f32.mrf.mxu1  ;;  %v4233_v16 = vcombine.high %v317_v52, %v325_v22 }
 0x243   :  { %v3086_v15 = vpop.f32.mrf.mxu0  ;;  %3495 = vmatmul.mubr.bf16.gmra.mxu0 %v4202_v51 }
 0x244   :  { %v3087_v1 = vadd.f32 %v3086_v15, %v5842_v38  ;;  %v3271_v0 = vpop.f32.mrf.mxu1  ;;  %4443 = vmatmul.mubr.msk.bf16.gmra.mxu1 %vm2238_vm1, %v4204_v17  ;;  %3502 = vmatprep.mubr.bf16.mxu0 %v4218_v6  ;;  %v4219_v38 = vcombine.low %v302_v39, %v310_v49  ;;  %v102_v17 = vld [vmem:[%s6604_s0 + $0x28e] sm:$0x3f]  ;;  %v326_v15 = vunpack.c.h.s8.bf16 %v94_v29  ;;  %v333_v39 = vunpack.c.l.s8.bf16 %v98_v47 }
 0x245   :  { %v3088_v42 = vpop.f32.mrf.mxu0  ;;  %4446 = vmatprep.mubr.msk.bf16.mxu1 %vm4497_vm0, %v6611_v60  ;;  %v106_v29 = vld [vmem:[%s6604_s0 + $0x2ac] sm:$0x3f] }
 0x246   :  { %v6227_v4 = vadd.f32 %v3271_v0, %v3087_v1  ;;  %v3273_v40 = vpop.f32.mrf.mxu1  ;;  %v341_v1 = vunpack.c.l.s8.bf16 %v102_v17 }
 0x247   :  { %v3089_v36 = vpop.f32.mrf.mxu0 }
 0x248   :  { %v3090_v53 = vadd.f32 %v3089_v36, %v5852_v9  ;;  %v3274_v51 = vpop.f32.mrf.mxu1  ;;  %v4232_v36 = vcombine.low %v317_v52, %v325_v22  ;;  %v334_v52 = vunpack.c.h.s8.bf16 %v98_v47 }
 0x249   :  { %v3091_v50 = vpop.f32.mrf.mxu0 }
 0x24a   :  { %v6236_v6 = vadd.f32 %v3274_v51, %v3090_v53  ;;  %v3276_v54 = vpop.f32.mrf.mxu1  ;;  %v4248_v53 = vcombine.high %v333_v39, %v341_v1 }
 0x24b   :  { %v3094_v45 = vpop.f32.mrf.mxu0  ;;  %3503 = vmatmul.mubr.bf16.gmra.mxu0 %v4217_v31 }
 0x24c   :  { %v3095_v9 = vadd.f32 %v3094_v45, %v5855_v8  ;;  %v3279_v34 = vpop.f32.mrf.mxu1  ;;  %4447 = vmatmul.mubr.msk.bf16.gmra.mxu1 %vm2238_vm1, %v4219_v38  ;;  %3510 = vmatprep.mubr.bf16.mxu0 %v4233_v16  ;;  %v4234_v8 = vcombine.low %v318_v26, %v326_v15  ;;  %v110_v38 = vld [vmem:[%s6604_s0 + $0x2ca] sm:$0x3f]  ;;  %v342_v45 = vunpack.c.h.s8.bf16 %v102_v17  ;;  %v349_v26 = vunpack.c.l.s8.bf16 %v106_v29 }
 0x24d   :  { %v3096_v0 = vpop.f32.mrf.mxu0  ;;  %4450 = vmatprep.mubr.msk.bf16.mxu1 %vm4497_vm0, %v6611_v60  ;;  %v114_v17 = vld [vmem:[%s6604_s0 + $0x2e8] sm:$0x3f] }
 0x24e   :  { %v6242_v49 = vadd.f32 %v3279_v34, %v3095_v9  ;;  %v3281_v42 = vpop.f32.mrf.mxu1  ;;  %v357_v9 = vunpack.c.l.s8.bf16 %v110_v38 }
 0x24f   :  { %v3097_v40 = vpop.f32.mrf.mxu0 }
 0x250   :  { %v3098_v18 = vadd.f32 %v3097_v40, %v5864_v56  ;;  %v3282_v31 = vpop.f32.mrf.mxu1  ;;  %v4247_v40 = vcombine.low %v333_v39, %v341_v1  ;;  %v350_v39 = vunpack.c.h.s8.bf16 %v106_v29 }
 0x251   :  { %v3099_v51 = vpop.f32.mrf.mxu0 }
 0x252   :  { %v6251_v16 = vadd.f32 %v3282_v31, %v3098_v18  ;;  %v3284_v50 = vpop.f32.mrf.mxu1  ;;  %v4263_v18 = vcombine.high %v349_v26, %v357_v9 }
 0x253   :  { %v3102_v54 = vpop.f32.mrf.mxu0  ;;  %3511 = vmatmul.mubr.bf16.gmra.mxu0 %v4232_v36 }
 0x254   :  { %v3103_v56 = vadd.f32 %v3102_v54, %v5867_v24  ;;  %v3287_v22 = vpop.f32.mrf.mxu1  ;;  %4451 = vmatmul.mubr.msk.bf16.gmra.mxu1 %vm2238_vm1, %v4234_v8  ;;  %3518 = vmatprep.mubr.bf16.mxu0 %v4248_v53  ;;  %v4249_v24 = vcombine.low %v334_v52, %v342_v45  ;;  %v118_v8 = vld [vmem:[%s6604_s0 + $0x306] sm:$0x3f]  ;;  %v358_v54 = vunpack.c.h.s8.bf16 %v110_v38  ;;  %v365_v52 = vunpack.c.l.s8.bf16 %v114_v17 }
 0x255   :  { %v3104_v34 = vpop.f32.mrf.mxu0  ;;  %4454 = vmatprep.mubr.msk.bf16.mxu1 %vm4497_vm0, %v6611_v60  ;;  %v122_v38 = vld [vmem:[%s6604_s0 + $0x324] sm:$0x3f] }
 0x256   :  { %v6257_v15 = vadd.f32 %v3287_v22, %v3103_v56  ;;  %v3289_v0 = vpop.f32.mrf.mxu1  ;;  %v373_v56 = vunpack.c.l.s8.bf16 %v118_v8 }
 0x257   :  { %v3105_v42 = vpop.f32.mrf.mxu0 }
 0x258   :  { %v3106_v47 = vadd.f32 %v3105_v42, %v5876_v55  ;;  %v3290_v36 = vpop.f32.mrf.mxu1  ;;  %v4262_v42 = vcombine.low %v349_v26, %v357_v9  ;;  %v366_v26 = vunpack.c.h.s8.bf16 %v114_v17 }
 0x259   :  { %v3107_v31 = vpop.f32.mrf.mxu0 }
 0x25a   :  { %v6266_v53 = vadd.f32 %v3290_v36, %v3106_v47  ;;  %v3292_v51 = vpop.f32.mrf.mxu1  ;;  %v4278_v47 = vcombine.high %v365_v52, %v373_v56 }
 0x25b   :  { %v3110_v50 = vpop.f32.mrf.mxu0  ;;  %3519 = vmatmul.mubr.bf16.gmra.mxu0 %v4247_v40 }
 0x25c   :  { %v3111_v55 = vadd.f32 %v3110_v50, %v5879_v57  ;;  %v3295_v1 = vpop.f32.mrf.mxu1  ;;  %4455 = vmatmul.mubr.msk.bf16.gmra.mxu1 %vm2238_vm1, %v4249_v24  ;;  %3526 = vmatprep.mubr.bf16.mxu0 %v4263_v18  ;;  %v4264_v57 = vcombine.low %v350_v39, %v358_v54  ;;  %v126_v24 = vld [vmem:[%s6604_s0 + $0x342] sm:$0x3f]  ;;  %v374_v50 = vunpack.c.h.s8.bf16 %v118_v8  ;;  %v381_v39 = vunpack.c.l.s8.bf16 %v122_v38 }
 0x25d   :  { %v3112_v22 = vpop.f32.mrf.mxu0  ;;  %4458 = vmatprep.mubr.msk.bf16.mxu1 %vm4497_vm0, %v6611_v60  ;;  %v130_v8 = vld [vmem:[%s6604_s0 + $0x360] sm:$0x3f] }
 0x25e   :  { %v6272_v45 = vadd.f32 %v3295_v1, %v3111_v55  ;;  %v3297_v34 = vpop.f32.mrf.mxu1  ;;  %v389_v55 = vunpack.c.l.s8.bf16 %v126_v24 }
 0x25f   :  { %v3113_v0 = vpop.f32.mrf.mxu0 }
 0x260   :  { %v3114_v29 = vadd.f32 %v3113_v0, %v5888_v7  ;;  %v3298_v40 = vpop.f32.mrf.mxu1  ;;  %v4277_v0 = vcombine.low %v365_v52, %v373_v56  ;;  %v382_v52 = vunpack.c.h.s8.bf16 %v122_v38 }
 0x261   :  { %v3115_v36 = vpop.f32.mrf.mxu0 }
 0x262   :  { %v6281_v18 = vadd.f32 %v3298_v40, %v3114_v29  ;;  %v3300_v31 = vpop.f32.mrf.mxu1  ;;  %v4293_v29 = vcombine.high %v381_v39, %v389_v55 }
 0x263   :  { %v3118_v51 = vpop.f32.mrf.mxu0  ;;  %3527 = vmatmul.mubr.bf16.gmra.mxu0 %v4262_v42 }
 0x264   :  { %v3119_v7 = vadd.f32 %v3118_v51, %v5891_v10  ;;  %v3303_v9 = vpop.f32.mrf.mxu1  ;;  %4459 = vmatmul.mubr.msk.bf16.gmra.mxu1 %vm2238_vm1, %v4264_v57  ;;  %3534 = vmatprep.mubr.bf16.mxu0 %v4278_v47  ;;  %v4279_v10 = vcombine.low %v366_v26, %v374_v50  ;;  %v134_v57 = vld [vmem:[%s6604_s0 + $0x37e] sm:$0x3f]  ;;  %v390_v51 = vunpack.c.h.s8.bf16 %v126_v24  ;;  %v397_v26 = vunpack.c.l.s8.bf16 %v130_v8 }
 0x265   :  { %v3120_v1 = vpop.f32.mrf.mxu0  ;;  %4462 = vmatprep.mubr.msk.bf16.mxu1 %vm4497_vm0, %v6611_v60  ;;  %v138_v24 = vld [vmem:[%s6604_s0 + $0x39c] sm:$0x3f] }
 0x266   :  { %v6287_v54 = vadd.f32 %v3303_v9, %v3119_v7  ;;  %v3305_v22 = vpop.f32.mrf.mxu1  ;;  %v405_v7 = vunpack.c.l.s8.bf16 %v134_v57 }
 0x267   :  { %v3121_v34 = vpop.f32.mrf.mxu0 }
 0x268   :  { %v3122_v17 = vadd.f32 %v3121_v34, %v5900_v30  ;;  %v3306_v42 = vpop.f32.mrf.mxu1  ;;  %v4292_v34 = vcombine.low %v381_v39, %v389_v55  ;;  %v398_v39 = vunpack.c.h.s8.bf16 %v130_v8 }
 0x269   :  { %v3123_v40 = vpop.f32.mrf.mxu0 }
 0x26a   :  { %v6296_v47 = vadd.f32 %v3306_v42, %v3122_v17  ;;  %v3308_v36 = vpop.f32.mrf.mxu1  ;;  %v4308_v17 = vcombine.high %v397_v26, %v405_v7 }
 0x26b   :  { %v3126_v31 = vpop.f32.mrf.mxu0  ;;  %3535 = vmatmul.mubr.bf16.gmra.mxu0 %v4277_v0 }
 0x26c   :  { %v3127_v30 = vadd.f32 %v3126_v31, %v5906_v48  ;;  %v3311_v56 = vpop.f32.mrf.mxu1  ;;  %4463 = vmatmul.mubr.msk.bf16.gmra.mxu1 %vm2238_vm1, %v4279_v10  ;;  %3542 = vmatprep.mubr.bf16.mxu0 %v4293_v29  ;;  %v4294_v48 = vcombine.low %v382_v52, %v390_v51  ;;  %v142_v10 = vld [vmem:[%s6604_s0 + $0x3ba] sm:$0x3f]  ;;  %v406_v31 = vunpack.c.h.s8.bf16 %v134_v57  ;;  %v413_v52 = vunpack.c.l.s8.bf16 %v138_v24 }
 0x26d   :  { %v3128_v9 = vpop.f32.mrf.mxu0  ;;  %4466 = vmatprep.mubr.msk.bf16.mxu1 %vm4497_vm0, %v6611_v60  ;;  %v146_v57 = vld [vmem:[%s6604_s0 + $0x3d8] sm:$0x3f] }
 0x26e   :  { %v6302_v50 = vadd.f32 %v3311_v56, %v3127_v30  ;;  %v3313_v1 = vpop.f32.mrf.mxu1  ;;  %v421_v30 = vunpack.c.l.s8.bf16 %v142_v10 }
 0x26f   :  { %v3129_v22 = vpop.f32.mrf.mxu0 }
 0x270   :  { %v3130_v38 = vadd.f32 %v3129_v22, %v5921_v58  ;;  %v3314_v0 = vpop.f32.mrf.mxu1  ;;  %v4307_v22 = vcombine.low %v397_v26, %v405_v7  ;;  %v414_v26 = vunpack.c.h.s8.bf16 %v138_v24 }
 0x271   :  { %v3131_v42 = vpop.f32.mrf.mxu0 }
 0x272   :  { %v6311_v29 = vadd.f32 %v3314_v0, %v3130_v38  ;;  %v3316_v40 = vpop.f32.mrf.mxu1  ;;  %v4323_v38 = vcombine.high %v413_v52, %v421_v30 }
 0x273   :  { %v3134_v36 = vpop.f32.mrf.mxu0  ;;  %3543 = vmatmul.mubr.bf16.gmra.mxu0 %v4292_v34 }
 0x274   :  { %v3135_v58 = vadd.f32 %v3134_v36, %v5927_v27  ;;  %v3319_v55 = vpop.f32.mrf.mxu1  ;;  %4467 = vmatmul.mubr.msk.bf16.gmra.mxu1 %vm2238_vm1, %v4294_v48  ;;  %3550 = vmatprep.mubr.bf16.mxu0 %v4308_v17  ;;  %v4309_v27 = vcombine.low %v398_v39, %v406_v31  ;;  %v150_v48 = vld [vmem:[%s6604_s0 + $0x3f6] sm:$0x3f]  ;;  %v422_v36 = vunpack.c.h.s8.bf16 %v142_v10  ;;  %v429_v39 = vunpack.c.l.s8.bf16 %v146_v57 }
 0x275   :  { %v3136_v56 = vpop.f32.mrf.mxu0  ;;  %4470 = vmatprep.mubr.msk.bf16.mxu1 %vm4497_vm0, %v6611_v60  ;;  %v154_v10 = vld [vmem:[%s6604_s0 + $0x414] sm:$0x3f] }
 0x276   :  { %v6317_v51 = vadd.f32 %v3319_v55, %v3135_v58  ;;  %v3321_v9 = vpop.f32.mrf.mxu1  ;;  %v437_v58 = vunpack.c.l.s8.bf16 %v150_v48 }
 0x277   :  { %v3137_v1 = vpop.f32.mrf.mxu0 }
 0x278   :  { %v3138_v8 = vadd.f32 %v3137_v1, %v5944_v20  ;;  %v3322_v34 = vpop.f32.mrf.mxu1  ;;  %v4322_v1 = vcombine.low %v413_v52, %v421_v30  ;;  %v430_v52 = vunpack.c.h.s8.bf16 %v146_v57 }
 0x279   :  { %v3139_v0 = vpop.f32.mrf.mxu0 }
 0x27a   :  { %v6326_v17 = vadd.f32 %v3322_v34, %v3138_v8  ;;  %v3324_v42 = vpop.f32.mrf.mxu1  ;;  %v4338_v8 = vcombine.high %v429_v39, %v437_v58 }
 0x27b   :  { %v3142_v40 = vpop.f32.mrf.mxu0  ;;  %3551 = vmatmul.mubr.bf16.gmra.mxu0 %v4307_v22 }
 0x27c   :  { %v3143_v20 = vadd.f32 %v3142_v40, %v5955_v5  ;;  %v3327_v7 = vpop.f32.mrf.mxu1  ;;  %4471 = vmatmul.mubr.msk.bf16.gmra.mxu1 %vm2238_vm1, %v4309_v27  ;;  %3558 = vmatprep.mubr.bf16.mxu0 %v4323_v38  ;;  %v4324_v5 = vcombine.low %v414_v26, %v422_v36  ;;  %v158_v27 = vld [vmem:[%s6604_s0 + $0x432] sm:$0x3f]  ;;  %v438_v40 = vunpack.c.h.s8.bf16 %v150_v48  ;;  %v445_v26 = vunpack.c.l.s8.bf16 %v154_v10 }
 0x27d   :  { %v3144_v55 = vpop.f32.mrf.mxu0  ;;  %4474 = vmatprep.mubr.msk.bf16.mxu1 %vm4497_vm0, %v6611_v60  ;;  %v162_v48 = vld [vmem:[%s6604_s0 + $0x450] sm:$0x3f] }
 0x27e   :  { %v6332_v31 = vadd.f32 %v3327_v7, %v3143_v20  ;;  %v3329_v56 = vpop.f32.mrf.mxu1  ;;  %v453_v20 = vunpack.c.l.s8.bf16 %v158_v27 }
 0x27f   :  { %v3145_v9 = vpop.f32.mrf.mxu0 }
 0x280   :  { %v3146_v24 = vadd.f32 %v3145_v9, %v5972_v2  ;;  %v3330_v22 = vpop.f32.mrf.mxu1  ;;  %v4337_v9 = vcombine.low %v429_v39, %v437_v58  ;;  %v446_v39 = vunpack.c.h.s8.bf16 %v154_v10 }
 0x281   :  { %v3147_v34 = vpop.f32.mrf.mxu0 }
 0x282   :  { %v6341_v38 = vadd.f32 %v3330_v22, %v3146_v24  ;;  %v3332_v0 = vpop.f32.mrf.mxu1  ;;  %v4353_v24 = vcombine.high %v445_v26, %v453_v20 }
 0x283   :  { %v3150_v42 = vpop.f32.mrf.mxu0  ;;  %3559 = vmatmul.mubr.bf16.gmra.mxu0 %v4322_v1 }
 0x284   :  { %v3151_v2 = vadd.f32 %v3150_v42, %v5983_v33  ;;  %v3335_v30 = vpop.f32.mrf.mxu1  ;;  %4475 = vmatmul.mubr.msk.bf16.gmra.mxu1 %vm2238_vm1, %v4324_v5  ;;  %3566 = vmatprep.mubr.bf16.mxu0 %v4338_v8  ;;  %v4339_v33 = vcombine.low %v430_v52, %v438_v40  ;;  %v166_v5 = vld [vmem:[%s6604_s0 + $0x46e] sm:$0x3f]  ;;  %v454_v42 = vunpack.c.h.s8.bf16 %v158_v27  ;;  %v461_v52 = vunpack.c.l.s8.bf16 %v162_v48 }
 0x285   :  { %v3152_v7 = vpop.f32.mrf.mxu0  ;;  %4478 = vmatprep.mubr.msk.bf16.mxu1 %vm4497_vm0, %v6611_v60 }
 0x286   :  { %v6347_v36 = vadd.f32 %v3335_v30, %v3151_v2  ;;  %v3337_v55 = vpop.f32.mrf.mxu1  ;;  %v469_v2 = vunpack.c.l.s8.bf16 %v166_v5 }
 0x287   :  { %v3153_v56 = vpop.f32.mrf.mxu0 }
 0x288   :  { %v3154_v57 = vadd.f32 %v3153_v56, %v5998_v28  ;;  %v3338_v1 = vpop.f32.mrf.mxu1  ;;  %v4352_v56 = vcombine.low %v445_v26, %v453_v20 }
 0x289   :  { %v3155_v22 = vpop.f32.mrf.mxu0 }
 0x28a   :  { %v6356_v8 = vadd.f32 %v3338_v1, %v3154_v57  ;;  %v3340_v34 = vpop.f32.mrf.mxu1  ;;  %v4368_v57 = vcombine.high %v461_v52, %v469_v2 }
 0x28b   :  { %v3158_v0 = vpop.f32.mrf.mxu0  ;;  %3567 = vmatmul.mubr.bf16.gmra.mxu0 %v4337_v9 }
 0x28c   :  { %v3159_v28 = vadd.f32 %v3158_v0, %v6007_v61  ;;  %v3343_v58 = vpop.f32.mrf.mxu1  ;;  %4479 = vmatmul.mubr.msk.bf16.gmra.mxu1 %vm2238_vm1, %v4339_v33  ;;  %3574 = vmatprep.mubr.bf16.mxu0 %v4353_v24  ;;  %v4354_v61 = vcombine.low %v446_v39, %v454_v42  ;;  %v462_v0 = vunpack.c.h.s8.bf16 %v162_v48 }
 0x28d   :  { %v3160_v30 = vpop.f32.mrf.mxu0  ;;  %4482 = vmatprep.mubr.msk.bf16.mxu1 %vm4497_vm0, %v6611_v60 }
 0x28e   :  { %v6362_v40 = vadd.f32 %v3343_v58, %v3159_v28  ;;  %v3345_v7 = vpop.f32.mrf.mxu1  ;;  %v470_v28 = vunpack.c.h.s8.bf16 %v166_v5  ;;  %v4367_v58 = vcombine.low %v461_v52, %v469_v2 }
 0x28f   :  { %v3161_v55 = vpop.f32.mrf.mxu0 }
 0x290   :  { %v3162_v10 = vadd.f32 %v3161_v55, %v6022_v59  ;;  %v3346_v9 = vpop.f32.mrf.mxu1  ;;  %v4369_v7 = vcombine.low %v462_v0, %v470_v28 }
 0x291   :  { %v3163_v1 = vpop.f32.mrf.mxu0 }
 0x292   :  { %v6365_v33 = vadd.f32 %v3346_v9, %v3162_v10  ;;  %v3348_v27 = vpop.f32.mrf.mxu1 }
 0x293   :  { %v3166_v24 = vpop.f32.mrf.mxu0  ;;  %3575 = vmatmul.mubr.bf16.gmra.mxu0 %v4352_v56 }
 0x294   :  { %v3167_v22 = vadd.f32 %v3166_v24, %v6031_v62  ;;  %v3351_v34 = vpop.f32.mrf.mxu1  ;;  %4483 = vmatmul.mubr.msk.bf16.gmra.mxu1 %vm2238_vm1, %v4354_v61  ;;  %3582 = vmatprep.mubr.bf16.mxu0 %v4368_v57 }
 0x295   :  { %v3168_v26 = vpop.f32.mrf.mxu0  ;;  %4486 = vmatprep.mubr.msk.bf16.mxu1 %vm4497_vm0, %v6611_v60 }
 0x296   :  { %v6371_v59 = vadd.f32 %v3351_v34, %v3167_v22  ;;  %v3353_v20 = vpop.f32.mrf.mxu1 }
 0x297   :  { %v3169_v39 = vpop.f32.mrf.mxu0 }
 0x298   :  { %v3170_v42 = vadd.f32 %v3169_v39, %v6050_v11  ;;  %v3354_v30 = vpop.f32.mrf.mxu1 }
 0x299   :  { %v3171_v62 = vpop.f32.mrf.mxu0 }
 0x29a   :  { %v6374_v55 = vadd.f32 %v3354_v30, %v3170_v42  ;;  %v3356_v56 = vpop.f32.mrf.mxu1 }
 0x29b   :  { %v3174_v48 = vpop.f32.mrf.mxu0  ;;  %3583 = vmatmul.mubr.bf16.gmra.mxu0 %v4367_v58 }
 0x29c   :  { %v3175_v5 = vadd.f32 %v3174_v48, %v6063_v44  ;;  %v3359_v10 = vpop.f32.mrf.mxu1  ;;  %4487 = vmatmul.mubr.msk.bf16.gmra.mxu1 %vm2238_vm1, %v4369_v7 }
 0x29d   :  { %v3176_v60 = vpop.f32.mrf.mxu0 }
 0x29e   :  { %v6378_v9 = vadd.f32 %v3359_v10, %v3175_v5  ;;  %v3361_v61 = vpop.f32.mrf.mxu1 }
 0x29f   :  { %v3177_v52 = vpop.f32.mrf.mxu0 }
 0x2a0   :  { %v3178_v11 = vadd.f32 %v3177_v52, %v6078_v43  ;;  %v3362_v2 = vpop.f32.mrf.mxu1 }
 0x2a1   :  { %v3179_v57 = vpop.f32.mrf.mxu0 }
 0x2a2   :  { %v6381_v1 = vadd.f32 %v3362_v2, %v3178_v11  ;;  %v3364_v27 = vpop.f32.mrf.mxu1 }
 0x2a3   :  { %v3182_v24 = vpop.f32.mrf.mxu0 }
 0x2a4   :  { %v3183_v22 = vadd.f32 %v3182_v24, %v6092_v63  ;;  %v3367_v34 = vpop.f32.mrf.mxu1 }
 0x2a5   :  { %v3184_v44 = vpop.f32.mrf.mxu0 }
 0x2a6   :  { %v6384_v0 = vadd.f32 %v3367_v34, %v3183_v22  ;;  %v3369_v28 = vpop.f32.mrf.mxu1 }
 0x2a7   :  { %v3185_v26 = vpop.f32.mrf.mxu0 }
 0x2a8   :  { %v3186_v20 = vadd.f32 %v3185_v26, %v6107_v25  ;;  %v3370_v39 = vpop.f32.mrf.mxu1 }
 0x2a9   :  { %v3187_v58 = vpop.f32.mrf.mxu0 }
 0x2aa   :  { %v6387_v42 = vadd.f32 %v3370_v39, %v3186_v20  ;;  %v3372_v43 = vpop.f32.mrf.mxu1 }
 0x2ab   :  { %v3190_v30 = vpop.f32.mrf.mxu0 }
 0x2ac   :  { %v3191_v7 = vadd.f32 %v3190_v30, %v6119_v35  ;;  %v3375_v62 = vpop.f32.mrf.mxu1 }
 0x2ad   :  { %v3192_v56 = vpop.f32.mrf.mxu0 }
 0x2ae   :  { %v6390_v48 = vadd.f32 %v3375_v62, %v3191_v7  ;;  %v3377_v63 = vpop.f32.mrf.mxu1 }
 0x2af   :  { %v3193_v5 = vpop.f32.mrf.mxu0 }
 0x2b0   :  { %v3194_v10 = vadd.f32 %v3193_v5, %v6134_v37  ;;  %v3378_v60 = vpop.f32.mrf.mxu1 }
 0x2b1   :  { %v3195_v61 = vpop.f32.mrf.mxu0 }
 0x2b2   :  { %v6393_v52 = vadd.f32 %v3378_v60, %v3194_v10  ;;  %v3380_v25 = vpop.f32.mrf.mxu1 }
 0x2b3   :  { %v3198_v11 = vpop.f32.mrf.mxu0 }
 0x2b4   :  { %v3199_v2 = vadd.f32 %v3198_v11, %v6146_v12  ;;  %v3383_v57 = vpop.f32.mrf.mxu1 }
 0x2b5   :  { %v3200_v27 = vpop.f32.mrf.mxu0 }
 0x2b6   :  { %v6396_v24 = vadd.f32 %v3383_v57, %v3199_v2  ;;  %v3385_v35 = vpop.f32.mrf.mxu1 }
 0x2b7   :  { %v3201_v22 = vpop.f32.mrf.mxu0 }
 0x2b8   :  { %v3202_v34 = vadd.f32 %v3201_v22, %v6161_v13  ;;  %v3386_v44 = vpop.f32.mrf.mxu1 }
 0x2b9   :  { %v3203_v28 = vpop.f32.mrf.mxu0 }
 0x2ba   :  { %v6399_v26 = vadd.f32 %v3386_v44, %v3202_v34  ;;  %v3388_v37 = vpop.f32.mrf.mxu1  ;;  %v3817_v44 = vpop.permute.xlu0 %3816 }
 0x2bb   :  { %v3206_v20 = vpop.f32.mrf.mxu0 }
 0x2bc   :  { %v3207_v39 = vadd.f32 %v3206_v20, %v6167_v3  ;;  %v3391_v58 = vpop.f32.mrf.mxu1 }
 0x2bd   :  { %v3208_v43 = vpop.f32.mrf.mxu0 }
 0x2be   :  { %v6402_v30 = vadd.f32 %v3391_v58, %v3207_v39  ;;  %v3393_v12 = vpop.f32.mrf.mxu1 }
 0x2bf   :  { %v3209_v7 = vpop.f32.mrf.mxu0 }
 0x2c0   :  { %v3210_v62 = vadd.f32 %v3209_v7, %v6176_v14  ;;  %v3394_v56 = vpop.f32.mrf.mxu1 }
 0x2c1   :  { %v3211_v63 = vpop.f32.mrf.mxu0 }
 0x2c2   :  { %v6405_v5 = vadd.f32 %v3394_v56, %v3210_v62  ;;  %v3396_v13 = vpop.f32.mrf.mxu1  ;;  %v3822_v62 = vpop.permute.xlu0 %3821 }
 0x2c3   :  { %v3214_v10 = vpop.f32.mrf.mxu0 }
 0x2c4   :  { %v3215_v60 = vadd.f32 %v3214_v10, %v6182_v46  ;;  %v3399_v61 = vpop.f32.mrf.mxu1 }
 0x2c5   :  { %v3216_v25 = vpop.f32.mrf.mxu0 }
 0x2c6   :  { %v6408_v11 = vadd.f32 %v3399_v61, %v3215_v60  ;;  %v3401_v3 = vpop.f32.mrf.mxu1  ;;  %v3827_v61 = vpop.permute.xlu1 %3826 }
 0x2c7   :  { %v3217_v2 = vpop.f32.mrf.mxu0 }
 0x2c8   :  { %v3218_v57 = vadd.f32 %v3217_v2, %v6191_v32  ;;  %v3402_v27 = vpop.f32.mrf.mxu1 }
 0x2c9   :  { %v3219_v35 = vpop.f32.mrf.mxu0 }
 0x2ca   :  { %v6411_v22 = vadd.f32 %v3402_v27, %v3218_v57  ;;  %v3404_v14 = vpop.f32.mrf.mxu1 }
 0x2cb   :  { %v3440_v34 = vpop.f32.mrf.mxu0 }
 0x2cc   :  { %v3441_v28 = vadd.f32 %v3440_v34, %v6197_v21  ;;  %v3625_v37 = vpop.f32.mrf.mxu1 }
 0x2cd   :  { %v3442_v20 = vpop.f32.mrf.mxu0 }
 0x2ce   :  { %v3626_v46 = vadd.f32 %v3625_v37, %v3441_v28  ;;  %v4416_v39 = vpop.f32.mrf.mxu1 }
 0x2cf   :  { %v3443_v58 = vpop.f32.mrf.mxu0 }
 0x2d0   :  { %v4004_v43 = vmul.f32 %v3817_v44, %v3626_v46  ;;  %v3444_v12 = vadd.f32 %v3443_v58, %v6206_v19  ;;  %v3628_v7 = vpop.f32.mrf.mxu1  ;;  %v3832_v44 = vpop.permute.xlu1 %3831 }
 0x2d1   :  { %v3445_v32 = vpop.f32.mrf.mxu0 }
 0x2d2   :  { %4043 = vst.msk [vmem:[%s6606_s3] sm:$0xff] %vm4042_vm2, %v4004_v43  ;;  %v3629_v56 = vadd.f32 %v3628_v7, %v3444_v12  ;;  %v4417_v63 = vpop.f32.mrf.mxu1  ;;  %v3837_v43 = vpop.permute.xlu0 %3836 }
 0x2d3   :  { %v3448_v21 = vpop.f32.mrf.mxu0 }
 0x2d4   :  { %v4005_v13 = vmul.f32 %v3822_v62, %v3629_v56  ;;  %v3449_v10 = vadd.f32 %v3448_v21, %v6212_v41  ;;  %v3633_v60 = vpop.f32.mrf.mxu1  ;;  %v3842_v21 = vpop.permute.xlu1 %3841 }
 0x2d5   :  { %v3450_v25 = vpop.f32.mrf.mxu0 }
 0x2d6   :  { %4044 = vst.msk [vmem:[%s6606_s3 + $0x8] sm:$0xff] %vm4042_vm2, %v4005_v13  ;;  %v3634_v19 = vadd.f32 %v3633_v60, %v3449_v10  ;;  %v4420_v3 = vpop.f32.mrf.mxu1 }
 0x2d7   :  { %v3451_v2 = vpop.f32.mrf.mxu0  ;;  %v3847_v3 = vpop.permute.xlu0 %3846 }
 0x2d8   :  { %v4006_v57 = vmul.f32 %v3827_v61, %v3634_v19  ;;  %v3452_v27 = vadd.f32 %v3451_v2, %v6221_v23  ;;  %v3636_v35 = vpop.f32.mrf.mxu1 }
 0x2d9   :  { %v3453_v14 = vpop.f32.mrf.mxu0 }
 0x2da   :  { %4045 = vst.msk [vmem:[%s6606_s3 + $0x10] sm:$0xff] %vm4042_vm2, %v4006_v57  ;;  %v3637_v41 = vadd.f32 %v3636_v35, %v3452_v27  ;;  %v4421_v34 = vpop.f32.mrf.mxu1 }
 0x2db   :  { %v3456_v28 = vpop.f32.mrf.mxu0  ;;  %v3852_v34 = vpop.permute.xlu1 %3851 }
 0x2dc   :  { %v4007_v37 = vmul.f32 %v3832_v44, %v3637_v41  ;;  %v3457_v20 = vadd.f32 %v3456_v28, %v6227_v4  ;;  %v3641_v46 = vpop.f32.mrf.mxu1 }
 0x2dd   :  { %v3458_v39 = vpop.f32.mrf.mxu0 }
 0x2de   :  { %4046 = vst.msk [vmem:[%s6606_s3 + $0x18] sm:$0xff] %vm4042_vm2, %v4007_v37  ;;  %v3642_v23 = vadd.f32 %v3641_v46, %v3457_v20  ;;  %v4424_v58 = vpop.f32.mrf.mxu1 }
 0x2df   :  { %v3459_v12 = vpop.f32.mrf.mxu0 }
 0x2e0   :  { %v4008_v7 = vmul.f32 %v3837_v43, %v3642_v23  ;;  %v3460_v32 = vadd.f32 %v3459_v12, %v6236_v6  ;;  %v3644_v62 = vpop.f32.mrf.mxu1  ;;  %v3857_v23 = vpop.permute.xlu0 %3856 }
 0x2e1   :  { %v3461_v56 = vpop.f32.mrf.mxu0 }
 0x2e2   :  { %4047 = vst.msk [vmem:[%s6606_s3 + $0x20] sm:$0xff] %vm4042_vm2, %v4008_v7  ;;  %v3645_v4 = vadd.f32 %v3644_v62, %v3460_v32  ;;  %v4425_v63 = vpop.f32.mrf.mxu1  ;;  %v3862_v56 = vpop.permute.xlu1 %3861 }
 0x2e3   :  { %v3464_v13 = vpop.f32.mrf.mxu0 }
 0x2e4   :  { %v4009_v10 = vmul.f32 %v3842_v21, %v3645_v4  ;;  %v3465_v60 = vadd.f32 %v3464_v13, %v6242_v49  ;;  %v3649_v61 = vpop.f32.mrf.mxu1 }
 0x2e5   :  { %v3466_v25 = vpop.f32.mrf.mxu0 }
 0x2e6   :  { %4048 = vst.msk [vmem:[%s6606_s3 + $0x28] sm:$0xff] %vm4042_vm2, %v4009_v10  ;;  %v3650_v6 = vadd.f32 %v3649_v61, %v3465_v60  ;;  %v4428_v19 = vpop.f32.mrf.mxu1  ;;  %v3867_v61 = vpop.permute.xlu0 %3866 }
 0x2e7   :  { %v3467_v2 = vpop.f32.mrf.mxu0 }
 0x2e8   :  { %v4010_v57 = vmul.f32 %v3847_v3, %v3650_v6  ;;  %v3468_v27 = vadd.f32 %v3467_v2, %v6251_v16  ;;  %v3652_v35 = vpop.f32.mrf.mxu1 }
 0x2e9   :  { %v3469_v14 = vpop.f32.mrf.mxu0 }
 0x2ea   :  { %4049 = vst.msk [vmem:[%s6606_s3 + $0x30] sm:$0xff] %vm4042_vm2, %v4010_v57  ;;  %v3653_v49 = vadd.f32 %v3652_v35, %v3468_v27  ;;  %v4429_v41 = vpop.f32.mrf.mxu1  ;;  %v3872_v27 = vpop.permute.xlu1 %3871 }
 0x2eb   :  { %v3472_v44 = vpop.f32.mrf.mxu0 }
 0x2ec   :  { %v4011_v28 = vmul.f32 %v3852_v34, %v3653_v49  ;;  %v3473_v37 = vadd.f32 %v3472_v44, %v6257_v15  ;;  %v3657_v20 = vpop.f32.mrf.mxu1 }
 0x2ed   :  { %v3474_v46 = vpop.f32.mrf.mxu0 }
 0x2ee   :  { %4050 = vst.msk [vmem:[%s6606_s3 + $0x38] sm:$0xff] %vm4042_vm2, %v4011_v28  ;;  %v3658_v16 = vadd.f32 %v3657_v20, %v3473_v37  ;;  %v4432_v39 = vpop.f32.mrf.mxu1  ;;  %v3877_v28 = vpop.permute.xlu0 %3876 }
 0x2ef   :  { %v3475_v58 = vpop.f32.mrf.mxu0 }
 0x2f0   :  { %v4012_v43 = vmul.f32 %v3857_v23, %v3658_v16  ;;  %v3476_v12 = vadd.f32 %v3475_v58, %v6266_v53  ;;  %v3660_v7 = vpop.f32.mrf.mxu1  ;;  %v3882_v58 = vpop.permute.xlu1 %3881 }
 0x2f1   :  { %v3477_v32 = vpop.f32.mrf.mxu0 }
 0x2f2   :  { %4051 = vst.msk [vmem:[%s6606_s3 + $0x40] sm:$0xff] %vm4042_vm2, %v4012_v43  ;;  %v3661_v15 = vadd.f32 %v3660_v7, %v3476_v12  ;;  %v4433_v62 = vpop.f32.mrf.mxu1 }
 0x2f3   :  { %v3480_v4 = vpop.f32.mrf.mxu0 }
 0x2f4   :  { %v4013_v63 = vmul.f32 %v3862_v56, %v3661_v15  ;;  %v3481_v21 = vadd.f32 %v3480_v4, %v6272_v45  ;;  %v3665_v13 = vpop.f32.mrf.mxu1  ;;  %v3887_v56 = vpop.permute.xlu0 %3886 }
 0x2f5   :  { %v3482_v10 = vpop.f32.mrf.mxu0 }
 0x2f6   :  { %4052 = vst.msk [vmem:[%s6606_s3 + $0x48] sm:$0xff] %vm4042_vm2, %v4013_v63  ;;  %v3666_v53 = vadd.f32 %v3665_v13, %v3481_v21  ;;  %v4436_v60 = vpop.f32.mrf.mxu1 }
 0x2f7   :  { %v3483_v25 = vpop.f32.mrf.mxu0  ;;  %v3892_v60 = vpop.permute.xlu1 %3891 }
 0x2f8   :  { %v4014_v6 = vmul.f32 %v3867_v61, %v3666_v53  ;;  %v3484_v19 = vadd.f32 %v3483_v25, %v6281_v18  ;;  %v3668_v3 = vpop.f32.mrf.mxu1 }
 0x2f9   :  { %v3485_v2 = vpop.f32.mrf.mxu0 }
 0x2fa   :  { %4053 = vst.msk [vmem:[%s6606_s3 + $0x50] sm:$0xff] %vm4042_vm2, %v4014_v6  ;;  %v3669_v45 = vadd.f32 %v3668_v3, %v3484_v19  ;;  %v4437_v57 = vpop.f32.mrf.mxu1 }
 0x2fb   :  { %v3488_v35 = vpop.f32.mrf.mxu0 }
 0x2fc   :  { %v4015_v14 = vmul.f32 %v3872_v27, %v3669_v45  ;;  %v3489_v49 = vadd.f32 %v3488_v35, %v6287_v54  ;;  %v3673_v41 = vpop.f32.mrf.mxu1  ;;  %v3897_v45 = vpop.permute.xlu0 %3896 }
 0x2fd   :  { %v3490_v34 = vpop.f32.mrf.mxu0 }
 0x2fe   :  { %4054 = vst.msk [vmem:[%s6606_s3 + $0x58] sm:$0xff] %vm4042_vm2, %v4015_v14  ;;  %v3674_v18 = vadd.f32 %v3673_v41, %v3489_v49  ;;  %v4440_v44 = vpop.f32.mrf.mxu1  ;;  %v3902_v34 = vpop.permute.xlu1 %3901 }
 0x2ff   :  { %v3491_v37 = vpop.f32.mrf.mxu0 }
 0x300   :  { %v4016_v20 = vmul.f32 %v3877_v28, %v3674_v18  ;;  %v3492_v46 = vadd.f32 %v3491_v37, %v6296_v47  ;;  %v3676_v16 = vpop.f32.mrf.mxu1 }
 0x301   :  { %v3493_v39 = vpop.f32.mrf.mxu0 }
 0x302   :  { %4055 = vst.msk [vmem:[%s6606_s3 + $0x60] sm:$0xff] %vm4042_vm2, %v4016_v20  ;;  %v3677_v54 = vadd.f32 %v3676_v16, %v3492_v46  ;;  %v4441_v23 = vpop.f32.mrf.mxu1  ;;  %v3907_v16 = vpop.permute.xlu0 %3906 }
 0x303   :  { %v3496_v43 = vpop.f32.mrf.mxu0 }
 0x304   :  { %v4017_v12 = vmul.f32 %v3882_v58, %v3677_v54  ;;  %v3497_v7 = vadd.f32 %v3496_v43, %v6302_v50  ;;  %v3681_v32 = vpop.f32.mrf.mxu1 }
 0x305   :  { %v3498_v15 = vpop.f32.mrf.mxu0 }
 0x306   :  { %4056 = vst.msk [vmem:[%s6606_s3 + $0x68] sm:$0xff] %vm4042_vm2, %v4017_v12  ;;  %v3682_v47 = vadd.f32 %v3681_v32, %v3497_v7  ;;  %v4444_v62 = vpop.f32.mrf.mxu1  ;;  %v3912_v7 = vpop.permute.xlu1 %3911 }
 0x307   :  { %v3499_v4 = vpop.f32.mrf.mxu0 }
 0x308   :  { %v4018_v63 = vmul.f32 %v3887_v56, %v3682_v47  ;;  %v3500_v21 = vadd.f32 %v3499_v4, %v6311_v29  ;;  %v3684_v13 = vpop.f32.mrf.mxu1 }
 0x309   :  { %v3501_v10 = vpop.f32.mrf.mxu0 }
 0x30a   :  { %4057 = vst.msk [vmem:[%s6606_s3 + $0x70] sm:$0xff] %vm4042_vm2, %v4018_v63  ;;  %v3685_v50 = vadd.f32 %v3684_v13, %v3500_v21  ;;  %v4445_v53 = vpop.f32.mrf.mxu1  ;;  %v3917_v63 = vpop.permute.xlu0 %3916 }
 0x30b   :  { %v3504_v61 = vpop.f32.mrf.mxu0 }
 0x30c   :  { %v4019_v25 = vmul.f32 %v3892_v60, %v3685_v50  ;;  %v3505_v6 = vadd.f32 %v3504_v61, %v6317_v51  ;;  %v3689_v19 = vpop.f32.mrf.mxu1  ;;  %v3922_v61 = vpop.permute.xlu1 %3921 }
 0x30d   :  { %v3506_v3 = vpop.f32.mrf.mxu0 }
 0x30e   :  { %4058 = vst.msk [vmem:[%s6606_s3 + $0x78] sm:$0xff] %vm4042_vm2, %v4019_v25  ;;  %v3690_v29 = vadd.f32 %v3689_v19, %v3505_v6  ;;  %v4448_v2 = vpop.f32.mrf.mxu1 }
 0x30f   :  { %v3507_v57 = vpop.f32.mrf.mxu0 }
 0x310   :  { %v4020_v27 = vmul.f32 %v3897_v45, %v3690_v29  ;;  %v3508_v35 = vadd.f32 %v3507_v57, %v6326_v17  ;;  %v3692_v14 = vpop.f32.mrf.mxu1  ;;  %v3927_v45 = vpop.permute.xlu0 %3926 }
 0x311   :  { %v3509_v49 = vpop.f32.mrf.mxu0 }
 0x312   :  { %4059 = vst.msk [vmem:[%s6606_s3 + $0x80] sm:$0xff] %vm4042_vm2, %v4020_v27  ;;  %v3693_v51 = vadd.f32 %v3692_v14, %v3508_v35  ;;  %v4449_v41 = vpop.f32.mrf.mxu1 }
 0x313   :  { %v3512_v18 = vpop.f32.mrf.mxu0  ;;  %v3932_v41 = vpop.permute.xlu1 %3931 }
 0x314   :  { %v4021_v44 = vmul.f32 %v3902_v34, %v3693_v51  ;;  %v3513_v28 = vadd.f32 %v3512_v18, %v6332_v31  ;;  %v3697_v37 = vpop.f32.mrf.mxu1 }
 0x315   :  { %v3514_v20 = vpop.f32.mrf.mxu0 }
 0x316   :  { %4060 = vst.msk [vmem:[%s6606_s3 + $0x88] sm:$0xff] %vm4042_vm2, %v4021_v44  ;;  %v3698_v17 = vadd.f32 %v3697_v37, %v3513_v28  ;;  %v4452_v46 = vpop.f32.mrf.mxu1 }
 0x317   :  { %v3515_v39 = vpop.f32.mrf.mxu0 }
 0x318   :  { %v4022_v54 = vmul.f32 %v3907_v16, %v3698_v17  ;;  %v3516_v23 = vadd.f32 %v3515_v39, %v6341_v38  ;;  %v3700_v58 = vpop.f32.mrf.mxu1  ;;  %v3937_v17 = vpop.permute.xlu0 %3936 }
 0x319   :  { %v3517_v43 = vpop.f32.mrf.mxu0 }
 0x31a   :  { %4061 = vst.msk [vmem:[%s6606_s3 + $0x90] sm:$0xff] %vm4042_vm2, %v4022_v54  ;;  %v3701_v31 = vadd.f32 %v3700_v58, %v3516_v23  ;;  %v4453_v12 = vpop.f32.mrf.mxu1  ;;  %v3942_v43 = vpop.permute.xlu1 %3941 }
 0x31b   :  { %v3520_v32 = vpop.f32.mrf.mxu0 }
 0x31c   :  { %v4023_v15 = vmul.f32 %v3912_v7, %v3701_v31  ;;  %v3521_v47 = vadd.f32 %v3520_v32, %v6347_v36  ;;  %v3705_v62 = vpop.f32.mrf.mxu1 }
 0x31d   :  { %v3522_v56 = vpop.f32.mrf.mxu0 }
 0x31e   :  { %4062 = vst.msk [vmem:[%s6606_s3 + $0x98] sm:$0xff] %vm4042_vm2, %v4023_v15  ;;  %v3706_v38 = vadd.f32 %v3705_v62, %v3521_v47  ;;  %v4456_v4 = vpop.f32.mrf.mxu1  ;;  %v3947_v62 = vpop.permute.xlu0 %3946 }
 0x31f   :  { %v3523_v21 = vpop.f32.mrf.mxu0 }
 0x320   :  { %v4024_v13 = vmul.f32 %v3917_v63, %v3706_v38  ;;  %v3524_v10 = vadd.f32 %v3523_v21, %v6356_v8  ;;  %v3708_v50 = vpop.f32.mrf.mxu1 }
 0x321   :  { %v3525_v53 = vpop.f32.mrf.mxu0 }
 0x322   :  { %4063 = vst.msk [vmem:[%s6606_s3 + $0xa0] sm:$0xff] %vm4042_vm2, %v4024_v13  ;;  %v3709_v36 = vadd.f32 %v3708_v50, %v3524_v10  ;;  %v4457_v60 = vpop.f32.mrf.mxu1  ;;  %v3952_v10 = vpop.permute.xlu1 %3951 }
 0x323   :  { %v3528_v25 = vpop.f32.mrf.mxu0 }
 0x324   :  { %v4025_v6 = vmul.f32 %v3922_v61, %v3709_v36  ;;  %v3529_v19 = vadd.f32 %v3528_v25, %v6362_v40  ;;  %v3713_v3 = vpop.f32.mrf.mxu1 }
 0x325   :  { %v3530_v29 = vpop.f32.mrf.mxu0 }
 0x326   :  { %4064 = vst.msk [vmem:[%s6606_s3 + $0xa8] sm:$0xff] %vm4042_vm2, %v4025_v6  ;;  %v3714_v8 = vadd.f32 %v3713_v3, %v3529_v19  ;;  %v4460_v2 = vpop.f32.mrf.mxu1  ;;  %v3957_v6 = vpop.permute.xlu0 %3956 }
 0x327   :  { %v3531_v57 = vpop.f32.mrf.mxu0 }
 0x328   :  { %v4026_v27 = vmul.f32 %v3927_v45, %v3714_v8  ;;  %v3532_v35 = vadd.f32 %v3531_v57, %v6365_v33  ;;  %v3716_v14 = vpop.f32.mrf.mxu1  ;;  %v3962_v57 = vpop.permute.xlu1 %3961 }
 0x329   :  { %v3533_v49 = vpop.f32.mrf.mxu0 }
 0x32a   :  { %4065 = vst.msk [vmem:[%s6606_s3 + $0xb0] sm:$0xff] %vm4042_vm2, %v4026_v27  ;;  %v3717_v40 = vadd.f32 %v3716_v14, %v3532_v35  ;;  %v4461_v51 = vpop.f32.mrf.mxu1 }
 0x32b   :  { %v3536_v34 = vpop.f32.mrf.mxu0 }
 0x32c   :  { %v4027_v18 = vmul.f32 %v3932_v41, %v3717_v40  ;;  %v3537_v44 = vadd.f32 %v3536_v34, %v6371_v59  ;;  %v3721_v28 = vpop.f32.mrf.mxu1  ;;  %v3967_v41 = vpop.permute.xlu0 %3966 }
 0x32d   :  { %v3538_v37 = vpop.f32.mrf.mxu0 }
 0x32e   :  { %4066 = vst.msk [vmem:[%s6606_s3 + $0xb8] sm:$0xff] %vm4042_vm2, %v4027_v18  ;;  %v3722_v33 = vadd.f32 %v3721_v28, %v3537_v44  ;;  %v4464_v20 = vpop.f32.mrf.mxu1 }
 0x32f   :  { %v3539_v46 = vpop.f32.mrf.mxu0  ;;  %v3972_v20 = vpop.permute.xlu1 %3971 }
 0x330   :  { %v4028_v16 = vmul.f32 %v3937_v17, %v3722_v33  ;;  %v3540_v39 = vadd.f32 %v3539_v46, %v6374_v55  ;;  %v3724_v54 = vpop.f32.mrf.mxu1 }
 0x331   :  { %v3541_v23 = vpop.f32.mrf.mxu0 }
 0x332   :  { %4067 = vst.msk [vmem:[%s6606_s3 + $0xc0] sm:$0xff] %vm4042_vm2, %v4028_v16  ;;  %v3725_v59 = vadd.f32 %v3724_v54, %v3540_v39  ;;  %v4465_v58 = vpop.f32.mrf.mxu1 }
 0x333   :  { %v3544_v31 = vpop.f32.mrf.mxu0 }
 0x334   :  { %v4029_v12 = vmul.f32 %v3942_v43, %v3725_v59  ;;  %v3545_v7 = vadd.f32 %v3544_v31, %v6378_v9  ;;  %v3729_v32 = vpop.f32.mrf.mxu1  ;;  %v3977_v59 = vpop.permute.xlu0 %3976 }
 0x335   :  { %v3546_v15 = vpop.f32.mrf.mxu0 }
 0x336   :  { %4068 = vst.msk [vmem:[%s6606_s3 + $0xc8] sm:$0xff] %vm4042_vm2, %v4029_v12  ;;  %v3730_v55 = vadd.f32 %v3729_v32, %v3545_v7  ;;  %v4468_v47 = vpop.f32.mrf.mxu1  ;;  %v3982_v15 = vpop.permute.xlu1 %3981 }
 0x337   :  { %v3547_v56 = vpop.f32.mrf.mxu0 }
 0x338   :  { %v4030_v38 = vmul.f32 %v3947_v62, %v3730_v55  ;;  %v3548_v4 = vadd.f32 %v3547_v56, %v6381_v1  ;;  %v3732_v63 = vpop.f32.mrf.mxu1 }
 0x339   :  { %v3549_v21 = vpop.f32.mrf.mxu0 }
 0x33a   :  { %4069 = vst.msk [vmem:[%s6606_s3 + $0xd0] sm:$0xff] %vm4042_vm2, %v4030_v38  ;;  %v3733_v9 = vadd.f32 %v3732_v63, %v3548_v4  ;;  %v4469_v13 = vpop.f32.mrf.mxu1  ;;  %v3987_v63 = vpop.permute.xlu0 %3986 }
 0x33b   :  { %v3552_v50 = vpop.f32.mrf.mxu0 }
 0x33c   :  { %v4031_v53 = vmul.f32 %v3952_v10, %v3733_v9  ;;  %v3553_v36 = vadd.f32 %v3552_v50, %v6384_v0  ;;  %v3737_v60 = vpop.f32.mrf.mxu1 }
 0x33d   :  { %v3554_v61 = vpop.f32.mrf.mxu0 }
 0x33e   :  { %4070 = vst.msk [vmem:[%s6606_s3 + $0xd8] sm:$0xff] %vm4042_vm2, %v4031_v53  ;;  %v3738_v1 = vadd.f32 %v3737_v60, %v3553_v36  ;;  %v4472_v25 = vpop.f32.mrf.mxu1  ;;  %v3992_v36 = vpop.permute.xlu1 %3991 }
 0x33f   :  { %v3555_v19 = vpop.f32.mrf.mxu0 }
 0x340   :  { %v4032_v3 = vmul.f32 %v3957_v6, %v3738_v1  ;;  %v3556_v29 = vadd.f32 %v3555_v19, %v6387_v42  ;;  %v3740_v8 = vpop.f32.mrf.mxu1 }
 0x341   :  { %v3557_v2 = vpop.f32.mrf.mxu0 }
 0x342   :  { %4071 = vst.msk [vmem:[%s6606_s3 + $0xe0] sm:$0xff] %vm4042_vm2, %v4032_v3  ;;  %v3741_v0 = vadd.f32 %v3740_v8, %v3556_v29  ;;  %v4473_v45 = vpop.f32.mrf.mxu1  ;;  %v3997_v3 = vpop.permute.xlu0 %3996 }
 0x343   :  { %v3560_v27 = vpop.f32.mrf.mxu0 }
 0x344   :  { %v4033_v35 = vmul.f32 %v3962_v57, %v3741_v0  ;;  %v3561_v14 = vadd.f32 %v3560_v27, %v6390_v48  ;;  %v3745_v49 = vpop.f32.mrf.mxu1  ;;  %v4002_v27 = vpop.permute.xlu1 %4001 }
 0x345   :  { %v3562_v40 = vpop.f32.mrf.mxu0 }
 0x346   :  { %4072 = vst.msk [vmem:[%s6606_s3 + $0xe8] sm:$0xff] %vm4042_vm2, %v4033_v35  ;;  %v3746_v42 = vadd.f32 %v3745_v49, %v3561_v14  ;;  %v4476_v51 = vpop.f32.mrf.mxu1 }
 0x347   :  { %v3563_v34 = vpop.f32.mrf.mxu0 }
 0x348   :  { %v4034_v18 = vmul.f32 %v3967_v41, %v3746_v42  ;;  %v3564_v44 = vadd.f32 %v3563_v34, %v6393_v52  ;;  %v3748_v28 = vpop.f32.mrf.mxu1 }
 0x349   :  { %v3565_v37 = vpop.f32.mrf.mxu0 }
 0x34a   :  { %4073 = vst.msk [vmem:[%s6606_s3 + $0xf0] sm:$0xff] %vm4042_vm2, %v4034_v18  ;;  %v3749_v48 = vadd.f32 %v3748_v28, %v3564_v44  ;;  %v4477_v33 = vpop.f32.mrf.mxu1 }
 0x34b   :  { %v3568_v17 = vpop.f32.mrf.mxu0 }
 0x34c   :  { %v4035_v46 = vmul.f32 %v3972_v20, %v3749_v48  ;;  %v3569_v16 = vadd.f32 %v3568_v17, %v6396_v24  ;;  %v3753_v39 = vpop.f32.mrf.mxu1 }
 0x34d   :  { %v3570_v54 = vpop.f32.mrf.mxu0 }
 0x34e   :  { %4074 = vst.msk [vmem:[%s6606_s3 + $0xf8] sm:$0xff] %vm4042_vm2, %v4035_v46  ;;  %v3754_v52 = vadd.f32 %v3753_v39, %v3569_v16  ;;  %v4480_v23 = vpop.f32.mrf.mxu1 }
 0x34f   :  { %v3571_v58 = vpop.f32.mrf.mxu0 }
 0x350   :  { %v4036_v43 = vmul.f32 %v3977_v59, %v3754_v52  ;;  %v3572_v31 = vadd.f32 %v3571_v58, %v6399_v26  ;;  %v3756_v12 = vpop.f32.mrf.mxu1 }
 0x351   :  { %v3573_v7 = vpop.f32.mrf.mxu0 }
 0x352   :  { %4075 = vst.msk [vmem:[%s6606_s3 + $0x100] sm:$0xff] %vm4042_vm2, %v4036_v43  ;;  %v3757_v24 = vadd.f32 %v3756_v12, %v3572_v31  ;;  %v4481_v32 = vpop.f32.mrf.mxu1 }
 0x353   :  { %v3576_v55 = vpop.f32.mrf.mxu0 }
 0x354   :  { %v4037_v47 = vmul.f32 %v3982_v15, %v3757_v24  ;;  %v3577_v62 = vadd.f32 %v3576_v55, %v6402_v30  ;;  %v3761_v56 = vpop.f32.mrf.mxu1 }
 0x355   :  { %v3578_v38 = vpop.f32.mrf.mxu0 }
 0x356   :  { %4076 = vst.msk [vmem:[%s6606_s3 + $0x108] sm:$0xff] %vm4042_vm2, %v4037_v47  ;;  %v3762_v26 = vadd.f32 %v3761_v56, %v3577_v62  ;;  %v4484_v4 = vpop.f32.mrf.mxu1 }
 0x357   :  { %v3579_v21 = vpop.f32.mrf.mxu0 }
 0x358   :  { %v4038_v9 = vmul.f32 %v3987_v63, %v3762_v26  ;;  %v3580_v13 = vadd.f32 %v3579_v21, %v6405_v5  ;;  %v3764_v10 = vpop.f32.mrf.mxu1 }
 0x359   :  { %v3581_v50 = vpop.f32.mrf.mxu0 }
 0x35a   :  { %4077 = vst.msk [vmem:[%s6606_s3 + $0x110] sm:$0xff] %vm4042_vm2, %v4038_v9  ;;  %v3765_v30 = vadd.f32 %v3764_v10, %v3580_v13  ;;  %v4485_v53 = vpop.f32.mrf.mxu1 }
 0x35b   :  { %v3584_v60 = vpop.f32.mrf.mxu0 }
 0x35c   :  { %v4039_v61 = vmul.f32 %v3992_v36, %v3765_v30  ;;  %v3585_v1 = vadd.f32 %v3584_v60, %v6408_v11  ;;  %v3769_v25 = vpop.f32.mrf.mxu1 }
 0x35d   :  { %v3586_v6 = vpop.f32.mrf.mxu0 }
 0x35e   :  { %4078 = vst.msk [vmem:[%s6606_s3 + $0x118] sm:$0xff] %vm4042_vm2, %v4039_v61  ;;  %v3770_v5 = vadd.f32 %v3769_v25, %v3585_v1  ;;  %v4488_v19 = vpop.f32.mrf.mxu1 }
 0x35f   :  { %v3587_v29 = vpop.f32.mrf.mxu0 }
 0x360   :  { %v4040_v8 = vmul.f32 %v3997_v3, %v3770_v5  ;;  %v3588_v2 = vadd.f32 %v3587_v29, %v6411_v22  ;;  %v3772_v0 = vpop.f32.mrf.mxu1 }
 0x361   :  { %v3589_v45 = vpop.f32.mrf.mxu0 }
 0x362   :  { %4079 = vst.msk [vmem:[%s6606_s3 + $0x120] sm:$0xff] %vm4042_vm2, %v4040_v8  ;;  %v3773_v11 = vadd.f32 %v3772_v0, %v3588_v2  ;;  %v4489_v57 = vpop.f32.mrf.mxu1 }
 0x364   :  { %v4041_v35 = vmul.f32 %v4002_v27, %v3773_v11 }
 0x366   :  { %4080 = vst.msk [vmem:[%s6606_s3 + $0x128] sm:$0xff] %vm4042_vm2, %v4041_v35 }

</bundles_post_ra>
